<compile_context>
chip_gen: v7x
topology: tpu7x:2x2x1
jax: 0.10.0
libtpu: 0.0.40
codegen_flags: <defaults>
</compile_context>

<pallas_src>
import math

import jax
import jax.numpy as jnp
from jax import lax
from jax.experimental import pallas as pl
from jax.experimental.pallas import tpu as pltpu


# ------------------------- configuration (small) -------------------------
B = 2            # batch
C_IN = 3         # input channels
IMG = 16         # image height/width
K, S, P = 3, 2, 1                 # tokenizer conv kernel / stride / padding
POOL_K, POOL_S, POOL_P = 3, 2, 1  # tokenizer maxpool
EMB = 32         # embedding dim
HEADS = 4        # attention heads
LAYERS = 2       # transformer encoder layers
FF = 64          # mlp hidden (mlp_ratio = 2.0)
CLASSES = 10     # num classes
OUT_PAD = 128    # lane-dense logits width written by the kernel

H_CONV = (IMG + 2 * P - K) // S + 1                       # 8
H_POOL = (H_CONV + 2 * POOL_P - POOL_K) // POOL_S + 1     # 4
SEQ = H_POOL * H_POOL                                     # 16 tokens per image
DH = EMB // HEADS                                         # 8
PATCH = C_IN * K * K                                      # 27
N_OFF = POOL_K * POOL_K                                   # 9 pool-window offsets
TOK_ROWS = B * SEQ                                        # 32 image-token rows
N_ROWS = TOK_ROWS + B                                     # 34 rows (class tokens last)

F32 = jnp.float32


# ------------------------------ fused kernel ------------------------------
def _fused_kernel(
    patches_ref,                       # (N_OFF*TOK_ROWS, PATCH) im2col, pool-offset-major
    conv_w_ref,                        # (PATCH, EMB)
    base_ref,                          # (N_ROWS, EMB) pos-emb rows; last B rows = cls + pos[0]
    mask_ref,                          # (N_ROWS, N_ROWS) additive block-diagonal mask
    qkv_w_ref,                         # (LAYERS, EMB, 3*EMB)  (Q columns pre-scaled)
    proj_w_ref,                        # (LAYERS, EMB, EMB)    rows ordered (head, dh)
    proj_b_ref,                        # (LAYERS, 1, EMB)
    ln1_g_ref, ln1_b_ref,              # (LAYERS, 1, EMB)
    ln2_g_ref, ln2_b_ref,              # (LAYERS, 1, EMB)
    fc1_w_ref, fc1_b_ref,              # (LAYERS, EMB, FF), (LAYERS, 1, FF)
    fc2_w_ref, fc2_b_ref,              # (LAYERS, FF, EMB), (LAYERS, 1, EMB)
    norm_g_ref, norm_b_ref,            # (1, EMB)
    fc_w_ref, fc_b_ref,                # (EMB, OUT_PAD), (1, OUT_PAD)
    out_ref,                           # (B, OUT_PAD)
):
    def ln(v, g, b):
        mu = jnp.mean(v, axis=-1, keepdims=True)
        d = v - mu
        var = jnp.mean(d * d, axis=-1, keepdims=True)
        return d * lax.rsqrt(var + 1e-5) * g + b

    def gelu(v):
        # exact (erf) GELU, matching torch.nn.functional.gelu default
        return 0.5 * v * (1.0 + lax.erf(v * 0.7071067811865476))

    # ---- tokenizer: conv(no bias) + ReLU + maxpool, fused as matmul + tree-max ----
    y = jnp.dot(patches_ref[...], conv_w_ref[...], preferred_element_type=F32)   # (288, EMB)
    y = jnp.maximum(y, 0.0)
    parts = [y[d * TOK_ROWS:(d + 1) * TOK_ROWS] for d in range(N_OFF)]
    while len(parts) > 1:                                   # pairwise max tree (depth ~4)
        nxt = [jnp.maximum(parts[i], parts[i + 1]) for i in range(0, len(parts) - 1, 2)]
        if len(parts) % 2:
            nxt.append(parts[-1])
        parts = nxt
    tok = parts[0]                                           # (TOK_ROWS, EMB)

    # ---- tokens + positional embedding; class tokens are the LAST B rows (in registers) ----
    x = jnp.concatenate([tok, jnp.zeros((B, EMB), F32)], axis=0) + base_ref[...]  # (N_ROWS, EMB)

    mask = mask_ref[...]
    for li in range(LAYERS):
        # --- attention branch (pre-LN); fused QKV, per-head softmax, fused output proj ---
        h = ln(x, ln1_g_ref[li], ln1_b_ref[li])
        qkv = jnp.dot(h, qkv_w_ref[li], preferred_element_type=F32)               # (N_ROWS, 3*EMB)
        outs = []
        for hd in range(HEADS):
            q = qkv[:, hd * DH:(hd + 1) * DH]                                     # scale pre-folded
            k = qkv[:, EMB + hd * DH:EMB + (hd + 1) * DH]
            v = qkv[:, 2 * EMB + hd * DH:2 * EMB + (hd + 1) * DH]
            s = lax.dot_general(q, k, (((1,), (1,)), ((), ())),
                                preferred_element_type=F32) + mask                # (N_ROWS, N_ROWS)
            s = s - jnp.max(s, axis=-1, keepdims=True)
            p = jnp.exp(s)
            p = p / jnp.sum(p, axis=-1, keepdims=True)
            outs.append(jnp.dot(p, v, preferred_element_type=F32))                # (N_ROWS, DH)
        o_cat = jnp.concatenate(outs, axis=-1)                                     # (N_ROWS, EMB)
        x = x + jnp.dot(o_cat, proj_w_ref[li], preferred_element_type=F32) + proj_b_ref[li]

        # --- MLP branch (pre-LN) ---
        h = ln(x, ln2_g_ref[li], ln2_b_ref[li])
        f = jnp.dot(h, fc1_w_ref[li], preferred_element_type=F32) + fc1_b_ref[li]
        f = gelu(f)
        x = x + jnp.dot(f, fc2_w_ref[li], preferred_element_type=F32) + fc2_b_ref[li]

    # ---- final LayerNorm on the class-token rows + lane-dense fc head ----
    cls = ln(x[TOK_ROWS:N_ROWS, :], norm_g_ref[...], norm_b_ref[...])              # (B, EMB)
    out_ref[...] = jnp.dot(cls, fc_w_ref[...], preferred_element_type=F32) + fc_b_ref[...]


# ------------------------- host-side input / weight prep -------------------------
def _build_pool_patches(x):
    """im2col patches gathered per maxpool-window offset: (N_OFF*B*SEQ, PATCH).

    Row d*(B*SEQ) + b*SEQ + ph*H_POOL + pw holds the conv im2col patch of image b at
    conv position (2*ph-1+dh, 2*pw-1+dw), d = dh*POOL_K+dw; out-of-range positions are
    zero patches (safe: post-ReLU conv output is >= 0, so the max ignores them).
    """
    b = x.shape[0]
    xp = jnp.pad(x, ((0, 0), (0, 0), (P, P), (P, P)))                           # (B, C, 18, 18)
    cols = []
    for kh in range(K):
        for kw in range(K):
            cols.append(xp[:, :, kh:kh + S * (H_CONV - 1) + 1:S,
                               kw:kw + S * (H_CONV - 1) + 1:S])                 # (B, C, 8, 8)
    pat = jnp.stack(cols, axis=2)                                               # (B, C, 9, 8, 8)
    pat = pat.transpose(0, 3, 4, 1, 2).reshape(b, H_CONV, H_CONV, PATCH)        # feature order (c, kh, kw)
    patp = jnp.pad(pat, ((0, 0), (POOL_P, POOL_P), (POOL_P, POOL_P), (0, 0)))   # (B, 10, 10, PATCH)
    offs = []
    for dh in range(POOL_K):
        for dw in range(POOL_K):
            offs.append(patp[:, dh:dh + POOL_S * (H_POOL - 1) + 1:POOL_S,
                                dw:dw + POOL_S * (H_POOL - 1) + 1:POOL_S, :])   # (B, 4, 4, PATCH)
    po = jnp.stack(offs, axis=0)                                                # (N_OFF, B, 4, 4, PATCH)
    return po.reshape(N_OFF * b * SEQ, PATCH)


def prepare_weights(params):
    """Static (per-model, not per-call) weight layout prep — hoisted out of the jit path."""
    bl = params["blocks"]
    st = lambda name: jnp.stack([blk[name] for blk in bl], axis=0)

    # fold the attention scale into the Q section of the fused qkv weight.
    # qkv output columns are ordered (q/k/v, head, dh), matching torch's
    # reshape(B,N,3,heads,dh) of a (in,out)-layout qkv weight.
    scale = jnp.concatenate([jnp.full((EMB,), DH ** -0.5, F32),
                             jnp.ones((2 * EMB,), F32)])
    qkv_w = st("qkv_w") * scale[None, None, :]                                  # (L, EMB, 3*EMB)

    pos = params["pos_emb"][0]                                                  # (SEQ+1, EMB)
    cls = params["cls"][0]                                                      # (1, EMB)
    base = jnp.concatenate([jnp.tile(pos[1:], (B, 1)),                          # token rows, per batch
                            jnp.tile(cls + pos[0:1], (B, 1))], axis=0)          # class-token rows last

    # block-diagonal additive attention mask (tokens of different batch elements can't attend)
    row_batch = jnp.concatenate([jnp.repeat(jnp.arange(B), SEQ), jnp.arange(B)])
    mask = jnp.where(row_batch[:, None] == row_batch[None, :], 0.0, -1e9).astype(F32)

    # lane-dense fc head (pad to 128 output columns)
    fc_w = jnp.zeros((EMB, OUT_PAD), F32).at[:, :CLASSES].set(params["fc_w"])
    fc_b = jnp.zeros((1, OUT_PAD), F32).at[0, :CLASSES].set(params["fc_b"])

    return dict(
        conv_w=params["conv_w"].reshape(EMB, PATCH).T,                          # (PATCH, EMB)
        base=base, mask=mask,
        qkv_w=qkv_w,
        proj_w=st("proj_w"),                                                    # rows ordered (head, dh)
        proj_b=st("proj_b").reshape(LAYERS, 1, EMB),
        ln1_g=st("ln1_g").reshape(LAYERS, 1, EMB), ln1_b=st("ln1_b").reshape(LAYERS, 1, EMB),
        ln2_g=st("ln2_g").reshape(LAYERS, 1, EMB), ln2_b=st("ln2_b").reshape(LAYERS, 1, EMB),
        fc1_w=st("fc1_w"), fc1_b=st("fc1_b").reshape(LAYERS, 1, FF),
        fc2_w=st("fc2_w"), fc2_b=st("fc2_b").reshape(LAYERS, 1, EMB),
        norm_g=params["norm_g"].reshape(1, EMB), norm_b=params["norm_b"].reshape(1, EMB),
        fc_w=fc_w, fc_b=fc_b,
    )


def _full_spec(arr):
    z = (0,) * arr.ndim
    return pl.BlockSpec(arr.shape, lambda i, _z=z: _z)


def ga_cct_forward(weights, x):
    patches = _build_pool_patches(x)                                            # per-call input glue only
    operands = (
        patches, weights["conv_w"], weights["base"], weights["mask"],
        weights["qkv_w"], weights["proj_w"], weights["proj_b"],
        weights["ln1_g"], weights["ln1_b"], weights["ln2_g"], weights["ln2_b"],
        weights["fc1_w"], weights["fc1_b"], weights["fc2_w"], weights["fc2_b"],
        weights["norm_g"], weights["norm_b"], weights["fc_w"], weights["fc_b"],
    )
    out = pl.pallas_call(
        _fused_kernel,
        grid=(1,),                                                              # whole batch in one step
        in_specs=[_full_spec(a) for a in operands],
        out_specs=pl.BlockSpec((B, OUT_PAD), lambda i: (0, 0)),
        out_shape=jax.ShapeDtypeStruct((B, OUT_PAD), F32),
        compiler_params=pltpu.CompilerParams(dimension_semantics=("arbitrary",)),
    )(*operands)
    return out[:, :CLASSES]


# ------------------------------ parameter init ------------------------------
def _trunc_normal(key, shape, std):
    return std * jax.random.truncated_normal(key, -2.0, 2.0, shape, F32)


def make_params(key):
    keys = jax.random.split(key, 4 + LAYERS)
    params = {}
    # Conv2d weight (EMB, C_IN, K, K), kaiming-normal (fan_in)
    fan_in = C_IN * K * K
    params["conv_w"] = jax.random.normal(keys[0], (EMB, C_IN, K, K), F32) * math.sqrt(2.0 / fan_in)
    # class token (zeros) and learnable positional embedding (trunc_normal std 0.2)
    params["cls"] = jnp.zeros((1, 1, EMB), F32)
    params["pos_emb"] = _trunc_normal(keys[1], (1, SEQ + 1, EMB), 0.2)
    # transformer blocks (linear weights stored (in, out), trunc_normal std 0.02)
    blocks = []
    for li in range(LAYERS):
        bk = jax.random.split(keys[4 + li], 4)
        blocks.append({
            "ln1_g": jnp.ones((EMB,), F32), "ln1_b": jnp.zeros((EMB,), F32),
            "qkv_w": _trunc_normal(bk[0], (EMB, 3 * EMB), 0.02),
            "proj_w": _trunc_normal(bk[1], (EMB, EMB), 0.02),
            "proj_b": jnp.zeros((EMB,), F32),
            "ln2_g": jnp.ones((EMB,), F32), "ln2_b": jnp.zeros((EMB,), F32),
            "fc1_w": _trunc_normal(bk[2], (EMB, FF), 0.02),
            "fc1_b": jnp.zeros((FF,), F32),
            "fc2_w": _trunc_normal(bk[3], (FF, EMB), 0.02),
            "fc2_b": jnp.zeros((EMB,), F32),
        })
    params["blocks"] = blocks
    params["norm_g"] = jnp.ones((EMB,), F32)
    params["norm_b"] = jnp.zeros((EMB,), F32)
    params["fc_w"] = _trunc_normal(keys[2], (EMB, CLASSES), 0.02)
    params["fc_b"] = jnp.zeros((CLASSES,), F32)
    return params


# ------------------------------------ main ------------------------------------
if __name__ == "__main__":
    key = jax.random.PRNGKey(0)
    pkey, xkey = jax.random.split(key)
    params = make_params(pkey)
    weights = prepare_weights(params)            # hoisted: done once, not per call
    x = jax.random.normal(xkey, (B, C_IN, IMG, IMG), F32)   # NCHW, like PyTorch

    fwd = jax.jit(ga_cct_forward)
    logits = fwd(weights, x)
    jax.block_until_ready(logits)
    assert logits.shape == (B, CLASSES)
    assert bool(jnp.all(jnp.isfinite(logits)))
    print("KERNEL_OK")
</pallas_src>

<mosaic_0001>
module attributes {stable_mosaic.version = 11 : i64} {
  func.func @_fused_kernel(%arg0: i32, %arg1: memref<288x27xf32, #tpu.memory_space<vmem>>, %arg2: memref<27x32xf32, #tpu.memory_space<vmem>>, %arg3: memref<34x32xf32, #tpu.memory_space<vmem>>, %arg4: memref<34x34xf32, #tpu.memory_space<vmem>>, %arg5: memref<2x32x96xf32, #tpu.memory_space<vmem>>, %arg6: memref<2x32x32xf32, #tpu.memory_space<vmem>>, %arg7: memref<2x1x32xf32, #tpu.memory_space<vmem>>, %arg8: memref<2x1x32xf32, #tpu.memory_space<vmem>>, %arg9: memref<2x1x32xf32, #tpu.memory_space<vmem>>, %arg10: memref<2x1x32xf32, #tpu.memory_space<vmem>>, %arg11: memref<2x1x32xf32, #tpu.memory_space<vmem>>, %arg12: memref<2x32x64xf32, #tpu.memory_space<vmem>>, %arg13: memref<2x1x64xf32, #tpu.memory_space<vmem>>, %arg14: memref<2x64x32xf32, #tpu.memory_space<vmem>>, %arg15: memref<2x1x32xf32, #tpu.memory_space<vmem>>, %arg16: memref<1x32xf32, #tpu.memory_space<vmem>>, %arg17: memref<1x32xf32, #tpu.memory_space<vmem>>, %arg18: memref<32x128xf32, #tpu.memory_space<vmem>>, %arg19: memref<1x128xf32, #tpu.memory_space<vmem>>, %arg20: memref<2x128xf32, #tpu.memory_space<vmem>>) attributes {dimension_semantics = [#tpu.dimension_semantics<arbitrary>], iteration_bounds = array<i64: 1>, scalar_prefetch = 0 : i64, scratch_operands = 0 : i64, tpu.core_type = #tpu.core_type<tc>, window_params = [{pipeline_mode = #tpu.pipeline_mode<synchronous>, transform_indices = @transform_0, window_bounds = array<i64: 288, 27>}, {pipeline_mode = #tpu.pipeline_mode<synchronous>, transform_indices = @transform_1, window_bounds = array<i64: 27, 32>}, {pipeline_mode = #tpu.pipeline_mode<synchronous>, transform_indices = @transform_2, window_bounds = array<i64: 34, 32>}, {pipeline_mode = #tpu.pipeline_mode<synchronous>, transform_indices = @transform_3, window_bounds = array<i64: 34, 34>}, {pipeline_mode = #tpu.pipeline_mode<synchronous>, transform_indices = @transform_4, window_bounds = array<i64: 2, 32, 96>}, {pipeline_mode = #tpu.pipeline_mode<synchronous>, transform_indices = @transform_5, window_bounds = array<i64: 2, 32, 32>}, {pipeline_mode = #tpu.pipeline_mode<synchronous>, transform_indices = @transform_6, window_bounds = array<i64: 2, 1, 32>}, {pipeline_mode = #tpu.pipeline_mode<synchronous>, transform_indices = @transform_7, window_bounds = array<i64: 2, 1, 32>}, {pipeline_mode = #tpu.pipeline_mode<synchronous>, transform_indices = @transform_8, window_bounds = array<i64: 2, 1, 32>}, {pipeline_mode = #tpu.pipeline_mode<synchronous>, transform_indices = @transform_9, window_bounds = array<i64: 2, 1, 32>}, {pipeline_mode = #tpu.pipeline_mode<synchronous>, transform_indices = @transform_10, window_bounds = array<i64: 2, 1, 32>}, {pipeline_mode = #tpu.pipeline_mode<synchronous>, transform_indices = @transform_11, window_bounds = array<i64: 2, 32, 64>}, {pipeline_mode = #tpu.pipeline_mode<synchronous>, transform_indices = @transform_12, window_bounds = array<i64: 2, 1, 64>}, {pipeline_mode = #tpu.pipeline_mode<synchronous>, transform_indices = @transform_13, window_bounds = array<i64: 2, 64, 32>}, {pipeline_mode = #tpu.pipeline_mode<synchronous>, transform_indices = @transform_14, window_bounds = array<i64: 2, 1, 32>}, {pipeline_mode = #tpu.pipeline_mode<synchronous>, transform_indices = @transform_15, window_bounds = array<i64: 1, 32>}, {pipeline_mode = #tpu.pipeline_mode<synchronous>, transform_indices = @transform_16, window_bounds = array<i64: 1, 32>}, {pipeline_mode = #tpu.pipeline_mode<synchronous>, transform_indices = @transform_17, window_bounds = array<i64: 32, 128>}, {pipeline_mode = #tpu.pipeline_mode<synchronous>, transform_indices = @transform_18, window_bounds = array<i64: 1, 128>}, {pipeline_mode = #tpu.pipeline_mode<synchronous>, transform_indices = @transform_19, window_bounds = array<i64: 2, 128>}]} {
    %c0 = arith.constant 0 : index
    %c0_0 = arith.constant 0 : index
    %0 = vector.load %arg1[%c0, %c0_0] : memref<288x27xf32, #tpu.memory_space<vmem>>, vector<288x27xf32>
    %c0_1 = arith.constant 0 : index
    %c0_2 = arith.constant 0 : index
    %1 = vector.load %arg2[%c0_1, %c0_2] : memref<27x32xf32, #tpu.memory_space<vmem>>, vector<27x32xf32>
    %cst = arith.constant dense<0.000000e+00> : vector<288x32xf32>
    %2 = tpu.matmul %0, %1, %cst {dimension_numbers = #tpu.dot_dimension_numbers<[1], [0], [0], [1], [0, 0, 1, 1], [], []>} : vector<288x27xf32>, vector<27x32xf32>, vector<288x32xf32> -> vector<288x32xf32>
    %cst_3 = arith.constant 0.000000e+00 : f32
    %3 = vector.broadcast %cst_3 : f32 to vector<288x32xf32>
    %4 = arith.maximumf %2, %3 : vector<288x32xf32>
    %5 = vector.extract_strided_slice %4 {offsets = [0, 0], sizes = [32, 32], strides = [1, 1]} : vector<288x32xf32> to vector<32x32xf32>
    %6 = vector.extract_strided_slice %4 {offsets = [32, 0], sizes = [32, 32], strides = [1, 1]} : vector<288x32xf32> to vector<32x32xf32>
    %7 = vector.extract_strided_slice %4 {offsets = [64, 0], sizes = [32, 32], strides = [1, 1]} : vector<288x32xf32> to vector<32x32xf32>
    %8 = vector.extract_strided_slice %4 {offsets = [96, 0], sizes = [32, 32], strides = [1, 1]} : vector<288x32xf32> to vector<32x32xf32>
    %9 = vector.extract_strided_slice %4 {offsets = [128, 0], sizes = [32, 32], strides = [1, 1]} : vector<288x32xf32> to vector<32x32xf32>
    %10 = vector.extract_strided_slice %4 {offsets = [160, 0], sizes = [32, 32], strides = [1, 1]} : vector<288x32xf32> to vector<32x32xf32>
    %11 = vector.extract_strided_slice %4 {offsets = [192, 0], sizes = [32, 32], strides = [1, 1]} : vector<288x32xf32> to vector<32x32xf32>
    %12 = vector.extract_strided_slice %4 {offsets = [224, 0], sizes = [32, 32], strides = [1, 1]} : vector<288x32xf32> to vector<32x32xf32>
    %13 = vector.extract_strided_slice %4 {offsets = [256, 0], sizes = [32, 32], strides = [1, 1]} : vector<288x32xf32> to vector<32x32xf32>
    %14 = arith.maximumf %5, %6 : vector<32x32xf32>
    %15 = arith.maximumf %7, %8 : vector<32x32xf32>
    %16 = arith.maximumf %9, %10 : vector<32x32xf32>
    %17 = arith.maximumf %11, %12 : vector<32x32xf32>
    %18 = arith.maximumf %14, %15 : vector<32x32xf32>
    %19 = arith.maximumf %16, %17 : vector<32x32xf32>
    %20 = arith.maximumf %18, %19 : vector<32x32xf32>
    %21 = arith.maximumf %20, %13 : vector<32x32xf32>
    %cst_4 = arith.constant 0.000000e+00 : f32
    %22 = vector.broadcast %cst_4 : f32 to vector<2x32xf32>
    %23 = tpu.concatenate %21, %22 in 0 : vector<32x32xf32>, vector<2x32xf32> -> vector<34x32xf32>
    %c0_5 = arith.constant 0 : index
    %c0_6 = arith.constant 0 : index
    %24 = vector.load %arg3[%c0_5, %c0_6] : memref<34x32xf32, #tpu.memory_space<vmem>>, vector<34x32xf32>
    %25 = arith.addf %23, %24 : vector<34x32xf32>
    %c0_7 = arith.constant 0 : index
    %c0_8 = arith.constant 0 : index
    %26 = vector.load %arg4[%c0_7, %c0_8] : memref<34x34xf32, #tpu.memory_space<vmem>>, vector<34x34xf32>
    %c0_9 = arith.constant 0 : index
    %c0_10 = arith.constant 0 : index
    %c0_11 = arith.constant 0 : index
    %27 = vector.load %arg8[%c0_9, %c0_10, %c0_11] : memref<2x1x32xf32, #tpu.memory_space<vmem>>, vector<1x1x32xf32>
    %28 = vector.shape_cast %27 : vector<1x1x32xf32> to vector<1x32xf32>
    %c0_12 = arith.constant 0 : index
    %c0_13 = arith.constant 0 : index
    %c0_14 = arith.constant 0 : index
    %29 = vector.load %arg9[%c0_12, %c0_13, %c0_14] : memref<2x1x32xf32, #tpu.memory_space<vmem>>, vector<1x1x32xf32>
    %30 = vector.shape_cast %29 : vector<1x1x32xf32> to vector<1x32xf32>
    %cst_15 = arith.constant dense<0.000000e+00> : vector<34xf32>
    %31 = vector.multi_reduction <add>, %25, %cst_15 [1] : vector<34x32xf32> to vector<34xf32>
    %32 = vector.shape_cast %31 : vector<34xf32> to vector<34x1xf32>
    %cst_16 = arith.constant 3.200000e+01 : f32
    %33 = vector.broadcast %cst_16 : f32 to vector<34x1xf32>
    %34 = arith.divf %32, %33 : vector<34x1xf32>
    %35 = vector.broadcast %34 : vector<34x1xf32> to vector<34x32xf32>
    %36 = arith.subf %25, %35 : vector<34x32xf32>
    %37 = arith.mulf %36, %36 : vector<34x32xf32>
    %cst_17 = arith.constant dense<0.000000e+00> : vector<34xf32>
    %38 = vector.multi_reduction <add>, %37, %cst_17 [1] : vector<34x32xf32> to vector<34xf32>
    %39 = vector.shape_cast %38 : vector<34xf32> to vector<34x1xf32>
    %cst_18 = arith.constant 3.200000e+01 : f32
    %40 = vector.broadcast %cst_18 : f32 to vector<34x1xf32>
    %41 = arith.divf %39, %40 : vector<34x1xf32>
    %cst_19 = arith.constant 9.99999974E-6 : f32
    %42 = vector.broadcast %cst_19 : f32 to vector<34x1xf32>
    %43 = arith.addf %41, %42 : vector<34x1xf32>
    %44 = math.rsqrt %43 : vector<34x1xf32>
    %45 = vector.broadcast %44 : vector<34x1xf32> to vector<34x32xf32>
    %46 = arith.mulf %36, %45 : vector<34x32xf32>
    %47 = vector.broadcast %28 : vector<1x32xf32> to vector<34x32xf32>
    %48 = arith.mulf %46, %47 : vector<34x32xf32>
    %49 = vector.broadcast %30 : vector<1x32xf32> to vector<34x32xf32>
    %50 = arith.addf %48, %49 : vector<34x32xf32>
    %c0_20 = arith.constant 0 : index
    %c0_21 = arith.constant 0 : index
    %c0_22 = arith.constant 0 : index
    %51 = vector.load %arg5[%c0_20, %c0_21, %c0_22] : memref<2x32x96xf32, #tpu.memory_space<vmem>>, vector<1x32x96xf32>
    %52 = vector.shape_cast %51 : vector<1x32x96xf32> to vector<32x96xf32>
    %cst_23 = arith.constant dense<0.000000e+00> : vector<34x96xf32>
    %53 = tpu.matmul %50, %52, %cst_23 {dimension_numbers = #tpu.dot_dimension_numbers<[1], [0], [0], [1], [0, 0, 1, 1], [], []>} : vector<34x32xf32>, vector<32x96xf32>, vector<34x96xf32> -> vector<34x96xf32>
    %54 = vector.extract_strided_slice %53 {offsets = [0, 0], sizes = [34, 8], strides = [1, 1]} : vector<34x96xf32> to vector<34x8xf32>
    %55 = vector.extract_strided_slice %53 {offsets = [0, 32], sizes = [34, 8], strides = [1, 1]} : vector<34x96xf32> to vector<34x8xf32>
    %56 = vector.extract_strided_slice %53 {offsets = [0, 64], sizes = [34, 8], strides = [1, 1]} : vector<34x96xf32> to vector<34x8xf32>
    %cst_24 = arith.constant dense<0.000000e+00> : vector<34x34xf32>
    %57 = tpu.matmul %54, %55, %cst_24 {dimension_numbers = #tpu.dot_dimension_numbers<[1], [1], [0], [0], [0, 0, 1, 0], [], []>} : vector<34x8xf32>, vector<34x8xf32>, vector<34x34xf32> -> vector<34x34xf32>
    %58 = arith.addf %57, %26 : vector<34x34xf32>
    %cst_25 = arith.constant dense<0xFF800000> : vector<34xf32>
    %59 = vector.multi_reduction <maximumf>, %58, %cst_25 [1] : vector<34x34xf32> to vector<34xf32>
    %60 = vector.shape_cast %59 : vector<34xf32> to vector<34x1xf32>
    %61 = vector.broadcast %60 : vector<34x1xf32> to vector<34x34xf32>
    %62 = arith.subf %58, %61 : vector<34x34xf32>
    %63 = math.exp %62 : vector<34x34xf32>
    %cst_26 = arith.constant dense<0.000000e+00> : vector<34xf32>
    %64 = vector.multi_reduction <add>, %63, %cst_26 [1] : vector<34x34xf32> to vector<34xf32>
    %65 = vector.shape_cast %64 : vector<34xf32> to vector<34x1xf32>
    %66 = vector.broadcast %65 : vector<34x1xf32> to vector<34x34xf32>
    %67 = arith.divf %63, %66 : vector<34x34xf32>
    %cst_27 = arith.constant dense<0.000000e+00> : vector<34x8xf32>
    %68 = tpu.matmul %67, %56, %cst_27 {dimension_numbers = #tpu.dot_dimension_numbers<[1], [0], [0], [1], [0, 0, 1, 1], [], []>} : vector<34x34xf32>, vector<34x8xf32>, vector<34x8xf32> -> vector<34x8xf32>
    %69 = vector.extract_strided_slice %53 {offsets = [0, 8], sizes = [34, 8], strides = [1, 1]} : vector<34x96xf32> to vector<34x8xf32>
    %70 = vector.extract_strided_slice %53 {offsets = [0, 40], sizes = [34, 8], strides = [1, 1]} : vector<34x96xf32> to vector<34x8xf32>
    %71 = vector.extract_strided_slice %53 {offsets = [0, 72], sizes = [34, 8], strides = [1, 1]} : vector<34x96xf32> to vector<34x8xf32>
    %cst_28 = arith.constant dense<0.000000e+00> : vector<34x34xf32>
    %72 = tpu.matmul %69, %70, %cst_28 {dimension_numbers = #tpu.dot_dimension_numbers<[1], [1], [0], [0], [0, 0, 1, 0], [], []>} : vector<34x8xf32>, vector<34x8xf32>, vector<34x34xf32> -> vector<34x34xf32>
    %73 = arith.addf %72, %26 : vector<34x34xf32>
    %cst_29 = arith.constant dense<0xFF800000> : vector<34xf32>
    %74 = vector.multi_reduction <maximumf>, %73, %cst_29 [1] : vector<34x34xf32> to vector<34xf32>
    %75 = vector.shape_cast %74 : vector<34xf32> to vector<34x1xf32>
    %76 = vector.broadcast %75 : vector<34x1xf32> to vector<34x34xf32>
    %77 = arith.subf %73, %76 : vector<34x34xf32>
    %78 = math.exp %77 : vector<34x34xf32>
    %cst_30 = arith.constant dense<0.000000e+00> : vector<34xf32>
    %79 = vector.multi_reduction <add>, %78, %cst_30 [1] : vector<34x34xf32> to vector<34xf32>
    %80 = vector.shape_cast %79 : vector<34xf32> to vector<34x1xf32>
    %81 = vector.broadcast %80 : vector<34x1xf32> to vector<34x34xf32>
    %82 = arith.divf %78, %81 : vector<34x34xf32>
    %cst_31 = arith.constant dense<0.000000e+00> : vector<34x8xf32>
    %83 = tpu.matmul %82, %71, %cst_31 {dimension_numbers = #tpu.dot_dimension_numbers<[1], [0], [0], [1], [0, 0, 1, 1], [], []>} : vector<34x34xf32>, vector<34x8xf32>, vector<34x8xf32> -> vector<34x8xf32>
    %84 = vector.extract_strided_slice %53 {offsets = [0, 16], sizes = [34, 8], strides = [1, 1]} : vector<34x96xf32> to vector<34x8xf32>
    %85 = vector.extract_strided_slice %53 {offsets = [0, 48], sizes = [34, 8], strides = [1, 1]} : vector<34x96xf32> to vector<34x8xf32>
    %86 = vector.extract_strided_slice %53 {offsets = [0, 80], sizes = [34, 8], strides = [1, 1]} : vector<34x96xf32> to vector<34x8xf32>
    %cst_32 = arith.constant dense<0.000000e+00> : vector<34x34xf32>
    %87 = tpu.matmul %84, %85, %cst_32 {dimension_numbers = #tpu.dot_dimension_numbers<[1], [1], [0], [0], [0, 0, 1, 0], [], []>} : vector<34x8xf32>, vector<34x8xf32>, vector<34x34xf32> -> vector<34x34xf32>
    %88 = arith.addf %87, %26 : vector<34x34xf32>
    %cst_33 = arith.constant dense<0xFF800000> : vector<34xf32>
    %89 = vector.multi_reduction <maximumf>, %88, %cst_33 [1] : vector<34x34xf32> to vector<34xf32>
    %90 = vector.shape_cast %89 : vector<34xf32> to vector<34x1xf32>
    %91 = vector.broadcast %90 : vector<34x1xf32> to vector<34x34xf32>
    %92 = arith.subf %88, %91 : vector<34x34xf32>
    %93 = math.exp %92 : vector<34x34xf32>
    %cst_34 = arith.constant dense<0.000000e+00> : vector<34xf32>
    %94 = vector.multi_reduction <add>, %93, %cst_34 [1] : vector<34x34xf32> to vector<34xf32>
    %95 = vector.shape_cast %94 : vector<34xf32> to vector<34x1xf32>
    %96 = vector.broadcast %95 : vector<34x1xf32> to vector<34x34xf32>
    %97 = arith.divf %93, %96 : vector<34x34xf32>
    %cst_35 = arith.constant dense<0.000000e+00> : vector<34x8xf32>
    %98 = tpu.matmul %97, %86, %cst_35 {dimension_numbers = #tpu.dot_dimension_numbers<[1], [0], [0], [1], [0, 0, 1, 1], [], []>} : vector<34x34xf32>, vector<34x8xf32>, vector<34x8xf32> -> vector<34x8xf32>
    %99 = vector.extract_strided_slice %53 {offsets = [0, 24], sizes = [34, 8], strides = [1, 1]} : vector<34x96xf32> to vector<34x8xf32>
    %100 = vector.extract_strided_slice %53 {offsets = [0, 56], sizes = [34, 8], strides = [1, 1]} : vector<34x96xf32> to vector<34x8xf32>
    %101 = vector.extract_strided_slice %53 {offsets = [0, 88], sizes = [34, 8], strides = [1, 1]} : vector<34x96xf32> to vector<34x8xf32>
    %cst_36 = arith.constant dense<0.000000e+00> : vector<34x34xf32>
    %102 = tpu.matmul %99, %100, %cst_36 {dimension_numbers = #tpu.dot_dimension_numbers<[1], [1], [0], [0], [0, 0, 1, 0], [], []>} : vector<34x8xf32>, vector<34x8xf32>, vector<34x34xf32> -> vector<34x34xf32>
    %103 = arith.addf %102, %26 : vector<34x34xf32>
    %cst_37 = arith.constant dense<0xFF800000> : vector<34xf32>
    %104 = vector.multi_reduction <maximumf>, %103, %cst_37 [1] : vector<34x34xf32> to vector<34xf32>
    %105 = vector.shape_cast %104 : vector<34xf32> to vector<34x1xf32>
    %106 = vector.broadcast %105 : vector<34x1xf32> to vector<34x34xf32>
    %107 = arith.subf %103, %106 : vector<34x34xf32>
    %108 = math.exp %107 : vector<34x34xf32>
    %cst_38 = arith.constant dense<0.000000e+00> : vector<34xf32>
    %109 = vector.multi_reduction <add>, %108, %cst_38 [1] : vector<34x34xf32> to vector<34xf32>
    %110 = vector.shape_cast %109 : vector<34xf32> to vector<34x1xf32>
    %111 = vector.broadcast %110 : vector<34x1xf32> to vector<34x34xf32>
    %112 = arith.divf %108, %111 : vector<34x34xf32>
    %cst_39 = arith.constant dense<0.000000e+00> : vector<34x8xf32>
    %113 = tpu.matmul %112, %101, %cst_39 {dimension_numbers = #tpu.dot_dimension_numbers<[1], [0], [0], [1], [0, 0, 1, 1], [], []>} : vector<34x34xf32>, vector<34x8xf32>, vector<34x8xf32> -> vector<34x8xf32>
    %114 = tpu.concatenate %68, %83, %98, %113 in 1 : vector<34x8xf32>, vector<34x8xf32>, vector<34x8xf32>, vector<34x8xf32> -> vector<34x32xf32>
    %c0_40 = arith.constant 0 : index
    %c0_41 = arith.constant 0 : index
    %c0_42 = arith.constant 0 : index
    %115 = vector.load %arg6[%c0_40, %c0_41, %c0_42] : memref<2x32x32xf32, #tpu.memory_space<vmem>>, vector<1x32x32xf32>
    %116 = vector.shape_cast %115 : vector<1x32x32xf32> to vector<32x32xf32>
    %cst_43 = arith.constant dense<0.000000e+00> : vector<34x32xf32>
    %117 = tpu.matmul %114, %116, %cst_43 {dimension_numbers = #tpu.dot_dimension_numbers<[1], [0], [0], [1], [0, 0, 1, 1], [], []>} : vector<34x32xf32>, vector<32x32xf32>, vector<34x32xf32> -> vector<34x32xf32>
    %118 = arith.addf %25, %117 : vector<34x32xf32>
    %c0_44 = arith.constant 0 : index
    %c0_45 = arith.constant 0 : index
    %c0_46 = arith.constant 0 : index
    %119 = vector.load %arg7[%c0_44, %c0_45, %c0_46] : memref<2x1x32xf32, #tpu.memory_space<vmem>>, vector<1x1x32xf32>
    %120 = vector.shape_cast %119 : vector<1x1x32xf32> to vector<1x32xf32>
    %121 = vector.broadcast %120 : vector<1x32xf32> to vector<34x32xf32>
    %122 = arith.addf %118, %121 : vector<34x32xf32>
    %c0_47 = arith.constant 0 : index
    %c0_48 = arith.constant 0 : index
    %c0_49 = arith.constant 0 : index
    %123 = vector.load %arg10[%c0_47, %c0_48, %c0_49] : memref<2x1x32xf32, #tpu.memory_space<vmem>>, vector<1x1x32xf32>
    %124 = vector.shape_cast %123 : vector<1x1x32xf32> to vector<1x32xf32>
    %c0_50 = arith.constant 0 : index
    %c0_51 = arith.constant 0 : index
    %c0_52 = arith.constant 0 : index
    %125 = vector.load %arg11[%c0_50, %c0_51, %c0_52] : memref<2x1x32xf32, #tpu.memory_space<vmem>>, vector<1x1x32xf32>
    %126 = vector.shape_cast %125 : vector<1x1x32xf32> to vector<1x32xf32>
    %cst_53 = arith.constant dense<0.000000e+00> : vector<34xf32>
    %127 = vector.multi_reduction <add>, %122, %cst_53 [1] : vector<34x32xf32> to vector<34xf32>
    %128 = vector.shape_cast %127 : vector<34xf32> to vector<34x1xf32>
    %cst_54 = arith.constant 3.200000e+01 : f32
    %129 = vector.broadcast %cst_54 : f32 to vector<34x1xf32>
    %130 = arith.divf %128, %129 : vector<34x1xf32>
    %131 = vector.broadcast %130 : vector<34x1xf32> to vector<34x32xf32>
    %132 = arith.subf %122, %131 : vector<34x32xf32>
    %133 = arith.mulf %132, %132 : vector<34x32xf32>
    %cst_55 = arith.constant dense<0.000000e+00> : vector<34xf32>
    %134 = vector.multi_reduction <add>, %133, %cst_55 [1] : vector<34x32xf32> to vector<34xf32>
    %135 = vector.shape_cast %134 : vector<34xf32> to vector<34x1xf32>
    %cst_56 = arith.constant 3.200000e+01 : f32
    %136 = vector.broadcast %cst_56 : f32 to vector<34x1xf32>
    %137 = arith.divf %135, %136 : vector<34x1xf32>
    %cst_57 = arith.constant 9.99999974E-6 : f32
    %138 = vector.broadcast %cst_57 : f32 to vector<34x1xf32>
    %139 = arith.addf %137, %138 : vector<34x1xf32>
    %140 = math.rsqrt %139 : vector<34x1xf32>
    %141 = vector.broadcast %140 : vector<34x1xf32> to vector<34x32xf32>
    %142 = arith.mulf %132, %141 : vector<34x32xf32>
    %143 = vector.broadcast %124 : vector<1x32xf32> to vector<34x32xf32>
    %144 = arith.mulf %142, %143 : vector<34x32xf32>
    %145 = vector.broadcast %126 : vector<1x32xf32> to vector<34x32xf32>
    %146 = arith.addf %144, %145 : vector<34x32xf32>
    %c0_58 = arith.constant 0 : index
    %c0_59 = arith.constant 0 : index
    %c0_60 = arith.constant 0 : index
    %147 = vector.load %arg12[%c0_58, %c0_59, %c0_60] : memref<2x32x64xf32, #tpu.memory_space<vmem>>, vector<1x32x64xf32>
    %148 = vector.shape_cast %147 : vector<1x32x64xf32> to vector<32x64xf32>
    %cst_61 = arith.constant dense<0.000000e+00> : vector<34x64xf32>
    %149 = tpu.matmul %146, %148, %cst_61 {dimension_numbers = #tpu.dot_dimension_numbers<[1], [0], [0], [1], [0, 0, 1, 1], [], []>} : vector<34x32xf32>, vector<32x64xf32>, vector<34x64xf32> -> vector<34x64xf32>
    %c0_62 = arith.constant 0 : index
    %c0_63 = arith.constant 0 : index
    %c0_64 = arith.constant 0 : index
    %150 = vector.load %arg13[%c0_62, %c0_63, %c0_64] : memref<2x1x64xf32, #tpu.memory_space<vmem>>, vector<1x1x64xf32>
    %151 = vector.shape_cast %150 : vector<1x1x64xf32> to vector<1x64xf32>
    %152 = vector.broadcast %151 : vector<1x64xf32> to vector<34x64xf32>
    %153 = arith.addf %149, %152 : vector<34x64xf32>
    %cst_65 = arith.constant 5.000000e-01 : f32
    %154 = vector.broadcast %cst_65 : f32 to vector<34x64xf32>
    %155 = arith.mulf %154, %153 : vector<34x64xf32>
    %cst_66 = arith.constant 0.707106769 : f32
    %156 = vector.broadcast %cst_66 : f32 to vector<34x64xf32>
    %157 = arith.mulf %153, %156 : vector<34x64xf32>
    %158 = math.erf %157 : vector<34x64xf32>
    %cst_67 = arith.constant 1.000000e+00 : f32
    %159 = vector.broadcast %cst_67 : f32 to vector<34x64xf32>
    %160 = arith.addf %159, %158 : vector<34x64xf32>
    %161 = arith.mulf %155, %160 : vector<34x64xf32>
    %c0_68 = arith.constant 0 : index
    %c0_69 = arith.constant 0 : index
    %c0_70 = arith.constant 0 : index
    %162 = vector.load %arg14[%c0_68, %c0_69, %c0_70] : memref<2x64x32xf32, #tpu.memory_space<vmem>>, vector<1x64x32xf32>
    %163 = vector.shape_cast %162 : vector<1x64x32xf32> to vector<64x32xf32>
    %cst_71 = arith.constant dense<0.000000e+00> : vector<34x32xf32>
    %164 = tpu.matmul %161, %163, %cst_71 {dimension_numbers = #tpu.dot_dimension_numbers<[1], [0], [0], [1], [0, 0, 1, 1], [], []>} : vector<34x64xf32>, vector<64x32xf32>, vector<34x32xf32> -> vector<34x32xf32>
    %165 = arith.addf %122, %164 : vector<34x32xf32>
    %c0_72 = arith.constant 0 : index
    %c0_73 = arith.constant 0 : index
    %c0_74 = arith.constant 0 : index
    %166 = vector.load %arg15[%c0_72, %c0_73, %c0_74] : memref<2x1x32xf32, #tpu.memory_space<vmem>>, vector<1x1x32xf32>
    %167 = vector.shape_cast %166 : vector<1x1x32xf32> to vector<1x32xf32>
    %168 = vector.broadcast %167 : vector<1x32xf32> to vector<34x32xf32>
    %169 = arith.addf %165, %168 : vector<34x32xf32>
    %c1 = arith.constant 1 : index
    %c0_75 = arith.constant 0 : index
    %c0_76 = arith.constant 0 : index
    %170 = vector.load %arg8[%c1, %c0_75, %c0_76] : memref<2x1x32xf32, #tpu.memory_space<vmem>>, vector<1x1x32xf32>
    %171 = vector.shape_cast %170 : vector<1x1x32xf32> to vector<1x32xf32>
    %c1_77 = arith.constant 1 : index
    %c0_78 = arith.constant 0 : index
    %c0_79 = arith.constant 0 : index
    %172 = vector.load %arg9[%c1_77, %c0_78, %c0_79] : memref<2x1x32xf32, #tpu.memory_space<vmem>>, vector<1x1x32xf32>
    %173 = vector.shape_cast %172 : vector<1x1x32xf32> to vector<1x32xf32>
    %cst_80 = arith.constant dense<0.000000e+00> : vector<34xf32>
    %174 = vector.multi_reduction <add>, %169, %cst_80 [1] : vector<34x32xf32> to vector<34xf32>
    %175 = vector.shape_cast %174 : vector<34xf32> to vector<34x1xf32>
    %cst_81 = arith.constant 3.200000e+01 : f32
    %176 = vector.broadcast %cst_81 : f32 to vector<34x1xf32>
    %177 = arith.divf %175, %176 : vector<34x1xf32>
    %178 = vector.broadcast %177 : vector<34x1xf32> to vector<34x32xf32>
    %179 = arith.subf %169, %178 : vector<34x32xf32>
    %180 = arith.mulf %179, %179 : vector<34x32xf32>
    %cst_82 = arith.constant dense<0.000000e+00> : vector<34xf32>
    %181 = vector.multi_reduction <add>, %180, %cst_82 [1] : vector<34x32xf32> to vector<34xf32>
    %182 = vector.shape_cast %181 : vector<34xf32> to vector<34x1xf32>
    %cst_83 = arith.constant 3.200000e+01 : f32
    %183 = vector.broadcast %cst_83 : f32 to vector<34x1xf32>
    %184 = arith.divf %182, %183 : vector<34x1xf32>
    %cst_84 = arith.constant 9.99999974E-6 : f32
    %185 = vector.broadcast %cst_84 : f32 to vector<34x1xf32>
    %186 = arith.addf %184, %185 : vector<34x1xf32>
    %187 = math.rsqrt %186 : vector<34x1xf32>
    %188 = vector.broadcast %187 : vector<34x1xf32> to vector<34x32xf32>
    %189 = arith.mulf %179, %188 : vector<34x32xf32>
    %190 = vector.broadcast %171 : vector<1x32xf32> to vector<34x32xf32>
    %191 = arith.mulf %189, %190 : vector<34x32xf32>
    %192 = vector.broadcast %173 : vector<1x32xf32> to vector<34x32xf32>
    %193 = arith.addf %191, %192 : vector<34x32xf32>
    %c1_85 = arith.constant 1 : index
    %c0_86 = arith.constant 0 : index
    %c0_87 = arith.constant 0 : index
    %194 = vector.load %arg5[%c1_85, %c0_86, %c0_87] : memref<2x32x96xf32, #tpu.memory_space<vmem>>, vector<1x32x96xf32>
    %195 = vector.shape_cast %194 : vector<1x32x96xf32> to vector<32x96xf32>
    %cst_88 = arith.constant dense<0.000000e+00> : vector<34x96xf32>
    %196 = tpu.matmul %193, %195, %cst_88 {dimension_numbers = #tpu.dot_dimension_numbers<[1], [0], [0], [1], [0, 0, 1, 1], [], []>} : vector<34x32xf32>, vector<32x96xf32>, vector<34x96xf32> -> vector<34x96xf32>
    %197 = vector.extract_strided_slice %196 {offsets = [0, 0], sizes = [34, 8], strides = [1, 1]} : vector<34x96xf32> to vector<34x8xf32>
    %198 = vector.extract_strided_slice %196 {offsets = [0, 32], sizes = [34, 8], strides = [1, 1]} : vector<34x96xf32> to vector<34x8xf32>
    %199 = vector.extract_strided_slice %196 {offsets = [0, 64], sizes = [34, 8], strides = [1, 1]} : vector<34x96xf32> to vector<34x8xf32>
    %cst_89 = arith.constant dense<0.000000e+00> : vector<34x34xf32>
    %200 = tpu.matmul %197, %198, %cst_89 {dimension_numbers = #tpu.dot_dimension_numbers<[1], [1], [0], [0], [0, 0, 1, 0], [], []>} : vector<34x8xf32>, vector<34x8xf32>, vector<34x34xf32> -> vector<34x34xf32>
    %201 = arith.addf %200, %26 : vector<34x34xf32>
    %cst_90 = arith.constant dense<0xFF800000> : vector<34xf32>
    %202 = vector.multi_reduction <maximumf>, %201, %cst_90 [1] : vector<34x34xf32> to vector<34xf32>
    %203 = vector.shape_cast %202 : vector<34xf32> to vector<34x1xf32>
    %204 = vector.broadcast %203 : vector<34x1xf32> to vector<34x34xf32>
    %205 = arith.subf %201, %204 : vector<34x34xf32>
    %206 = math.exp %205 : vector<34x34xf32>
    %cst_91 = arith.constant dense<0.000000e+00> : vector<34xf32>
    %207 = vector.multi_reduction <add>, %206, %cst_91 [1] : vector<34x34xf32> to vector<34xf32>
    %208 = vector.shape_cast %207 : vector<34xf32> to vector<34x1xf32>
    %209 = vector.broadcast %208 : vector<34x1xf32> to vector<34x34xf32>
    %210 = arith.divf %206, %209 : vector<34x34xf32>
    %cst_92 = arith.constant dense<0.000000e+00> : vector<34x8xf32>
    %211 = tpu.matmul %210, %199, %cst_92 {dimension_numbers = #tpu.dot_dimension_numbers<[1], [0], [0], [1], [0, 0, 1, 1], [], []>} : vector<34x34xf32>, vector<34x8xf32>, vector<34x8xf32> -> vector<34x8xf32>
    %212 = vector.extract_strided_slice %196 {offsets = [0, 8], sizes = [34, 8], strides = [1, 1]} : vector<34x96xf32> to vector<34x8xf32>
    %213 = vector.extract_strided_slice %196 {offsets = [0, 40], sizes = [34, 8], strides = [1, 1]} : vector<34x96xf32> to vector<34x8xf32>
    %214 = vector.extract_strided_slice %196 {offsets = [0, 72], sizes = [34, 8], strides = [1, 1]} : vector<34x96xf32> to vector<34x8xf32>
    %cst_93 = arith.constant dense<0.000000e+00> : vector<34x34xf32>
    %215 = tpu.matmul %212, %213, %cst_93 {dimension_numbers = #tpu.dot_dimension_numbers<[1], [1], [0], [0], [0, 0, 1, 0], [], []>} : vector<34x8xf32>, vector<34x8xf32>, vector<34x34xf32> -> vector<34x34xf32>
    %216 = arith.addf %215, %26 : vector<34x34xf32>
    %cst_94 = arith.constant dense<0xFF800000> : vector<34xf32>
    %217 = vector.multi_reduction <maximumf>, %216, %cst_94 [1] : vector<34x34xf32> to vector<34xf32>
    %218 = vector.shape_cast %217 : vector<34xf32> to vector<34x1xf32>
    %219 = vector.broadcast %218 : vector<34x1xf32> to vector<34x34xf32>
    %220 = arith.subf %216, %219 : vector<34x34xf32>
    %221 = math.exp %220 : vector<34x34xf32>
    %cst_95 = arith.constant dense<0.000000e+00> : vector<34xf32>
    %222 = vector.multi_reduction <add>, %221, %cst_95 [1] : vector<34x34xf32> to vector<34xf32>
    %223 = vector.shape_cast %222 : vector<34xf32> to vector<34x1xf32>
    %224 = vector.broadcast %223 : vector<34x1xf32> to vector<34x34xf32>
    %225 = arith.divf %221, %224 : vector<34x34xf32>
    %cst_96 = arith.constant dense<0.000000e+00> : vector<34x8xf32>
    %226 = tpu.matmul %225, %214, %cst_96 {dimension_numbers = #tpu.dot_dimension_numbers<[1], [0], [0], [1], [0, 0, 1, 1], [], []>} : vector<34x34xf32>, vector<34x8xf32>, vector<34x8xf32> -> vector<34x8xf32>
    %227 = vector.extract_strided_slice %196 {offsets = [0, 16], sizes = [34, 8], strides = [1, 1]} : vector<34x96xf32> to vector<34x8xf32>
    %228 = vector.extract_strided_slice %196 {offsets = [0, 48], sizes = [34, 8], strides = [1, 1]} : vector<34x96xf32> to vector<34x8xf32>
    %229 = vector.extract_strided_slice %196 {offsets = [0, 80], sizes = [34, 8], strides = [1, 1]} : vector<34x96xf32> to vector<34x8xf32>
    %cst_97 = arith.constant dense<0.000000e+00> : vector<34x34xf32>
    %230 = tpu.matmul %227, %228, %cst_97 {dimension_numbers = #tpu.dot_dimension_numbers<[1], [1], [0], [0], [0, 0, 1, 0], [], []>} : vector<34x8xf32>, vector<34x8xf32>, vector<34x34xf32> -> vector<34x34xf32>
    %231 = arith.addf %230, %26 : vector<34x34xf32>
    %cst_98 = arith.constant dense<0xFF800000> : vector<34xf32>
    %232 = vector.multi_reduction <maximumf>, %231, %cst_98 [1] : vector<34x34xf32> to vector<34xf32>
    %233 = vector.shape_cast %232 : vector<34xf32> to vector<34x1xf32>
    %234 = vector.broadcast %233 : vector<34x1xf32> to vector<34x34xf32>
    %235 = arith.subf %231, %234 : vector<34x34xf32>
    %236 = math.exp %235 : vector<34x34xf32>
    %cst_99 = arith.constant dense<0.000000e+00> : vector<34xf32>
    %237 = vector.multi_reduction <add>, %236, %cst_99 [1] : vector<34x34xf32> to vector<34xf32>
    %238 = vector.shape_cast %237 : vector<34xf32> to vector<34x1xf32>
    %239 = vector.broadcast %238 : vector<34x1xf32> to vector<34x34xf32>
    %240 = arith.divf %236, %239 : vector<34x34xf32>
    %cst_100 = arith.constant dense<0.000000e+00> : vector<34x8xf32>
    %241 = tpu.matmul %240, %229, %cst_100 {dimension_numbers = #tpu.dot_dimension_numbers<[1], [0], [0], [1], [0, 0, 1, 1], [], []>} : vector<34x34xf32>, vector<34x8xf32>, vector<34x8xf32> -> vector<34x8xf32>
    %242 = vector.extract_strided_slice %196 {offsets = [0, 24], sizes = [34, 8], strides = [1, 1]} : vector<34x96xf32> to vector<34x8xf32>
    %243 = vector.extract_strided_slice %196 {offsets = [0, 56], sizes = [34, 8], strides = [1, 1]} : vector<34x96xf32> to vector<34x8xf32>
    %244 = vector.extract_strided_slice %196 {offsets = [0, 88], sizes = [34, 8], strides = [1, 1]} : vector<34x96xf32> to vector<34x8xf32>
    %cst_101 = arith.constant dense<0.000000e+00> : vector<34x34xf32>
    %245 = tpu.matmul %242, %243, %cst_101 {dimension_numbers = #tpu.dot_dimension_numbers<[1], [1], [0], [0], [0, 0, 1, 0], [], []>} : vector<34x8xf32>, vector<34x8xf32>, vector<34x34xf32> -> vector<34x34xf32>
    %246 = arith.addf %245, %26 : vector<34x34xf32>
    %cst_102 = arith.constant dense<0xFF800000> : vector<34xf32>
    %247 = vector.multi_reduction <maximumf>, %246, %cst_102 [1] : vector<34x34xf32> to vector<34xf32>
    %248 = vector.shape_cast %247 : vector<34xf32> to vector<34x1xf32>
    %249 = vector.broadcast %248 : vector<34x1xf32> to vector<34x34xf32>
    %250 = arith.subf %246, %249 : vector<34x34xf32>
    %251 = math.exp %250 : vector<34x34xf32>
    %cst_103 = arith.constant dense<0.000000e+00> : vector<34xf32>
    %252 = vector.multi_reduction <add>, %251, %cst_103 [1] : vector<34x34xf32> to vector<34xf32>
    %253 = vector.shape_cast %252 : vector<34xf32> to vector<34x1xf32>
    %254 = vector.broadcast %253 : vector<34x1xf32> to vector<34x34xf32>
    %255 = arith.divf %251, %254 : vector<34x34xf32>
    %cst_104 = arith.constant dense<0.000000e+00> : vector<34x8xf32>
    %256 = tpu.matmul %255, %244, %cst_104 {dimension_numbers = #tpu.dot_dimension_numbers<[1], [0], [0], [1], [0, 0, 1, 1], [], []>} : vector<34x34xf32>, vector<34x8xf32>, vector<34x8xf32> -> vector<34x8xf32>
    %257 = tpu.concatenate %211, %226, %241, %256 in 1 : vector<34x8xf32>, vector<34x8xf32>, vector<34x8xf32>, vector<34x8xf32> -> vector<34x32xf32>
    %c1_105 = arith.constant 1 : index
    %c0_106 = arith.constant 0 : index
    %c0_107 = arith.constant 0 : index
    %258 = vector.load %arg6[%c1_105, %c0_106, %c0_107] : memref<2x32x32xf32, #tpu.memory_space<vmem>>, vector<1x32x32xf32>
    %259 = vector.shape_cast %258 : vector<1x32x32xf32> to vector<32x32xf32>
    %cst_108 = arith.constant dense<0.000000e+00> : vector<34x32xf32>
    %260 = tpu.matmul %257, %259, %cst_108 {dimension_numbers = #tpu.dot_dimension_numbers<[1], [0], [0], [1], [0, 0, 1, 1], [], []>} : vector<34x32xf32>, vector<32x32xf32>, vector<34x32xf32> -> vector<34x32xf32>
    %261 = arith.addf %169, %260 : vector<34x32xf32>
    %c1_109 = arith.constant 1 : index
    %c0_110 = arith.constant 0 : index
    %c0_111 = arith.constant 0 : index
    %262 = vector.load %arg7[%c1_109, %c0_110, %c0_111] : memref<2x1x32xf32, #tpu.memory_space<vmem>>, vector<1x1x32xf32>
    %263 = vector.shape_cast %262 : vector<1x1x32xf32> to vector<1x32xf32>
    %264 = vector.broadcast %263 : vector<1x32xf32> to vector<34x32xf32>
    %265 = arith.addf %261, %264 : vector<34x32xf32>
    %c1_112 = arith.constant 1 : index
    %c0_113 = arith.constant 0 : index
    %c0_114 = arith.constant 0 : index
    %266 = vector.load %arg10[%c1_112, %c0_113, %c0_114] : memref<2x1x32xf32, #tpu.memory_space<vmem>>, vector<1x1x32xf32>
    %267 = vector.shape_cast %266 : vector<1x1x32xf32> to vector<1x32xf32>
    %c1_115 = arith.constant 1 : index
    %c0_116 = arith.constant 0 : index
    %c0_117 = arith.constant 0 : index
    %268 = vector.load %arg11[%c1_115, %c0_116, %c0_117] : memref<2x1x32xf32, #tpu.memory_space<vmem>>, vector<1x1x32xf32>
    %269 = vector.shape_cast %268 : vector<1x1x32xf32> to vector<1x32xf32>
    %cst_118 = arith.constant dense<0.000000e+00> : vector<34xf32>
    %270 = vector.multi_reduction <add>, %265, %cst_118 [1] : vector<34x32xf32> to vector<34xf32>
    %271 = vector.shape_cast %270 : vector<34xf32> to vector<34x1xf32>
    %cst_119 = arith.constant 3.200000e+01 : f32
    %272 = vector.broadcast %cst_119 : f32 to vector<34x1xf32>
    %273 = arith.divf %271, %272 : vector<34x1xf32>
    %274 = vector.broadcast %273 : vector<34x1xf32> to vector<34x32xf32>
    %275 = arith.subf %265, %274 : vector<34x32xf32>
    %276 = arith.mulf %275, %275 : vector<34x32xf32>
    %cst_120 = arith.constant dense<0.000000e+00> : vector<34xf32>
    %277 = vector.multi_reduction <add>, %276, %cst_120 [1] : vector<34x32xf32> to vector<34xf32>
    %278 = vector.shape_cast %277 : vector<34xf32> to vector<34x1xf32>
    %cst_121 = arith.constant 3.200000e+01 : f32
    %279 = vector.broadcast %cst_121 : f32 to vector<34x1xf32>
    %280 = arith.divf %278, %279 : vector<34x1xf32>
    %cst_122 = arith.constant 9.99999974E-6 : f32
    %281 = vector.broadcast %cst_122 : f32 to vector<34x1xf32>
    %282 = arith.addf %280, %281 : vector<34x1xf32>
    %283 = math.rsqrt %282 : vector<34x1xf32>
    %284 = vector.broadcast %283 : vector<34x1xf32> to vector<34x32xf32>
    %285 = arith.mulf %275, %284 : vector<34x32xf32>
    %286 = vector.broadcast %267 : vector<1x32xf32> to vector<34x32xf32>
    %287 = arith.mulf %285, %286 : vector<34x32xf32>
    %288 = vector.broadcast %269 : vector<1x32xf32> to vector<34x32xf32>
    %289 = arith.addf %287, %288 : vector<34x32xf32>
    %c1_123 = arith.constant 1 : index
    %c0_124 = arith.constant 0 : index
    %c0_125 = arith.constant 0 : index
    %290 = vector.load %arg12[%c1_123, %c0_124, %c0_125] : memref<2x32x64xf32, #tpu.memory_space<vmem>>, vector<1x32x64xf32>
    %291 = vector.shape_cast %290 : vector<1x32x64xf32> to vector<32x64xf32>
    %cst_126 = arith.constant dense<0.000000e+00> : vector<34x64xf32>
    %292 = tpu.matmul %289, %291, %cst_126 {dimension_numbers = #tpu.dot_dimension_numbers<[1], [0], [0], [1], [0, 0, 1, 1], [], []>} : vector<34x32xf32>, vector<32x64xf32>, vector<34x64xf32> -> vector<34x64xf32>
    %c1_127 = arith.constant 1 : index
    %c0_128 = arith.constant 0 : index
    %c0_129 = arith.constant 0 : index
    %293 = vector.load %arg13[%c1_127, %c0_128, %c0_129] : memref<2x1x64xf32, #tpu.memory_space<vmem>>, vector<1x1x64xf32>
    %294 = vector.shape_cast %293 : vector<1x1x64xf32> to vector<1x64xf32>
    %295 = vector.broadcast %294 : vector<1x64xf32> to vector<34x64xf32>
    %296 = arith.addf %292, %295 : vector<34x64xf32>
    %cst_130 = arith.constant 5.000000e-01 : f32
    %297 = vector.broadcast %cst_130 : f32 to vector<34x64xf32>
    %298 = arith.mulf %297, %296 : vector<34x64xf32>
    %cst_131 = arith.constant 0.707106769 : f32
    %299 = vector.broadcast %cst_131 : f32 to vector<34x64xf32>
    %300 = arith.mulf %296, %299 : vector<34x64xf32>
    %301 = math.erf %300 : vector<34x64xf32>
    %cst_132 = arith.constant 1.000000e+00 : f32
    %302 = vector.broadcast %cst_132 : f32 to vector<34x64xf32>
    %303 = arith.addf %302, %301 : vector<34x64xf32>
    %304 = arith.mulf %298, %303 : vector<34x64xf32>
    %c1_133 = arith.constant 1 : index
    %c0_134 = arith.constant 0 : index
    %c0_135 = arith.constant 0 : index
    %305 = vector.load %arg14[%c1_133, %c0_134, %c0_135] : memref<2x64x32xf32, #tpu.memory_space<vmem>>, vector<1x64x32xf32>
    %306 = vector.shape_cast %305 : vector<1x64x32xf32> to vector<64x32xf32>
    %cst_136 = arith.constant dense<0.000000e+00> : vector<34x32xf32>
    %307 = tpu.matmul %304, %306, %cst_136 {dimension_numbers = #tpu.dot_dimension_numbers<[1], [0], [0], [1], [0, 0, 1, 1], [], []>} : vector<34x64xf32>, vector<64x32xf32>, vector<34x32xf32> -> vector<34x32xf32>
    %308 = arith.addf %265, %307 : vector<34x32xf32>
    %c1_137 = arith.constant 1 : index
    %c0_138 = arith.constant 0 : index
    %c0_139 = arith.constant 0 : index
    %309 = vector.load %arg15[%c1_137, %c0_138, %c0_139] : memref<2x1x32xf32, #tpu.memory_space<vmem>>, vector<1x1x32xf32>
    %310 = vector.shape_cast %309 : vector<1x1x32xf32> to vector<1x32xf32>
    %311 = vector.broadcast %310 : vector<1x32xf32> to vector<34x32xf32>
    %312 = arith.addf %308, %311 : vector<34x32xf32>
    %313 = vector.extract_strided_slice %312 {offsets = [32, 0], sizes = [2, 32], strides = [1, 1]} : vector<34x32xf32> to vector<2x32xf32>
    %c0_140 = arith.constant 0 : index
    %c0_141 = arith.constant 0 : index
    %314 = vector.load %arg16[%c0_140, %c0_141] : memref<1x32xf32, #tpu.memory_space<vmem>>, vector<1x32xf32>
    %c0_142 = arith.constant 0 : index
    %c0_143 = arith.constant 0 : index
    %315 = vector.load %arg17[%c0_142, %c0_143] : memref<1x32xf32, #tpu.memory_space<vmem>>, vector<1x32xf32>
    %cst_144 = arith.constant dense<0.000000e+00> : vector<2xf32>
    %316 = vector.multi_reduction <add>, %313, %cst_144 [1] : vector<2x32xf32> to vector<2xf32>
    %317 = vector.shape_cast %316 : vector<2xf32> to vector<2x1xf32>
    %cst_145 = arith.constant 3.200000e+01 : f32
    %318 = vector.broadcast %cst_145 : f32 to vector<2x1xf32>
    %319 = arith.divf %317, %318 : vector<2x1xf32>
    %320 = vector.broadcast %319 : vector<2x1xf32> to vector<2x32xf32>
    %321 = arith.subf %313, %320 : vector<2x32xf32>
    %322 = arith.mulf %321, %321 : vector<2x32xf32>
    %cst_146 = arith.constant dense<0.000000e+00> : vector<2xf32>
    %323 = vector.multi_reduction <add>, %322, %cst_146 [1] : vector<2x32xf32> to vector<2xf32>
    %324 = vector.shape_cast %323 : vector<2xf32> to vector<2x1xf32>
    %cst_147 = arith.constant 3.200000e+01 : f32
    %325 = vector.broadcast %cst_147 : f32 to vector<2x1xf32>
    %326 = arith.divf %324, %325 : vector<2x1xf32>
    %cst_148 = arith.constant 9.99999974E-6 : f32
    %327 = vector.broadcast %cst_148 : f32 to vector<2x1xf32>
    %328 = arith.addf %326, %327 : vector<2x1xf32>
    %329 = math.rsqrt %328 : vector<2x1xf32>
    %330 = vector.broadcast %329 : vector<2x1xf32> to vector<2x32xf32>
    %331 = arith.mulf %321, %330 : vector<2x32xf32>
    %332 = vector.broadcast %314 : vector<1x32xf32> to vector<2x32xf32>
    %333 = arith.mulf %331, %332 : vector<2x32xf32>
    %334 = vector.broadcast %315 : vector<1x32xf32> to vector<2x32xf32>
    %335 = arith.addf %333, %334 : vector<2x32xf32>
    %c0_149 = arith.constant 0 : index
    %c0_150 = arith.constant 0 : index
    %336 = vector.load %arg18[%c0_149, %c0_150] : memref<32x128xf32, #tpu.memory_space<vmem>>, vector<32x128xf32>
    %cst_151 = arith.constant dense<0.000000e+00> : vector<2x128xf32>
    %337 = tpu.matmul %335, %336, %cst_151 {dimension_numbers = #tpu.dot_dimension_numbers<[1], [0], [0], [1], [0, 0, 1, 1], [], []>} : vector<2x32xf32>, vector<32x128xf32>, vector<2x128xf32> -> vector<2x128xf32>
    %c0_152 = arith.constant 0 : index
    %c0_153 = arith.constant 0 : index
    %338 = vector.load %arg19[%c0_152, %c0_153] : memref<1x128xf32, #tpu.memory_space<vmem>>, vector<1x128xf32>
    %339 = vector.broadcast %338 : vector<1x128xf32> to vector<2x128xf32>
    %340 = arith.addf %337, %339 : vector<2x128xf32>
    %c0_154 = arith.constant 0 : index
    %c0_155 = arith.constant 0 : index
    %341 = vector.load %arg20[%c0_154, %c0_155] : memref<2x128xf32, #tpu.memory_space<vmem>>, vector<2x128xf32>
    tpu.vector_store %arg20[%c0_154, %c0_155], %340 {strides = array<i32>} : memref<2x128xf32, #tpu.memory_space<vmem>>, vector<2x128xf32>,
    return
  }
  func.func @transform_0(%arg0: i32) -> (i32, i32) {
    %c0_i32 = arith.constant 0 : i32
    %c0_i32_0 = arith.constant 0 : i32
    %c0_i32_1 = arith.constant 0 : i32
    return %c0_i32, %c0_i32_0 : i32, i32
  }
  func.func @transform_1(%arg0: i32) -> (i32, i32) {
    %c0_i32 = arith.constant 0 : i32
    %c0_i32_0 = arith.constant 0 : i32
    %c0_i32_1 = arith.constant 0 : i32
    return %c0_i32, %c0_i32_0 : i32, i32
  }
  func.func @transform_2(%arg0: i32) -> (i32, i32) {
    %c0_i32 = arith.constant 0 : i32
    %c0_i32_0 = arith.constant 0 : i32
    %c0_i32_1 = arith.constant 0 : i32
    return %c0_i32, %c0_i32_0 : i32, i32
  }
  func.func @transform_3(%arg0: i32) -> (i32, i32) {
    %c0_i32 = arith.constant 0 : i32
    %c0_i32_0 = arith.constant 0 : i32
    %c0_i32_1 = arith.constant 0 : i32
    return %c0_i32, %c0_i32_0 : i32, i32
  }
  func.func @transform_4(%arg0: i32) -> (i32, i32, i32) {
    %c0_i32 = arith.constant 0 : i32
    %c0_i32_0 = arith.constant 0 : i32
    %c0_i32_1 = arith.constant 0 : i32
    %c0_i32_2 = arith.constant 0 : i32
    return %c0_i32, %c0_i32_0, %c0_i32_1 : i32, i32, i32
  }
  func.func @transform_5(%arg0: i32) -> (i32, i32, i32) {
    %c0_i32 = arith.constant 0 : i32
    %c0_i32_0 = arith.constant 0 : i32
    %c0_i32_1 = arith.constant 0 : i32
    %c0_i32_2 = arith.constant 0 : i32
    return %c0_i32, %c0_i32_0, %c0_i32_1 : i32, i32, i32
  }
  func.func @transform_6(%arg0: i32) -> (i32, i32, i32) {
    %c0_i32 = arith.constant 0 : i32
    %c0_i32_0 = arith.constant 0 : i32
    %c0_i32_1 = arith.constant 0 : i32
    %c0_i32_2 = arith.constant 0 : i32
    return %c0_i32, %c0_i32_0, %c0_i32_1 : i32, i32, i32
  }
  func.func @transform_7(%arg0: i32) -> (i32, i32, i32) {
    %c0_i32 = arith.constant 0 : i32
    %c0_i32_0 = arith.constant 0 : i32
    %c0_i32_1 = arith.constant 0 : i32
    %c0_i32_2 = arith.constant 0 : i32
    return %c0_i32, %c0_i32_0, %c0_i32_1 : i32, i32, i32
  }
  func.func @transform_8(%arg0: i32) -> (i32, i32, i32) {
    %c0_i32 = arith.constant 0 : i32
    %c0_i32_0 = arith.constant 0 : i32
    %c0_i32_1 = arith.constant 0 : i32
    %c0_i32_2 = arith.constant 0 : i32
    return %c0_i32, %c0_i32_0, %c0_i32_1 : i32, i32, i32
  }
  func.func @transform_9(%arg0: i32) -> (i32, i32, i32) {
    %c0_i32 = arith.constant 0 : i32
    %c0_i32_0 = arith.constant 0 : i32
    %c0_i32_1 = arith.constant 0 : i32
    %c0_i32_2 = arith.constant 0 : i32
    return %c0_i32, %c0_i32_0, %c0_i32_1 : i32, i32, i32
  }
  func.func @transform_10(%arg0: i32) -> (i32, i32, i32) {
    %c0_i32 = arith.constant 0 : i32
    %c0_i32_0 = arith.constant 0 : i32
    %c0_i32_1 = arith.constant 0 : i32
    %c0_i32_2 = arith.constant 0 : i32
    return %c0_i32, %c0_i32_0, %c0_i32_1 : i32, i32, i32
  }
  func.func @transform_11(%arg0: i32) -> (i32, i32, i32) {
    %c0_i32 = arith.constant 0 : i32
    %c0_i32_0 = arith.constant 0 : i32
    %c0_i32_1 = arith.constant 0 : i32
    %c0_i32_2 = arith.constant 0 : i32
    return %c0_i32, %c0_i32_0, %c0_i32_1 : i32, i32, i32
  }
  func.func @transform_12(%arg0: i32) -> (i32, i32, i32) {
    %c0_i32 = arith.constant 0 : i32
    %c0_i32_0 = arith.constant 0 : i32
    %c0_i32_1 = arith.constant 0 : i32
    %c0_i32_2 = arith.constant 0 : i32
    return %c0_i32, %c0_i32_0, %c0_i32_1 : i32, i32, i32
  }
  func.func @transform_13(%arg0: i32) -> (i32, i32, i32) {
    %c0_i32 = arith.constant 0 : i32
    %c0_i32_0 = arith.constant 0 : i32
    %c0_i32_1 = arith.constant 0 : i32
    %c0_i32_2 = arith.constant 0 : i32
    return %c0_i32, %c0_i32_0, %c0_i32_1 : i32, i32, i32
  }
  func.func @transform_14(%arg0: i32) -> (i32, i32, i32) {
    %c0_i32 = arith.constant 0 : i32
    %c0_i32_0 = arith.constant 0 : i32
    %c0_i32_1 = arith.constant 0 : i32
    %c0_i32_2 = arith.constant 0 : i32
    return %c0_i32, %c0_i32_0, %c0_i32_1 : i32, i32, i32
  }
  func.func @transform_15(%arg0: i32) -> (i32, i32) {
    %c0_i32 = arith.constant 0 : i32
    %c0_i32_0 = arith.constant 0 : i32
    %c0_i32_1 = arith.constant 0 : i32
    return %c0_i32, %c0_i32_0 : i32, i32
  }
  func.func @transform_16(%arg0: i32) -> (i32, i32) {
    %c0_i32 = arith.constant 0 : i32
    %c0_i32_0 = arith.constant 0 : i32
    %c0_i32_1 = arith.constant 0 : i32
    return %c0_i32, %c0_i32_0 : i32, i32
  }
  func.func @transform_17(%arg0: i32) -> (i32, i32) {
    %c0_i32 = arith.constant 0 : i32
    %c0_i32_0 = arith.constant 0 : i32
    %c0_i32_1 = arith.constant 0 : i32
    return %c0_i32, %c0_i32_0 : i32, i32
  }
  func.func @transform_18(%arg0: i32) -> (i32, i32) {
    %c0_i32 = arith.constant 0 : i32
    %c0_i32_0 = arith.constant 0 : i32
    %c0_i32_1 = arith.constant 0 : i32
    return %c0_i32, %c0_i32_0 : i32, i32
  }
  func.func @transform_19(%arg0: i32) -> (i32, i32) {
    %c0_i32 = arith.constant 0 : i32
    %c0_i32_0 = arith.constant 0 : i32
    %c0_i32_1 = arith.constant 0 : i32
    return %c0_i32, %c0_i32_0 : i32, i32
  }
}

</mosaic_0001>

<bundles_post_ra>
// kernel: ga_cct_forward.1
= control target key start
LH: loop header
LB: loop body
LE: loop exit
PB: predicated region body
PF: predicated region fallthrough
CT: control target
= control target key end

     0   :  { %s8403_s0 = inlined_call_operand.vmem [shape: f32[288,27], index: 0, kind: input, shape index: {}]   ;;  %s8404_s1 = inlined_call_operand.vmem [shape: f32[27,32], index: 1, kind: input, shape index: {}]   ;;  %s8405_s2 = inlined_call_operand.vmem [shape: f32[34,32], index: 2, kind: input, shape index: {}]   ;;  %s8406_s3 = inlined_call_operand.vmem [shape: f32[34,34], index: 3, kind: input, shape index: {}]   ;;  %s8407_s4 = inlined_call_operand.vmem [shape: f32[2,32,96], index: 4, kind: input, shape index: {}]   ;;  %s8408_s5 = inlined_call_operand.vmem [shape: f32[2,32,32], index: 5, kind: input, shape index: {}]   ;;  %s8409_s6 = inlined_call_operand.vmem [shape: f32[2,1,32], index: 6, kind: input, shape index: {}]   ;;  %s8410_s7 = inlined_call_operand.vmem [shape: f32[2,1,32], index: 7, kind: input, shape index: {}]   ;;  %s8411_s8 = inlined_call_operand.vmem [shape: f32[2,1,32], index: 8, kind: input, shape index: {}]   ;;  %s8412_s9 = inlined_call_operand.vmem [shape: f32[2,1,32], index: 9, kind: input, shape index: {}]   ;;  %s8413_s10 = inlined_call_operand.vmem [shape: f32[2,1,32], index: 10, kind: input, shape index: {}]   ;;  %s8414_s11 = inlined_call_operand.vmem [shape: f32[2,32,64], index: 11, kind: input, shape index: {}]   ;;  %s8415_s12 = inlined_call_operand.vmem [shape: f32[2,1,64], index: 12, kind: input, shape index: {}]   ;;  %s8416_s13 = inlined_call_operand.vmem [shape: f32[2,64,32], index: 13, kind: input, shape index: {}]   ;;  %s8417_s14 = inlined_call_operand.vmem [shape: f32[2,1,32], index: 14, kind: input, shape index: {}]   ;;  %s8418_s15 = inlined_call_operand.vmem [shape: f32[1,32], index: 15, kind: input, shape index: {}]   ;;  %s8419_s16 = inlined_call_operand.vmem [shape: f32[1,32], index: 16, kind: input, shape index: {}]   ;;  %s8420_s17 = inlined_call_operand.vmem [shape: f32[32,128], index: 17, kind: input, shape index: {}]   ;;  %s8421_s18 = inlined_call_operand.vmem [shape: f32[1,128], index: 18, kind: input, shape index: {}]   ;;  %s8422_s19 = inlined_call_operand.hbm [shape: f32[2,128], index: 19, kind: output, shape index: {}]  }
   0x1   :  { %8443 = sst [smem:[#allocation5_spill]] %s8403_s0 }
   0x2   :  { %8444 = sst [smem:[#allocation6_spill]] %s8404_s1 }
   0x3   :  { %8445 = sst [smem:[#allocation7_spill]] %s8405_s2 }
   0x4   :  { %8446 = sst [smem:[#allocation8_spill]] %s8406_s3 }
   0x5   :  { %s8447_s20 = sld [smem:[#allocation6_spill]]  ;;  %vm212_vm0 = vcmask 1042432   ;;  %vm103_vm1 = vcmask 220160   ;;  %s8448_s26 = sld [smem:[#allocation5_spill]]  ;;  %vm6464_vm2 = vmmov 1  }
   0x6   :  { %vm5850_vm3 = vmpackc.low %vm212_vm0, %vm6464_vm2 }
   0xb   :  { %v99_v0 = vld [vmem:[%s8447_s20] sm:$0xff]  ;;  %v100_v1 = vld [vmem:[%s8447_s20 + $0x8] sm:$0xff]  ;;  %v101_v2 = vld [vmem:[%s8447_s20 + $0x10] sm:$0xff] }
   0xc   :  { %v5845_v3 = vpack.c.bf16 %v100_v1, %v99_v0  ;;  %v102_v4 = vld [vmem:[%s8447_s20 + $0x18] sm:$0x7]  ;;  %v63_v5 = vld [vmem:[%s8448_s26] sm:$0xff]  ;;  %v64_v7 = vld [vmem:[%s8448_s26 + $0x8] sm:$0xff] }
   0xd   :  { %v5849_v6 = vpack.c.bf16 %v102_v4, %v101_v2  ;;  %5180 = vmatprep.mubr.msk.f32.mxu0 %vm103_vm1, %v63_v5  ;;  %v65_v8 = vld [vmem:[%s8448_s26 + $0x10] sm:$0xff]  ;;  %v66_v9 = vld [vmem:[%s8448_s26 + $0x18] sm:$0xff]  ;;  %v67_v10 = vld [vmem:[%s8448_s26 + $0x20] sm:$0xff] }
   0xe   :  { %5846 = vmatprep.subr.bf16.mxu0 %v5845_v3 }
   0xf   :  { %5848 = vmatpush3.bf16.msra.mxu0 %v5845_v3 }
  0x10   :  { %5851 = vmatprep.subr.msk.bf16.mxu0 %vm5850_vm3, %v5849_v6 }
  0x13   :  { %5854 = vmatpush3.bf16.msk.msra.mxu0 %vm5850_vm3, %v5849_v6 }
  0x16   :  { %5181 = vmatmul.mubr.msk.f32.vlgmr.msra.gmra.mrb[0].mxu0 %vm103_vm1, %v64_v7 }
  0x17   :  { %5183 = vmatprep.mubr.msk.f32.mxu0 %vm103_vm1, %v65_v8 }
  0x18   :  { %24 = vsyncpa [#allocation3], 0  ;;  %v68_v11 = vld [vmem:[%s8448_s26 + $0x28] sm:$0xff]  ;;  %v69_v12 = vld [vmem:[%s8448_s26 + $0x30] sm:$0xff]  ;;  %s8449_s28 = sld [smem:[#allocation7_spill]]  ;;  %vm546_vm4 = vcmask 261120  }
  0x19   :  { %v70_v13 = vld [vmem:[%s8448_s26 + $0x38] sm:$0xff]  ;;  %v71_v14 = vld [vmem:[%s8448_s26 + $0x40] sm:$0xff]  ;;  %v72_v15 = vld [vmem:[%s8448_s26 + $0x48] sm:$0xff]  ;;  %vm559_vm5 = vcmask 254976   ;;  %vm6466_vm6 = vmmov 0   ;;  %s6468_s22 = smov 96  }
  0x1a   :  { %5184 = vmatmul.mubr.msk.f32.gmra.mrb[2].mxu0 %vm103_vm1, %v66_v9  ;;  %v73_v16 = vld [vmem:[%s8448_s26 + $0x50] sm:$0xff]  ;;  %v74_v17 = vld [vmem:[%s8448_s26 + $0x58] sm:$0xff]  ;;  %v75_v18 = vld [vmem:[%s8448_s26 + $0x60] sm:$0xff]  ;;  %vm760_vm7 = vcmask 64512   ;;  %s8452_s24 = sld [smem:[#allocation8_spill]]  ;;  %vm871_vm9 = vcmask 277504  }
  0x1b   :  { %5186 = vmatprep.mubr.msk.f32.mxu0 %vm103_vm1, %v67_v10  ;;  %v76_v19 = vld [vmem:[%s8448_s26 + $0x68] sm:$0xff]  ;;  %v77_v20 = vld [vmem:[%s8448_s26 + $0x70] sm:$0xff]  ;;  %v78_v21 = vld [vmem:[%s8448_s26 + $0x78] sm:$0xff]  ;;  %vm884_vm10 = vcmask 271360   ;;  %s8433_s21 = smov 64   ;;  %s6470_s1 = smov 88  }
  0x1c   :  { %v79_v22 = vld [vmem:[%s8448_s26 + $0x80] sm:$0xff]  ;;  %v80_v23 = vld [vmem:[%s8448_s26 + $0x88] sm:$0xff]  ;;  %v81_v24 = vld [vmem:[%s8448_s26 + $0x90] sm:$0xff]  ;;  %s6471_s2 = smov 80   ;;  %s6472_s23 = smov 120   ;;  %vm957_vm11 = vcmask 1041408  }
  0x1d   :  { %v82_v25 = vld [vmem:[%s8448_s26 + $0x98] sm:$0xff]  ;;  %v83_v26 = vld [vmem:[%s8448_s26 + $0xa0] sm:$0xff]  ;;  %v84_v27 = vld [vmem:[%s8448_s26 + $0xa8] sm:$0xff]  ;;  %s8437_s25 = smov 72   ;;  %s8439_s3 = smov 112   ;;  %vm2033_vm12 = vcmask 130048  }
  0x1e   :  { %5187 = vmatmul.mubr.msk.f32.gmra.mrb[4].mxu0 %vm103_vm1, %v68_v11  ;;  %v85_v28 = vld [vmem:[%s8448_s26 + $0xb0] sm:$0xff]  ;;  %v86_v29 = vld [vmem:[%s8448_s26 + $0xb8] sm:$0xff]  ;;  %v87_v30 = vld [vmem:[%s8448_s26 + $0xc0] sm:$0xff]  ;;  %s8431_s27 = smov 56   ;;  %s8429_s29 = smov 48   ;;  %vm2039_vm13 = vcmask 195584  }
  0x1f   :  { %5189 = vmatprep.mubr.msk.f32.mxu0 %vm103_vm1, %v69_v12  ;;  %v88_v31 = vld [vmem:[%s8448_s26 + $0xc8] sm:$0xff]  ;;  %v89_v32 = vld [vmem:[%s8448_s26 + $0xd0] sm:$0xff]  ;;  %v90_v33 = vld [vmem:[%s8448_s26 + $0xd8] sm:$0xff]  ;;  %s8427_s0 = smov 40   ;;  %s6479_s30 = smov 8   ;;  %vm2409_vm14 = vcmask 523264  }
  0x20   :  { %v91_v34 = vld [vmem:[%s8448_s26 + $0xe0] sm:$0xff]  ;;  %v92_v35 = vld [vmem:[%s8448_s26 + $0xe8] sm:$0xff]  ;;  %v93_v36 = vld [vmem:[%s8448_s26 + $0xf0] sm:$0xff] }
  0x21   :  { %v94_v37 = vld [vmem:[%s8448_s26 + $0xf8] sm:$0xff]  ;;  %v95_v38 = vld [vmem:[%s8448_s26 + $0x100] sm:$0xff]  ;;  %v96_v39 = vld [vmem:[%s8448_s26 + $0x108] sm:$0xff] }
  0x22   :  { %5190 = vmatmul.mubr.msk.f32.gmra.mrb[6].mxu0 %vm103_vm1, %v70_v13  ;;  %v97_v40 = vld [vmem:[%s8448_s26 + $0x110] sm:$0xff]  ;;  %v98_v41 = vld [vmem:[%s8448_s26 + $0x118] sm:$0xff]  ;;  %vm6884_vm8 = vmpackc.low %vm760_vm7, %vm760_vm7  ;;  %s8435_s26 = smov 104  }
  0x23   :  { %5192 = vmatprep.mubr.msk.f32.mxu0 %vm103_vm1, %v71_v14 }
  0x26   :  { %5193 = vmatmul.mubr.msk.f32.gmra.mrb[8].mxu0 %vm103_vm1, %v72_v15 }
  0x27   :  { %5195 = vmatprep.mubr.msk.f32.mxu0 %vm103_vm1, %v73_v16 }
  0x2a   :  { %5196 = vmatmul.mubr.msk.f32.gmra.mrb[10].mxu0 %vm103_vm1, %v74_v17 }
  0x2b   :  { %5198 = vmatprep.mubr.msk.f32.mxu0 %vm103_vm1, %v75_v18 }
  0x2e   :  { %5199 = vmatmul.mubr.msk.f32.gmra.mrb[12].mxu0 %vm103_vm1, %v76_v19 }
  0x2f   :  { %5201 = vmatprep.mubr.msk.f32.mxu0 %vm103_vm1, %v77_v20 }
  0x32   :  { %5202 = vmatmul.mubr.msk.f32.gmra.mrb[14].mxu0 %vm103_vm1, %v78_v21 }
  0x33   :  { %5204 = vmatprep.mubr.msk.f32.mxu0 %vm103_vm1, %v79_v22 }
  0x36   :  { %5205 = vmatmul.mubr.msk.f32.gmra.mrb[16].mxu0 %vm103_vm1, %v80_v23 }
  0x37   :  { %5207 = vmatprep.mubr.msk.f32.mxu0 %vm103_vm1, %v81_v24 }
  0x3a   :  { %5208 = vmatmul.mubr.msk.f32.gmra.mrb[18].mxu0 %vm103_vm1, %v82_v25 }
  0x3b   :  { %5210 = vmatprep.mubr.msk.f32.mxu0 %vm103_vm1, %v83_v26 }
  0x3e   :  { %5211 = vmatmul.mubr.msk.f32.gmra.mrb[20].mxu0 %vm103_vm1, %v84_v27 }
  0x3f   :  { %5213 = vmatprep.mubr.msk.f32.mxu0 %vm103_vm1, %v85_v28 }
  0x42   :  { %5214 = vmatmul.mubr.msk.f32.gmra.mrb[22].mxu0 %vm103_vm1, %v86_v29 }
  0x43   :  { %5216 = vmatprep.mubr.msk.f32.mxu0 %vm103_vm1, %v87_v30 }
  0x46   :  { %5217 = vmatmul.mubr.msk.f32.gmra.mrb[24].mxu0 %vm103_vm1, %v88_v31 }
  0x47   :  { %5219 = vmatprep.mubr.msk.f32.mxu0 %vm103_vm1, %v89_v32 }
  0x4a   :  { %5220 = vmatmul.mubr.msk.f32.gmra.mrb[26].mxu0 %vm103_vm1, %v90_v33 }
  0x4b   :  { %5222 = vmatprep.mubr.msk.f32.mxu0 %vm103_vm1, %v91_v34 }
  0x4e   :  { %5223 = vmatmul.mubr.msk.f32.gmra.mrb[28].mxu0 %vm103_vm1, %v92_v35 }
  0x4f   :  { %5225 = vmatprep.mubr.msk.f32.mxu0 %vm103_vm1, %v93_v36 }
  0x52   :  { %5226 = vmatmul.mubr.msk.f32.gmra.mrb[30].mxu0 %vm103_vm1, %v94_v37 }
  0x53   :  { %5228 = vmatprep.mubr.msk.f32.mxu0 %vm103_vm1, %v95_v38 }
  0x56   :  { %5229 = vmatmul.mubr.msk.f32.gmra.mrb[32].mxu0 %vm103_vm1, %v96_v39 }
  0x57   :  { %5231 = vmatprep.mubr.msk.f32.mxu0 %vm103_vm1, %v97_v40 }
  0x5a   :  { %5232 = vmatmul.mubr.msk.f32.gmra.mrb[34].mxu0 %vm103_vm1, %v98_v41 }
  0xe9   :  { %v5182_v42 = vpop.f32.mrb[0].mxu0 }
  0xea   :  { %v282_v43 = vpop.f32.mrb[1].mxu0  ;;  %v462_v47 = vmax.f32 %v5182_v42, 0.0 }
  0xeb   :  { %v461_v50 = vmax.f32 %v282_v43, 0.0 }
  0xed   :  { %v5185_v44 = vpop.f32.mrb[2].mxu0 }
  0xee   :  { %v292_v45 = vpop.f32.mrb[3].mxu0  ;;  %v464_v55 = vmax.f32 %v5185_v44, 0.0 }
  0xef   :  { %v463_v58 = vmax.f32 %v292_v45, 0.0 }
  0xf1   :  { %v5188_v46 = vpop.f32.mrb[4].mxu0 }
  0xf2   :  { %v466_v48 = vmax.f32 %v5188_v46, 0.0  ;;  %v302_v49 = vpop.f32.mrb[5].mxu0 }
  0xf3   :  { %v465_v51 = vmax.f32 %v302_v49, 0.0 }
  0xf4   :  { %v6739_v52 = vmax.f32 %v462_v47, %v466_v48 }
  0xf5   :  { %v6741_v53 = vmax.f32 %v461_v50, %v465_v51  ;;  %v5191_v54 = vpop.f32.mrb[6].mxu0 }
  0xf6   :  { %v468_v56 = vmax.f32 %v5191_v54, 0.0  ;;  %v312_v57 = vpop.f32.mrb[7].mxu0 }
  0xf7   :  { %v467_v59 = vmax.f32 %v312_v57, 0.0 }
  0xf8   :  { %v6743_v60 = vmax.f32 %v464_v55, %v468_v56 }
  0xf9   :  { %v6745_v61 = vmax.f32 %v463_v58, %v467_v59  ;;  %v5194_v62 = vpop.f32.mrb[8].mxu0 }
  0xfa   :  { %v322_v63 = vpop.f32.mrb[9].mxu0  ;;  %v470_v3 = vmax.f32 %v5194_v62, 0.0 }
  0xfb   :  { %v469_v6 = vmax.f32 %v322_v63, 0.0 }
  0xfd   :  { %v5197_v0 = vpop.f32.mrb[10].mxu0 }
  0xfe   :  { %v332_v1 = vpop.f32.mrb[11].mxu0  ;;  %v472_v11 = vmax.f32 %v5197_v0, 0.0 }
  0xff   :  { %v471_v15 = vmax.f32 %v332_v1, 0.0 }
 0x101   :  { %v5200_v2 = vpop.f32.mrb[12].mxu0 }
 0x102   :  { %v474_v4 = vmax.f32 %v5200_v2, 0.0  ;;  %v342_v5 = vpop.f32.mrb[13].mxu0 }
 0x103   :  { %v473_v7 = vmax.f32 %v342_v5, 0.0 }
 0x104   :  { %v502_v8 = vmax.f32 %v470_v3, %v474_v4 }
 0x105   :  { %v501_v9 = vmax.f32 %v469_v6, %v473_v7  ;;  %v5203_v10 = vpop.f32.mrb[14].mxu0 }
 0x106   :  { %v514_v12 = vmax.f32 %v6739_v52, %v502_v8  ;;  %v476_v13 = vmax.f32 %v5203_v10, 0.0  ;;  %v352_v14 = vpop.f32.mrb[15].mxu0  ;;  %v529_v10 = vld [vmem:[%s8449_s28] sm:$0xff] }
 0x107   :  { %v513_v16 = vmax.f32 %v6741_v53, %v501_v9  ;;  %v475_v17 = vmax.f32 %v352_v14, 0.0 }
 0x108   :  { %v504_v18 = vmax.f32 %v472_v11, %v476_v13 }
 0x109   :  { %v503_v19 = vmax.f32 %v471_v15, %v475_v17  ;;  %v5206_v20 = vpop.f32.mrb[16].mxu0 }
 0x10a   :  { %v516_v21 = vmax.f32 %v6743_v60, %v504_v18  ;;  %v362_v22 = vpop.f32.mrb[17].mxu0  ;;  %v478_v27 = vmax.f32 %v5206_v20, 0.0  ;;  %v531_v20 = vld [vmem:[%s8449_s28 + $0x10] sm:$0xff] }
 0x10b   :  { %v515_v23 = vmax.f32 %v6745_v61, %v503_v19  ;;  %v477_v30 = vmax.f32 %v362_v22, 0.0 }
 0x10d   :  { %v5209_v24 = vpop.f32.mrb[18].mxu0 }
 0x10e   :  { %v372_v25 = vpop.f32.mrb[19].mxu0  ;;  %v480_v35 = vmax.f32 %v5209_v24, 0.0  ;;  %v532_v24 = vld [vmem:[%s8449_s28 + $0x18] sm:$0xff] }
 0x10f   :  { %v479_v38 = vmax.f32 %v372_v25, 0.0 }
 0x111   :  { %v5212_v26 = vpop.f32.mrb[20].mxu0 }
 0x112   :  { %v482_v28 = vmax.f32 %v5212_v26, 0.0  ;;  %v382_v29 = vpop.f32.mrb[21].mxu0  ;;  %v533_v26 = vld [vmem:[%s8449_s28 + $0x20] sm:$0x3] }
 0x113   :  { %v481_v31 = vmax.f32 %v382_v29, 0.0 }
 0x114   :  { %v506_v32 = vmax.f32 %v478_v27, %v482_v28 }
 0x115   :  { %v505_v33 = vmax.f32 %v477_v30, %v481_v31  ;;  %v5215_v34 = vpop.f32.mrb[22].mxu0  ;;  %v560_v30 = vsel %vm559_vm5, %v533_v26, 0.0 }
 0x116   :  { %v484_v36 = vmax.f32 %v5215_v34, 0.0  ;;  %v392_v37 = vpop.f32.mrb[23].mxu0 }
 0x117   :  { %v483_v39 = vmax.f32 %v392_v37, 0.0 }
 0x118   :  { %v508_v40 = vmax.f32 %v480_v35, %v484_v36 }
 0x119   :  { %v507_v41 = vmax.f32 %v479_v38, %v483_v39  ;;  %v5218_v42 = vpop.f32.mrb[24].mxu0 }
 0x11a   :  { %v402_v43 = vpop.f32.mrb[25].mxu0  ;;  %v486_v47 = vmax.f32 %v5218_v42, 0.0 }
 0x11b   :  { %v485_v50 = vmax.f32 %v402_v43, 0.0 }
 0x11d   :  { %v5221_v44 = vpop.f32.mrb[26].mxu0 }
 0x11e   :  { %v412_v45 = vpop.f32.mrb[27].mxu0  ;;  %v488_v55 = vmax.f32 %v5221_v44, 0.0 }
 0x11f   :  { %v487_v59 = vmax.f32 %v412_v45, 0.0 }
 0x121   :  { %v5224_v46 = vpop.f32.mrb[28].mxu0 }
 0x122   :  { %v490_v48 = vmax.f32 %v5224_v46, 0.0  ;;  %v422_v49 = vpop.f32.mrb[29].mxu0 }
 0x123   :  { %v489_v51 = vmax.f32 %v422_v49, 0.0 }
 0x124   :  { %v510_v52 = vmax.f32 %v486_v47, %v490_v48 }
 0x125   :  { %v509_v53 = vmax.f32 %v485_v50, %v489_v51  ;;  %v5227_v54 = vpop.f32.mrb[30].mxu0 }
 0x126   :  { %v518_v56 = vmax.f32 %v506_v32, %v510_v52  ;;  %v492_v57 = vmax.f32 %v5227_v54, 0.0  ;;  %v432_v58 = vpop.f32.mrb[31].mxu0 }
 0x127   :  { %v517_v60 = vmax.f32 %v505_v33, %v509_v53  ;;  %v491_v61 = vmax.f32 %v432_v58, 0.0  ;;  %v637_v58 = vld [vmem:[%s8407_s4 + $0x8] sm:$0xff] }
 0x128   :  { %v512_v62 = vmax.f32 %v488_v55, %v492_v57  ;;  %v522_v63 = vmax.f32 %v514_v12, %v518_v56  ;;  %v530_v12 = vld [vmem:[%s8449_s28 + $0x8] sm:$0xff]  ;;  %v636_v57 = vld [vmem:[%s8407_s4] sm:$0xff] }
 0x129   :  { %v511_v0 = vmax.f32 %v487_v59, %v491_v61  ;;  %v5230_v1 = vpop.f32.mrb[32].mxu0  ;;  %v521_v2 = vmax.f32 %v513_v16, %v517_v60  ;;  %v5856_v59 = vpack.c.bf16 %v637_v58, %v636_v57  ;;  %v638_v60 = vld [vmem:[%s8407_s4 + $0x10] sm:$0xff]  ;;  %v639_v61 = vld [vmem:[%s8407_s4 + $0x18] sm:$0xff] }
 0x12a   :  { %v520_v3 = vmax.f32 %v508_v40, %v512_v62  ;;  %v494_v4 = vmax.f32 %v5230_v1, 0.0  ;;  %v442_v5 = vpop.f32.mrb[33].mxu0  ;;  %v6465_v62 = vmov 0.0|0.0  }
 0x12b   :  { %v519_v6 = vmax.f32 %v507_v41, %v511_v0  ;;  %v493_v7 = vmax.f32 %v442_v5, 0.0  ;;  %5855 = vmatprep.subr.bf16.mxu1 %v6465_v62  ;;  %v5859_v0 = vpack.c.bf16 %v639_v61, %v638_v60  ;;  %5883 = vmatprep.subr.bf16.mxu0 %v6465_v62 }
 0x12c   :  { %v526_v8 = vmax.f32 %v522_v63, %v494_v4  ;;  %v524_v9 = vmax.f32 %v516_v21, %v520_v3  ;;  %v6467_v63 = vmov 0.0   ;;  %5857 = vmatpush3.bf16.msra.mxu1 %v5856_v59 }
 0x12d   :  { %v525_v11 = vmax.f32 %v521_v2, %v493_v7  ;;  %v5233_v13 = vpop.f32.mrb[34].mxu0  ;;  %v523_v14 = vmax.f32 %v515_v23, %v519_v6  ;;  %5242 = vmatprep.mubr.msk.f32.mxu1 %vm6466_vm6, %v6467_v63  ;;  %5858 = vmatprep.subr.bf16.mxu1 %v6465_v62 }
 0x12e   :  { %v496_v15 = vmax.f32 %v5233_v13, 0.0  ;;  %v452_v16 = vpop.f32.mrb[35].mxu0  ;;  %v6762_v21 = vadd.f32 %v530_v12, %v526_v8  ;;  %5342 = vmatprep.mubr.msk.f32.mxu0 %vm6466_vm6, %v6467_v63 }
 0x12f   :  { %v495_v17 = vmax.f32 %v452_v16, 0.0  ;;  %v6757_v18 = vadd.f32 %v529_v10, %v525_v11 }
 0x130   :  { %v528_v19 = vmax.f32 %v524_v9, %v496_v15  ;;  %v550_v28 = vsel %vm546_vm4, %v6762_v21, 0.0  ;;  %5860 = vmatpush3.bf16.msra.mxu1 %v5859_v0 }
 0x131   :  { %v527_v22 = vmax.f32 %v523_v14, %v495_v17  ;;  %v547_v23 = vsel %vm546_vm4, %v6757_v18, 0.0  ;;  %5861 = vmatprep.subr.bf16.mxu1 %v6465_v62  ;;  %v4674_v17 = vld [vmem:[%s8410_s7] ss:$0 sm:$0xff] }
 0x132   :  { %548 = vadd.xlane.f32.xlu0 %v547_v23  ;;  %v6774_v27 = vadd.f32 %v532_v24, %v528_v19 }
 0x133   :  { %v6769_v25 = vadd.f32 %v531_v20, %v527_v22  ;;  %v4675_v20 = vld [vmem:[%s8411_s8] ss:$0 sm:$0xff] }
 0x134   :  { %v556_v31 = vsel %vm546_vm4, %v6774_v27, 0.0 }
 0x135   :  { %v553_v29 = vsel %vm546_vm4, %v6769_v25, 0.0 }
 0x136   :  { %551 = vadd.xlane.f32.xlu0 %v550_v28  ;;  %554 = vadd.xlane.f32.xlu1 %v553_v29 }
 0x13a   :  { %561 = vadd.xlane.f32.xlu0 %v560_v30  ;;  %557 = vadd.xlane.f32.xlu1 %v556_v31 }
 0x1bf   :  { %v549_v32 = vpop.xlane.xlu0 %548 }
 0x1c0   :  { %v564_v33 = vmul.f32 0.03125, %v549_v32 }
 0x1c2   :  { %v6784_v34 = vsub.f32 %v6757_v18, %v564_v33 }
 0x1c3   :  { %v552_v35 = vpop.xlane.xlu0 %551  ;;  %v555_v36 = vpop.xlane.xlu1 %554 }
 0x1c4   :  { %v565_v37 = vmul.f32 0.03125, %v552_v35  ;;  %v566_v38 = vmul.f32 0.03125, %v555_v36  ;;  %v574_v39 = vmul.f32 %v6784_v34, %v6784_v34 }
 0x1c6   :  { %v6789_v40 = vsub.f32 %v6762_v21, %v565_v37  ;;  %v6792_v41 = vsub.f32 %v6769_v25, %v566_v38  ;;  %v579_v42 = vsel %vm546_vm4, %v574_v39, 0.0 }
 0x1c7   :  { %v562_v43 = vpop.xlane.xlu0 %561  ;;  %580 = vadd.xlane.f32.xlu1 %v579_v42  ;;  %v558_v44 = vpop.xlane.xlu1 %557 }
 0x1c8   :  { %v568_v45 = vmul.f32 0.03125, %v562_v43  ;;  %v567_v46 = vmul.f32 0.03125, %v558_v44  ;;  %v575_v47 = vmul.f32 %v6789_v40, %v6789_v40  ;;  %v576_v48 = vmul.f32 %v6792_v41, %v6792_v41 }
 0x1ca   :  { %v6799_v49 = vsub.f32 %v533_v26, %v568_v45  ;;  %v6802_v50 = vsub.f32 %v6774_v27, %v567_v46  ;;  %v582_v51 = vsel %vm546_vm4, %v575_v47, 0.0  ;;  %v585_v52 = vsel %vm546_vm4, %v576_v48, 0.0 }
 0x1cb   :  { %583 = vadd.xlane.f32.xlu0 %v582_v51  ;;  %586 = vadd.xlane.f32.xlu1 %v585_v52 }
 0x1cc   :  { %v578_v53 = vmul.f32 %v6799_v49, %v6799_v49  ;;  %v577_v54 = vmul.f32 %v6802_v50, %v6802_v50 }
 0x1ce   :  { %v591_v55 = vsel %vm559_vm5, %v578_v53, 0.0  ;;  %v588_v56 = vsel %vm546_vm4, %v577_v54, 0.0 }
 0x1cf   :  { %592 = vadd.xlane.f32.xlu1 %v591_v55  ;;  %589 = vadd.xlane.f32.xlu0 %v588_v56 }
 0x254   :  { %v581_v1 = vpop.xlane.xlu1 %580 }
 0x255   :  { %v594_v2 = vmul.f32 0.03125, %v581_v1 }
 0x257   :  { %v599_v3 = vadd.f32 1e-05, %v594_v2  ;;  %v6919_v2 = vld [vmem:[%s8452_s24] sm:$0xff] }
 0x258   :  { %v584_v4 = vpop.xlane.xlu0 %583  ;;  %v587_v5 = vpop.xlane.xlu1 %586 }
 0x259   :  { %6212 = vrsqrt.f32 %v599_v3  ;;  %v595_v6 = vmul.f32 0.03125, %v584_v4  ;;  %v596_v7 = vmul.f32 0.03125, %v587_v5 }
 0x25b   :  { %v600_v8 = vadd.f32 1e-05, %v595_v6  ;;  %v601_v9 = vadd.f32 1e-05, %v596_v7  ;;  %v6925_v6 = vld [vmem:[%s8452_s24 + $0x8] sm:$0xff] }
 0x25c   :  { %v590_v10 = vpop.xlane.xlu0 %589  ;;  %v593_v11 = vpop.xlane.xlu1 %592 }
 0x25d   :  { %6214 = vrsqrt.f32 %v600_v8  ;;  %v597_v13 = vmul.f32 0.03125, %v590_v10  ;;  %v598_v14 = vmul.f32 0.03125, %v593_v11  ;;  %v6932_v11 = vld [vmem:[%s8452_s24 + $0x10] sm:$0xff] }
 0x25e   :  { %6216 = vrsqrt.f32 %v601_v9 }
 0x25f   :  { %v602_v12 = vadd.f32 1e-05, %v597_v13  ;;  %v603_v15 = vadd.f32 1e-05, %v598_v14 }
 0x261   :  { %6218 = vrsqrt.f32 %v602_v12 }
 0x262   :  { %6220 = vrsqrt.f32 %v603_v15 }
 0x263   :  { %v6213_v16 = vpop.eup %6212 }
 0x264   :  { %v609_v19 = vmul.f32 %v6213_v16, %v6784_v34  ;;  %v6939_v16 = vld [vmem:[%s8452_s24 + $0x18] sm:$0xff] }
 0x266   :  { %v620_v22 = vmul.f32 %v4674_v17, %v609_v19 }
 0x267   :  { %v6215_v23 = vpop.eup %6214 }
 0x268   :  { %v6217_v24 = vpop.eup %6216  ;;  %v631_v26 = vadd.f32 %v4675_v20, %v620_v22  ;;  %v610_v28 = vmul.f32 %v6215_v23, %v6789_v40  ;;  %v6946_v23 = vld [vmem:[%s8452_s24 + $0x20] sm:$0x3] }
 0x269   :  { %v611_v29 = vmul.f32 %v6217_v24, %v6792_v41 }
 0x26a   :  { %5243 = vmatmul.mubr.msk.f32.vlgmr.msra.gmra.mrb[0].mxu1 %vm546_vm4, %v631_v26  ;;  %v621_v30 = vmul.f32 %v4674_v17, %v610_v28 }
 0x26b   :  { %v6219_v31 = vpop.eup %6218  ;;  %5245 = vmatprep.mubr.msk.f32.mxu1 %vm6466_vm6, %v6467_v63  ;;  %v622_v33 = vmul.f32 %v4674_v17, %v611_v29 }
 0x26c   :  { %v632_v32 = vadd.f32 %v4675_v20, %v621_v30  ;;  %v612_v34 = vmul.f32 %v6219_v31, %v6802_v50  ;;  %v6221_v35 = vpop.eup %6220 }
 0x26d   :  { %v633_v36 = vadd.f32 %v4675_v20, %v622_v33  ;;  %v613_v38 = vmul.f32 %v6221_v35, %v6799_v49 }
 0x26e   :  { %5246 = vmatmul.mubr.msk.f32.gmra.mrb[2].mxu1 %vm546_vm4, %v632_v32  ;;  %v623_v37 = vmul.f32 %v4674_v17, %v612_v34 }
 0x26f   :  { %5248 = vmatprep.mubr.msk.f32.mxu1 %vm6466_vm6, %v6467_v63  ;;  %v624_v40 = vmul.f32 %v4674_v17, %v613_v38 }
 0x270   :  { %v634_v39 = vadd.f32 %v4675_v20, %v623_v37 }
 0x271   :  { %v635_v41 = vadd.f32 %v4675_v20, %v624_v40 }
 0x272   :  { %5249 = vmatmul.mubr.msk.f32.gmra.mrb[4].mxu1 %vm546_vm4, %v633_v36 }
 0x273   :  { %5251 = vmatprep.mubr.msk.f32.mxu1 %vm6466_vm6, %v6467_v63 }
 0x276   :  { %5252 = vmatmul.mubr.msk.f32.gmra.mrb[6].mxu1 %vm546_vm4, %v634_v39 }
 0x277   :  { %5254 = vmatprep.mubr.msk.f32.mxu1 %vm6466_vm6, %v6467_v63 }
 0x27a   :  { %5255 = vmatmul.mubr.msk.f32.gmra.mrb[8].mxu1 %vm546_vm4, %v635_v41 }
 0x27b   :  { %5267 = vmatprep.mubr.msk.f32.mxu1 %vm6466_vm6, %v6467_v63 }
 0x33d   :  { %v6858_v42 = vpop.f32.mrb[0].mxu1 }
 0x33e   :  { %v5244_v43 = vpop.f32.mrb[1].mxu1 }
 0x341   :  { %v6860_v44 = vpop.f32.mrb[2].mxu1 }
 0x342   :  { %v5247_v45 = vpop.f32.mrb[3].mxu1  ;;  %v6864_v46 = vpack.i.bf16 %v6860_v44, %v6858_v42 }
 0x344   :  { %6053 = vrot.lane.b32.xlu0 %v6864_v46, %s6468_s22 }
 0x345   :  { %v6868_v47 = vpop.f32.mrb[4].mxu1 }
 0x346   :  { %v5250_v48 = vpop.f32.mrb[5].mxu1 }
 0x349   :  { %v6870_v49 = vpop.f32.mrb[6].mxu1 }
 0x34a   :  { %v5253_v50 = vpop.f32.mrb[7].mxu1  ;;  %v6874_v51 = vpack.i.bf16 %v6870_v49, %v6868_v47 }
 0x34c   :  { %6058 = vrot.lane.b32.xlu1 %v6874_v51, %s6468_s22 }
 0x34d   :  { %v6878_v52 = vpop.f32.mrb[8].mxu1 }
 0x34e   :  { %v5256_v53 = vpop.f32.mrb[9].mxu1 }
 0x350   :  { %758 = vrot.lane.b32.xlu1 %v6878_v52, %s6468_s22 }
 0x3b6   :  { %v6054_v54 = vpop.permute.xlu0 %6053 }
 0x3b7   :  { %v6056_v55 = vunpack.i.h.bf16 %v6054_v54  ;;  %v6055_v56 = vunpack.i.l.bf16 %v6054_v54 }
 0x3b9   :  { %v5862_v58 = vpack.c.bf16 %v6056_v55, %v6055_v56 }
 0x3bb   :  { %5864 = vmatpush3.bf16.xpose.msk.msra.mxu1 %vm6884_vm8, %v5862_v58 }
 0x3bc   :  { %5865 = vmatprep.subr.bf16.mxu1 %v6465_v62 }
 0x3be   :  { %v6059_v59 = vpop.permute.xlu1 %6058 }
 0x3bf   :  { %v6061_v60 = vunpack.i.h.bf16 %v6059_v59  ;;  %v6060_v61 = vunpack.i.l.bf16 %v6059_v59 }
 0x3c1   :  { %v5866_v0 = vpack.c.bf16 %v6061_v60, %v6060_v61 }
 0x3c2   :  { %v759_v1 = vpop.permute.xlu1 %758 }
 0x3c3   :  { %5868 = vmatpush3.bf16.xpose.msk.msra.mxu1 %vm6884_vm8, %v5866_v0 }
 0x3c4   :  { %5265 = vmatprep.subr.mxu1 %v6467_v63 }
 0x3cb   :  { %5266 = vmatpush3.xpose.msk.msra.mxu1 %vm760_vm7, %v759_v1 }
 0x3cc   :  { %5869 = vmatprep.subr.bf16.mxu1 %v6465_v62 }
 0x3ce   :  { %5268 = vmatmul.mubr.msk.f32.vlgmr.msra.gmra.mrb[10].mxu1 %vm760_vm7, %v6858_v42 }
 0x3cf   :  { %5270 = vmatprep.mubr.msk.f32.mxu1 %vm6466_vm6, %v6467_v63 }
 0x3d2   :  { %5271 = vmatmul.mubr.msk.f32.gmra.mrb[12].mxu1 %vm760_vm7, %v6860_v44 }
 0x3d3   :  { %5273 = vmatprep.mubr.msk.f32.mxu1 %vm6466_vm6, %v6467_v63 }
 0x3d6   :  { %5274 = vmatmul.mubr.msk.f32.gmra.mrb[14].mxu1 %vm760_vm7, %v6868_v47 }
 0x3d7   :  { %5276 = vmatprep.mubr.msk.f32.mxu1 %vm6466_vm6, %v6467_v63 }
 0x3da   :  { %5277 = vmatmul.mubr.msk.f32.gmra.mrb[16].mxu1 %vm760_vm7, %v6870_v49 }
 0x3db   :  { %5279 = vmatprep.mubr.msk.f32.mxu1 %vm6466_vm6, %v6467_v63 }
 0x3de   :  { %5280 = vmatmul.mubr.msk.f32.gmra.mrb[18].mxu1 %vm760_vm7, %v6878_v52 }
 0x3df   :  { %5292 = vmatprep.mubr.msk.f32.mxu1 %vm6466_vm6, %v6467_v63 }
 0x4a1   :  { %v847_v3 = vpop.f32.mrb[10].mxu1 }
 0x4a2   :  { %v848_v4 = vadd.f32 %v847_v3, %v6919_v2  ;;  %v5269_v5 = vpop.f32.mrb[11].mxu1 }
 0x4a4   :  { %v872_v7 = vsel %vm871_vm9, %v848_v4, -inf }
 0x4a5   :  { %873 = vmax.xlane.f32.xlu1 %v872_v7  ;;  %v852_v8 = vpop.f32.mrb[12].mxu1 }
 0x4a6   :  { %v853_v9 = vadd.f32 %v852_v8, %v6925_v6  ;;  %v5272_v10 = vpop.f32.mrb[13].mxu1 }
 0x4a8   :  { %v875_v13 = vsel %vm871_vm9, %v853_v9, -inf }
 0x4a9   :  { %876 = vmax.xlane.f32.xlu0 %v875_v13  ;;  %v857_v14 = vpop.f32.mrb[14].mxu1 }
 0x4aa   :  { %v858_v12 = vadd.f32 %v857_v14, %v6932_v11  ;;  %v5275_v15 = vpop.f32.mrb[15].mxu1 }
 0x4ac   :  { %v878_v17 = vsel %vm871_vm9, %v858_v12, -inf }
 0x4ad   :  { %879 = vmax.xlane.f32.xlu0 %v878_v17  ;;  %v862_v19 = vpop.f32.mrb[16].mxu1 }
 0x4ae   :  { %v863_v20 = vadd.f32 %v862_v19, %v6939_v16  ;;  %v5278_v22 = vpop.f32.mrb[17].mxu1 }
 0x4b0   :  { %v881_v24 = vsel %vm871_vm9, %v863_v20, -inf }
 0x4b1   :  { %882 = vmax.xlane.f32.xlu0 %v881_v24  ;;  %v867_v26 = vpop.f32.mrb[18].mxu1 }
 0x4b2   :  { %v868_v28 = vadd.f32 %v867_v26, %v6946_v23  ;;  %v5281_v29 = vpop.f32.mrb[19].mxu1 }
 0x4b4   :  { %v885_v30 = vsel %vm884_vm10, %v868_v28, -inf }
 0x4b5   :  { %886 = vmax.xlane.f32.xlu1 %v885_v30 }
 0x532   :  { %v874_v31 = vpop.xlane.xlu1 %873 }
 0x533   :  { %v888_v32 = vsub.f32 %v848_v4, %v874_v31 }
 0x535   :  { %v893_v33 = vmul.f32 1.442695, %v888_v32 }
 0x536   :  { %v877_v34 = vpop.xlane.xlu0 %876 }
 0x537   :  { %6222 = vpow2.f32 %v893_v33  ;;  %v889_v35 = vsub.f32 %v853_v9, %v877_v34 }
 0x539   :  { %v895_v36 = vmul.f32 1.442695, %v889_v35 }
 0x53a   :  { %v880_v48 = vpop.xlane.xlu0 %879 }
 0x53b   :  { %6224 = vpow2.f32 %v895_v36  ;;  %v890_v50 = vsub.f32 %v858_v12, %v880_v48 }
 0x53d   :  { %v897_v55 = vmul.f32 1.442695, %v890_v50 }
 0x53e   :  { %v883_v53 = vpop.xlane.xlu0 %882 }
 0x53f   :  { %v891_v56 = vsub.f32 %v863_v20, %v883_v53 }
 0x541   :  { %v6951_v37 = vpop.eup %6222  ;;  %v899_v59 = vmul.f32 1.442695, %v891_v56 }
 0x542   :  { %v903_v38 = vsel %vm871_vm9, %v6951_v37, 0.0  ;;  %v887_v41 = vpop.xlane.xlu1 %886 }
 0x543   :  { %904 = vadd.xlane.f32.xlu0 %v903_v38  ;;  %v892_v43 = vsub.f32 %v868_v28, %v887_v41 }
 0x545   :  { %v6955_v39 = vpop.eup %6224  ;;  %v901_v45 = vmul.f32 1.442695, %v892_v43 }
 0x546   :  { %v906_v40 = vsel %vm871_vm9, %v6955_v39, 0.0 }
 0x547   :  { %907 = vadd.xlane.f32.xlu1 %v906_v40  ;;  %6226 = vpow2.f32 %v901_v45 }
 0x548   :  { %6228 = vpow2.f32 %v897_v55 }
 0x549   :  { %6230 = vpow2.f32 %v899_v59 }
 0x551   :  { %v6973_v54 = vpop.eup %6226 }
 0x552   :  { %v915_v58 = vsel %vm884_vm10, %v6973_v54, 0.0  ;;  %v6977_v60 = vpop.eup %6228 }
 0x553   :  { %v909_v61 = vsel %vm871_vm9, %v6977_v60, 0.0  ;;  %v6981_v0 = vpop.eup %6230 }
 0x554   :  { %v912_v1 = vsel %vm871_vm9, %v6981_v0, 0.0 }
 0x558   :  { %6063 = vrot.lane.b32.xlu1 %v6864_v46, %s8433_s21 }
 0x559   :  { %6068 = vrot.lane.b32.xlu0 %v6874_v51, %s8433_s21 }
 0x55d   :  { %936 = vrot.lane.b32.xlu0 %v6878_v52, %s8433_s21  ;;  %s8441_s21 = smov 24  }
 0x561   :  { %6073 = vrot.lane.b32.xlu0 %v6864_v46, %s6470_s1 }
 0x565   :  { %6078 = vrot.lane.b32.xlu0 %v6874_v51, %s6470_s1 }
 0x569   :  { %1068 = vrot.lane.b32.xlu0 %v6878_v52, %s6470_s1 }
 0x56d   :  { %6083 = vrot.lane.b32.xlu0 %v6864_v46, %s6471_s2 }
 0x57c   :  { %916 = vadd.xlane.f32.xlu1 %v915_v58 }
 0x58c   :  { %910 = vadd.xlane.f32.xlu0 %v909_v61 }
 0x58d   :  { %1052 = vrot.lane.b32.xlu1 %v6860_v44, %s6472_s23 }
 0x590   :  { %913 = vadd.xlane.f32.xlu0 %v912_v1 }
 0x591   :  { %6093 = vrot.lane.b32.xlu1 %v6864_v46, %s8437_s25 }
 0x595   :  { %1358 = vrot.lane.b32.xlu1 %v6860_v44, %s8439_s3 }
 0x599   :  { %1360 = vrot.lane.b32.xlu1 %v6868_v47, %s8439_s3 }
 0x59d   :  { %1364 = vrot.lane.b32.xlu1 %v6878_v52, %s8439_s3 }
 0x5a1   :  { %1662 = vrot.lane.b32.xlu1 %v6858_v42, %s8435_s26 }
 0x5a5   :  { %1666 = vrot.lane.b32.xlu1 %v6868_v47, %s8435_s26 }
 0x5a6   :  { %1050 = vrot.lane.b32.xlu0 %v6858_v42, %s6472_s23 }
 0x5a9   :  { %1670 = vrot.lane.b32.xlu1 %v6878_v52, %s8435_s26 }
 0x5aa   :  { %6088 = vrot.lane.b32.xlu0 %v6874_v51, %s6471_s2 }
 0x5ad   :  { %6103 = vrot.lane.b32.xlu1 %v6864_v46, %s8431_s27 }
 0x5ae   :  { %1054 = vrot.lane.b32.xlu0 %v6868_v47, %s6472_s23 }
 0x5b1   :  { %1243 = vrot.lane.b32.xlu1 %v6878_v52, %s8431_s27 }
 0x5b2   :  { %1056 = vrot.lane.b32.xlu0 %v6870_v49, %s6472_s23 }
 0x5b6   :  { %1058 = vrot.lane.b32.xlu0 %v6878_v52, %s6472_s23 }
 0x5ba   :  { %1374 = vrot.lane.b32.xlu0 %v6878_v52, %s6471_s2 }
 0x5be   :  { %1356 = vrot.lane.b32.xlu0 %v6858_v42, %s8439_s3 }
 0x5c2   :  { %6098 = vrot.lane.b32.xlu0 %v6874_v51, %s8437_s25 }
 0x5c6   :  { %1362 = vrot.lane.b32.xlu0 %v6870_v49, %s8439_s3  ;;  %s6482_s3 = smov [#allocation2]  }
 0x5ca   :  { %1680 = vrot.lane.b32.xlu0 %v6878_v52, %s8437_s25 }
 0x5ce   :  { %1664 = vrot.lane.b32.xlu0 %v6860_v44, %s8435_s26 }
 0x5d0   :  { %v905_v47 = vpop.xlane.xlu0 %904 }
 0x5d1   :  { %6232 = vrcp.f32 %v905_v47 }
 0x5d2   :  { %1668 = vrot.lane.b32.xlu0 %v6870_v49, %s8435_s26 }
 0x5d4   :  { %v908_v3 = vpop.xlane.xlu1 %907  ;;  %v6069_v42 = vpop.permute.xlu0 %6068 }
 0x5d5   :  { %v6071_v8 = vunpack.i.h.bf16 %v6069_v42  ;;  %v6070_v9 = vunpack.i.l.bf16 %v6069_v42  ;;  %6234 = vrcp.f32 %v908_v3 }
 0x5d6   :  { %6108 = vrot.lane.b32.xlu0 %v6874_v51, %s8431_s27 }
 0x5d7   :  { %v5873_v44 = vpack.c.bf16 %v6071_v8, %v6070_v9 }
 0x5d8   :  { %v6064_v4 = vpop.permute.xlu1 %6063  ;;  %v937_v13 = vpop.permute.xlu0 %936 }
 0x5d9   :  { %v6066_v5 = vunpack.i.h.bf16 %v6064_v4  ;;  %v6065_v7 = vunpack.i.l.bf16 %v6064_v4 }
 0x5db   :  { %v5870_v10 = vpack.c.bf16 %v6066_v5, %v6065_v7  ;;  %v6233_v14 = vpop.eup %6232 }
 0x5dc   :  { %v6074_v49 = vpop.permute.xlu0 %6073  ;;  %v919_v12 = vmul.f32 %v6233_v14, %v6951_v37 }
 0x5dd   :  { %5871 = vmatpush3.bf16.msra.mxu1 %v5870_v10  ;;  %v6076_v17 = vunpack.i.h.bf16 %v6074_v49  ;;  %v6075_v19 = vunpack.i.l.bf16 %v6074_v49 }
 0x5de   :  { %5872 = vmatprep.subr.bf16.mxu1 %v6465_v62 }
 0x5df   :  { %v6235_v15 = vpop.eup %6234  ;;  %v5876_v22 = vpack.c.bf16 %v6076_v17, %v6075_v19 }
 0x5e0   :  { %v921_v20 = vmul.f32 %v6235_v15, %v6955_v39  ;;  %v6079_v24 = vpop.permute.xlu0 %6078 }
 0x5e1   :  { %5874 = vmatpush3.bf16.msra.mxu1 %v5873_v44  ;;  %v6081_v26 = vunpack.i.h.bf16 %v6079_v24  ;;  %v6080_v28 = vunpack.i.l.bf16 %v6079_v24 }
 0x5e2   :  { %5290 = vmatprep.subr.mxu1 %v6467_v63 }
 0x5e3   :  { %v5880_v29 = vpack.c.bf16 %v6081_v26, %v6080_v28 }
 0x5e4   :  { %v1069_v30 = vpop.permute.xlu0 %1068 }
 0x5e5   :  { %5291 = vmatpush3.msk.msra.mxu1 %vm957_vm11, %v937_v13 }
 0x5e6   :  { %5293 = vmatmul.mubr.msk.f32.vlgmr.msra.gmra.mrb[20].mxu1 %vm871_vm9, %v919_v12  ;;  %5875 = vmatprep.subr.bf16.mxu1 %v6465_v62 }
 0x5e7   :  { %5295 = vmatprep.mubr.msk.f32.mxu1 %vm6466_vm6, %v6467_v63 }
 0x5e8   :  { %v6084_v34 = vpop.permute.xlu0 %6083 }
 0x5e9   :  { %v6086_v47 = vunpack.i.h.bf16 %v6084_v34  ;;  %v6085_v3 = vunpack.i.l.bf16 %v6084_v34 }
 0x5ea   :  { %5296 = vmatmul.mubr.msk.f32.gmra.mrb[22].mxu1 %vm871_vm9, %v921_v20 }
 0x5eb   :  { %5298 = vmatprep.mubr.msk.f32.mxu1 %vm6466_vm6, %v6467_v63  ;;  %v5890_v7 = vpack.c.bf16 %v6086_v47, %v6085_v3 }
 0x5ec   :  { %5878 = vmatpush3.bf16.xpose.msk.msra.mxu1 %vm6884_vm8, %v5876_v22 }
 0x5ed   :  { %5879 = vmatprep.subr.bf16.mxu1 %v6465_v62 }
 0x5f4   :  { %5882 = vmatpush3.bf16.xpose.msk.msra.mxu1 %vm6884_vm8, %v5880_v29 }
 0x5f5   :  { %5315 = vmatprep.subr.mxu1 %v6467_v63 }
 0x5fc   :  { %5316 = vmatpush3.xpose.msk.msra.mxu1 %vm760_vm7, %v1069_v30 }
 0x5fd   :  { %5889 = vmatprep.subr.bf16.mxu1 %v6465_v62 }
 0x609   :  { %v917_v31 = vpop.xlane.xlu1 %916 }
 0x60d   :  { %v1053_v32 = vpop.permute.xlu1 %1052 }
 0x611   :  { %v7051_v33 = vpop.permute.xlu1 %6093 }
 0x612   :  { %v6096_v49 = vunpack.i.h.bf16 %v7051_v33  ;;  %v6095_v12 = vunpack.i.l.bf16 %v7051_v33 }
 0x614   :  { %v5904_v17 = vpack.c.bf16 %v6096_v49, %v6095_v12 }
 0x615   :  { %v7053_v35 = vpop.permute.xlu1 %1358 }
 0x619   :  { %v911_v36 = vpop.xlane.xlu0 %910  ;;  %v7055_v37 = vpop.permute.xlu1 %1360 }
 0x61a   :  { %6236 = vrcp.f32 %v911_v36 }
 0x61d   :  { %v914_v38 = vpop.xlane.xlu0 %913  ;;  %v7057_v39 = vpop.permute.xlu1 %1364 }
 0x61e   :  { %6238 = vrcp.f32 %v914_v38 }
 0x61f   :  { %6240 = vrcp.f32 %v917_v31 }
 0x621   :  { %v1051_v40 = vpop.permute.xlu0 %1050  ;;  %v7059_v41 = vpop.permute.xlu1 %1662 }
 0x624   :  { %v6237_v43 = vpop.eup %6236 }
 0x625   :  { %v6089_v45 = vpop.permute.xlu0 %6088  ;;  %v7061_v48 = vpop.permute.xlu1 %1666  ;;  %v923_v50 = vmul.f32 %v6237_v43, %v6977_v60 }
 0x626   :  { %v6091_v8 = vunpack.i.h.bf16 %v6089_v45  ;;  %v6090_v9 = vunpack.i.l.bf16 %v6089_v45 }
 0x627   :  { %5299 = vmatmul.mubr.msk.f32.gmra.mrb[24].mxu1 %vm871_vm9, %v923_v50 }
 0x628   :  { %v6239_v53 = vpop.eup %6238  ;;  %5301 = vmatprep.mubr.msk.f32.mxu1 %vm6466_vm6, %v6467_v63  ;;  %v5894_v13 = vpack.c.bf16 %v6091_v8, %v6090_v9 }
 0x629   :  { %v1055_v55 = vpop.permute.xlu0 %1054  ;;  %v7067_v56 = vpop.permute.xlu1 %1670  ;;  %v925_v58 = vmul.f32 %v6239_v53, %v6981_v0 }
 0x62a   :  { %v6241_v59 = vpop.eup %6240 }
 0x62b   :  { %5302 = vmatmul.mubr.msk.f32.gmra.mrb[26].mxu1 %vm871_vm9, %v925_v58  ;;  %v927_v60 = vmul.f32 %v6241_v59, %v6973_v54 }
 0x62c   :  { %5304 = vmatprep.mubr.msk.f32.mxu1 %vm6466_vm6, %v6467_v63 }
 0x62d   :  { %v1057_v61 = vpop.permute.xlu0 %1056  ;;  %v6104_v1 = vpop.permute.xlu1 %6103 }
 0x62e   :  { %v6106_v42 = vunpack.i.h.bf16 %v6104_v1  ;;  %v6105_v4 = vunpack.i.l.bf16 %v6104_v1 }
 0x62f   :  { %5305 = vmatmul.mubr.msk.f32.gmra.mrb[28].mxu1 %vm871_vm9, %v927_v60 }
 0x630   :  { %v5884_v5 = vpack.c.bf16 %v6106_v42, %v6105_v4  ;;  %5317 = vmatprep.mubr.msk.f32.mxu1 %vm6466_vm6, %v6467_v63 }
 0x631   :  { %v1059_v0 = vpop.permute.xlu0 %1058 }
 0x632   :  { %5885 = vmatpush3.bf16.msra.mxu0 %v5884_v5 }
 0x633   :  { %5318 = vmatmul.mubr.msk.f32.vlgmr.msra.gmra.mrb[30].mxu1 %vm760_vm7, %v1051_v40  ;;  %5886 = vmatprep.subr.bf16.mxu0 %v6465_v62 }
 0x634   :  { %5892 = vmatpush3.bf16.xpose.msk.msra.mxu1 %vm6884_vm8, %v5890_v7  ;;  %5320 = vmatprep.mubr.msk.f32.mxu1 %vm6466_vm6, %v6467_v63 }
 0x635   :  { %v1375_v54 = vpop.permute.xlu0 %1374  ;;  %5893 = vmatprep.subr.bf16.mxu1 %v6465_v62 }
 0x637   :  { %5321 = vmatmul.mubr.msk.f32.gmra.mrb[32].mxu1 %vm760_vm7, %v1053_v32  ;;  %v1244_v32 = vpop.permute.xlu1 %1243 }
 0x638   :  { %5323 = vmatprep.mubr.msk.f32.mxu1 %vm6466_vm6, %v6467_v63 }
 0x639   :  { %v1357_v10 = vpop.permute.xlu0 %1356 }
 0x63b   :  { %5324 = vmatmul.mubr.msk.f32.gmra.mrb[34].mxu1 %vm760_vm7, %v1055_v55 }
 0x63c   :  { %5896 = vmatpush3.bf16.xpose.msk.msra.mxu1 %vm6884_vm8, %v5894_v13  ;;  %5326 = vmatprep.mubr.msk.f32.mxu1 %vm6466_vm6, %v6467_v63 }
 0x63d   :  { %v6099_v44 = vpop.permute.xlu0 %6098  ;;  %5365 = vmatprep.subr.mxu1 %v6467_v63 }
 0x63e   :  { %v6101_v20 = vunpack.i.h.bf16 %v6099_v44  ;;  %v6100_v22 = vunpack.i.l.bf16 %v6099_v44 }
 0x63f   :  { %5327 = vmatmul.mubr.msk.f32.gmra.mrb[36].mxu1 %vm760_vm7, %v1057_v61 }
 0x640   :  { %5329 = vmatprep.mubr.msk.f32.mxu1 %vm6466_vm6, %v6467_v63  ;;  %v5908_v26 = vpack.c.bf16 %v6101_v20, %v6100_v22 }
 0x641   :  { %v1363_v14 = vpop.permute.xlu0 %1362 }
 0x643   :  { %5330 = vmatmul.mubr.msk.f32.gmra.mrb[38].mxu1 %vm760_vm7, %v1059_v0 }
 0x644   :  { %5366 = vmatpush3.xpose.msk.msra.mxu1 %vm760_vm7, %v1375_v54  ;;  %5367 = vmatprep.mubr.msk.f32.mxu1 %vm6466_vm6, %v6467_v63 }
 0x645   :  { %v1681_v15 = vpop.permute.xlu0 %1680  ;;  %5903 = vmatprep.subr.bf16.mxu1 %v6465_v62 }
 0x647   :  { %5368 = vmatmul.mubr.msk.f32.vlgmr.msra.gmra.mrb[40].mxu1 %vm760_vm7, %v1357_v10 }
 0x648   :  { %5906 = vmatpush3.bf16.xpose.msk.msra.mxu1 %vm6884_vm8, %v5904_v17  ;;  %5370 = vmatprep.mubr.msk.f32.mxu1 %vm6466_vm6, %v6467_v63 }
 0x649   :  { %v1665_v19 = vpop.permute.xlu0 %1664  ;;  %5907 = vmatprep.subr.bf16.mxu1 %v6465_v62 }
 0x64b   :  { %5371 = vmatmul.mubr.msk.f32.gmra.mrb[42].mxu1 %vm760_vm7, %v7053_v35 }
 0x64c   :  { %5373 = vmatprep.mubr.msk.f32.mxu1 %vm6466_vm6, %v6467_v63 }
 0x64d   :  { %v1669_v24 = vpop.permute.xlu0 %1668 }
 0x64f   :  { %5374 = vmatmul.mubr.msk.f32.gmra.mrb[44].mxu1 %vm760_vm7, %v7055_v37 }
 0x650   :  { %5910 = vmatpush3.bf16.xpose.msk.msra.mxu1 %vm6884_vm8, %v5908_v26  ;;  %5376 = vmatprep.mubr.msk.f32.mxu1 %vm6466_vm6, %v6467_v63 }
 0x651   :  { %v6109_v28 = vpop.permute.xlu0 %6108  ;;  %5415 = vmatprep.subr.mxu1 %v6467_v63 }
 0x652   :  { %v6111_v29 = vunpack.i.h.bf16 %v6109_v28  ;;  %v6110_v30 = vunpack.i.l.bf16 %v6109_v28 }
 0x653   :  { %5377 = vmatmul.mubr.msk.f32.gmra.mrb[46].mxu1 %vm760_vm7, %v1363_v14 }
 0x654   :  { %v5887_v31 = vpack.c.bf16 %v6111_v29, %v6110_v30  ;;  %5379 = vmatprep.mubr.msk.f32.mxu1 %vm6466_vm6, %v6467_v63 }
 0x656   :  { %5888 = vmatpush3.bf16.msra.mxu0 %v5887_v31 }
 0x657   :  { %5380 = vmatmul.mubr.msk.f32.gmra.mrb[48].mxu1 %vm760_vm7, %v7057_v39  ;;  %5340 = vmatprep.subr.mxu0 %v6467_v63 }
 0x658   :  { %5416 = vmatpush3.xpose.msk.msra.mxu1 %vm760_vm7, %v1681_v15  ;;  %5417 = vmatprep.mubr.msk.f32.mxu1 %vm6466_vm6, %v6467_v63 }
 0x659   :  { %5917 = vmatprep.subr.bf16.mxu1 %v6465_v62 }
 0x65a   :  { %5341 = vmatpush3.msk.msra.mxu0 %vm957_vm11, %v1244_v32 }
 0x65b   :  { %5418 = vmatmul.mubr.msk.f32.vlgmr.msra.gmra.mrb[50].mxu1 %vm760_vm7, %v7059_v41  ;;  %5897 = vmatprep.subr.bf16.mxu0 %v6465_v62 }
 0x65c   :  { %5420 = vmatprep.mubr.msk.f32.mxu1 %vm6466_vm6, %v6467_v63 }
 0x65f   :  { %5421 = vmatmul.mubr.msk.f32.gmra.mrb[52].mxu1 %vm760_vm7, %v1665_v19 }
 0x660   :  { %5423 = vmatprep.mubr.msk.f32.mxu1 %vm6466_vm6, %v6467_v63 }
 0x663   :  { %5424 = vmatmul.mubr.msk.f32.gmra.mrb[54].mxu1 %vm760_vm7, %v7061_v48 }
 0x664   :  { %5426 = vmatprep.mubr.msk.f32.mxu1 %vm6466_vm6, %v6467_v63 }
 0x667   :  { %5427 = vmatmul.mubr.msk.f32.gmra.mrb[56].mxu1 %vm760_vm7, %v1669_v24 }
 0x668   :  { %5429 = vmatprep.mubr.msk.f32.mxu1 %vm6466_vm6, %v6467_v63 }
 0x66b   :  { %5430 = vmatmul.mubr.msk.f32.gmra.mrb[58].mxu1 %vm760_vm7, %v7067_v56 }
 0x66c   :  { %5465 = vmatprep.mubr.msk.f32.mxu1 %vm6466_vm6, %v6467_v63 }
 0x6b9   :  { %v7150_v33 = vpop.f32.mrb[20].mxu1 }
 0x6ba   :  { %v5294_v34 = vpop.f32.mrb[21].mxu1 }
 0x6bd   :  { %v7152_v35 = vpop.f32.mrb[22].mxu1 }
 0x6be   :  { %v5297_v36 = vpop.f32.mrb[23].mxu1 }
 0x6fa   :  { %v7154_v37 = vpop.f32.mrb[24].mxu1 }
 0x6fb   :  { %v5300_v38 = vpop.f32.mrb[25].mxu1 }
 0x6fe   :  { %v7156_v39 = vpop.f32.mrb[26].mxu1 }
 0x6ff   :  { %v5303_v40 = vpop.f32.mrb[27].mxu1 }
 0x702   :  { %v7158_v41 = vpop.f32.mrb[28].mxu1 }
 0x703   :  { %v5306_v43 = vpop.f32.mrb[29].mxu1 }
 0x706   :  { %v1156_v45 = vpop.f32.mrb[30].mxu1 }
 0x707   :  { %v7161_v48 = vadd.f32 %v1156_v45, %v6919_v2  ;;  %v5319_v50 = vpop.f32.mrb[31].mxu1 }
 0x709   :  { %v1180_v53 = vsel %vm871_vm9, %v7161_v48, -inf }
 0x70a   :  { %1181 = vmax.xlane.f32.xlu0 %v1180_v53  ;;  %v1161_v55 = vpop.f32.mrb[32].mxu1 }
 0x70b   :  { %v7166_v56 = vadd.f32 %v1161_v55, %v6925_v6  ;;  %v5322_v58 = vpop.f32.mrb[33].mxu1 }
 0x70d   :  { %v1183_v59 = vsel %vm871_vm9, %v7166_v56, -inf }
 0x70e   :  { %1184 = vmax.xlane.f32.xlu1 %v1183_v59  ;;  %v1166_v61 = vpop.f32.mrb[34].mxu1 }
 0x70f   :  { %v7171_v1 = vadd.f32 %v1166_v61, %v6932_v11  ;;  %v5325_v60 = vpop.f32.mrb[35].mxu1 }
 0x711   :  { %v1186_v47 = vsel %vm871_vm9, %v7171_v1, -inf }
 0x712   :  { %1187 = vmax.xlane.f32.xlu0 %v1186_v47  ;;  %v1171_v3 = vpop.f32.mrb[36].mxu1 }
 0x713   :  { %v7176_v42 = vadd.f32 %v1171_v3, %v6939_v16  ;;  %v5328_v4 = vpop.f32.mrb[37].mxu1 }
 0x715   :  { %v1189_v5 = vsel %vm871_vm9, %v7176_v42, -inf }
 0x716   :  { %1190 = vmax.xlane.f32.xlu0 %v1189_v5  ;;  %v1176_v0 = vpop.f32.mrb[38].mxu1 }
 0x717   :  { %v5331_v7 = vpop.f32.mrb[39].mxu1  ;;  %v7185_v30 = vadd.f32 %v1176_v0, %v6946_v23 }
 0x719   :  { %v1192_v36 = vsel %vm884_vm10, %v7185_v30, -inf }
 0x71a   :  { %v1462_v54 = vpop.f32.mrb[40].mxu1 }
 0x71b   :  { %v5369_v8 = vpop.f32.mrb[41].mxu1  ;;  %v7193_v38 = vadd.f32 %v1462_v54, %v6919_v2 }
 0x71d   :  { %v1486_v53 = vsel %vm871_vm9, %v7193_v38, -inf }
 0x71e   :  { %v1467_v9 = vpop.f32.mrb[42].mxu1 }
 0x71f   :  { %6118 = vrot.lane.b32.xlu1 %v6874_v51, %s8429_s29  ;;  %v5372_v10 = vpop.f32.mrb[43].mxu1  ;;  %v7188_v34 = vadd.f32 %v1467_v9, %v6925_v6 }
 0x721   :  { %v1489_v43 = vsel %vm871_vm9, %v7188_v34, -inf }
 0x722   :  { %v1472_v13 = vpop.f32.mrb[44].mxu1 }
 0x723   :  { %v5375_v44 = vpop.f32.mrb[45].mxu1  ;;  %v7201_v45 = vadd.f32 %v1472_v13, %v6932_v11 }
 0x725   :  { %v1492_v61 = vsel %vm871_vm9, %v7201_v45, -inf }
 0x726   :  { %v1477_v14 = vpop.f32.mrb[46].mxu1 }
 0x727   :  { %v5378_v49 = vpop.f32.mrb[47].mxu1  ;;  %v7196_v40 = vadd.f32 %v1477_v14, %v6939_v16 }
 0x729   :  { %v1495_v55 = vsel %vm871_vm9, %v7196_v40, -inf }
 0x72a   :  { %v1482_v12 = vpop.f32.mrb[48].mxu1 }
 0x72b   :  { %v5381_v15 = vpop.f32.mrb[49].mxu1  ;;  %v7211_v58 = vadd.f32 %v1482_v12, %v6946_v23 }
 0x72c   :  { %6113 = vrot.lane.b32.xlu0 %v6864_v46, %s8429_s29 }
 0x72d   :  { %v1498_v3 = vsel %vm884_vm10, %v7211_v58, -inf }
 0x72e   :  { %v1768_v17 = vpop.f32.mrb[50].mxu1 }
 0x72f   :  { %v5419_v19 = vpop.f32.mrb[51].mxu1  ;;  %v7204_v50 = vadd.f32 %v1768_v17, %v6919_v2 }
 0x731   :  { %v1792_v2 = vsel %vm871_vm9, %v7204_v50, -inf }
 0x732   :  { %v1773_v20 = vpop.f32.mrb[52].mxu1 }
 0x733   :  { %v5422_v22 = vpop.f32.mrb[53].mxu1  ;;  %v7221_v60 = vadd.f32 %v1773_v20, %v6925_v6 }
 0x735   :  { %v1795_v5 = vsel %vm871_vm9, %v7221_v60, -inf }
 0x736   :  { %v1778_v24 = vpop.f32.mrb[54].mxu1 }
 0x737   :  { %v5425_v26 = vpop.f32.mrb[55].mxu1  ;;  %v7214_v59 = vadd.f32 %v1778_v24, %v6932_v11 }
 0x739   :  { %v1798_v11 = vsel %vm871_vm9, %v7214_v59, -inf }
 0x73a   :  { %v1783_v28 = vpop.f32.mrb[56].mxu1 }
 0x73b   :  { %v5428_v29 = vpop.f32.mrb[57].mxu1  ;;  %v7231_v4 = vadd.f32 %v1783_v28, %v6939_v16 }
 0x73e   :  { %v1788_v31 = vpop.f32.mrb[58].mxu1 }
 0x73f   :  { %v5431_v32 = vpop.f32.mrb[59].mxu1  ;;  %v7224_v47 = vadd.f32 %v1788_v31, %v6946_v23  ;;  %v1801_v23 = vsel %vm871_vm9, %v7231_v4, -inf }
 0x741   :  { %v1804_v6 = vsel %vm884_vm10, %v7224_v47, -inf }
 0x743   :  { %1193 = vmax.xlane.f32.xlu1 %v1192_v36 }
 0x747   :  { %1490 = vmax.xlane.f32.xlu1 %v1489_v43 }
 0x74b   :  { %1487 = vmax.xlane.f32.xlu0 %v1486_v53  ;;  %1496 = vmax.xlane.f32.xlu1 %v1495_v55 }
 0x74f   :  { %1493 = vmax.xlane.f32.xlu0 %v1492_v61  ;;  %1793 = vmax.xlane.f32.xlu1 %v1792_v2 }
 0x753   :  { %1499 = vmax.xlane.f32.xlu0 %v1498_v3  ;;  %1799 = vmax.xlane.f32.xlu1 %v1798_v11 }
 0x757   :  { %1796 = vmax.xlane.f32.xlu0 %v1795_v5  ;;  %1805 = vmax.xlane.f32.xlu1 %v1804_v6 }
 0x75b   :  { %1802 = vmax.xlane.f32.xlu0 %v1801_v23 }
 0x768   :  { %1549 = vrot.lane.b32.xlu1 %v6878_v52, %s8429_s29 }
 0x797   :  { %v1182_v0 = vpop.xlane.xlu0 %1181 }
 0x798   :  { %v1195_v7 = vsub.f32 %v7161_v48, %v1182_v0 }
 0x79a   :  { %v1200_v16 = vmul.f32 1.442695, %v1195_v7 }
 0x79b   :  { %v1185_v54 = vpop.xlane.xlu1 %1184 }
 0x79c   :  { %6242 = vpow2.f32 %v1200_v16  ;;  %v1196_v8 = vsub.f32 %v7166_v56, %v1185_v54 }
 0x79e   :  { %v1202_v9 = vmul.f32 1.442695, %v1196_v8 }
 0x79f   :  { %v1188_v10 = vpop.xlane.xlu0 %1187  ;;  %v7261_v22 = vpop.permute.xlu1 %6118 }
 0x7a0   :  { %6244 = vpow2.f32 %v1202_v9  ;;  %v1197_v13 = vsub.f32 %v7171_v1, %v1188_v10 }
 0x7a2   :  { %v1204_v44 = vmul.f32 1.442695, %v1197_v13 }
 0x7a3   :  { %v1191_v14 = vpop.xlane.xlu0 %1190 }
 0x7a4   :  { %6246 = vpow2.f32 %v1204_v44  ;;  %v1198_v49 = vsub.f32 %v7176_v42, %v1191_v14 }
 0x7a6   :  { %v7245_v12 = vpop.eup %6242  ;;  %v1206_v15 = vmul.f32 1.442695, %v1198_v49 }
 0x7a7   :  { %v1210_v48 = vsel %vm871_vm9, %v7245_v12, 0.0  ;;  %v7264_v29 = vpop.permute.xlu0 %6113 }
 0x7a8   :  { %6248 = vpow2.f32 %v1206_v15  ;;  %1211 = vadd.xlane.f32.xlu0 %v1210_v48 }
 0x7aa   :  { %v7249_v17 = vpop.eup %6244 }
 0x7ab   :  { %v1213_v56 = vsel %vm871_vm9, %v7249_v17, 0.0 }
 0x7ac   :  { %1214 = vadd.xlane.f32.xlu1 %v1213_v56 }
 0x7ae   :  { %v7253_v1 = vpop.eup %6246 }
 0x7af   :  { %v1216_v19 = vsel %vm871_vm9, %v7253_v1, 0.0 }
 0x7b0   :  { %1217 = vadd.xlane.f32.xlu0 %v1216_v19 }
 0x7b2   :  { %v7257_v42 = vpop.eup %6248 }
 0x7b3   :  { %v1219_v20 = vsel %vm871_vm9, %v7257_v42, 0.0 }
 0x7b4   :  { %1220 = vadd.xlane.f32.xlu1 %v1219_v20 }
 0x7d0   :  { %v1194_v24 = vpop.xlane.xlu1 %1193 }
 0x7d1   :  { %v1199_v26 = vsub.f32 %v7185_v30, %v1194_v24 }
 0x7d3   :  { %v1208_v28 = vmul.f32 1.442695, %v1199_v26 }
 0x7d4   :  { %v1491_v31 = vpop.xlane.xlu1 %1490 }
 0x7d5   :  { %6250 = vpow2.f32 %v1208_v28  ;;  %v1502_v32 = vsub.f32 %v7188_v34, %v1491_v31 }
 0x7d7   :  { %v1508_v36 = vmul.f32 1.442695, %v1502_v32 }
 0x7d8   :  { %v1488_v43 = vpop.xlane.xlu0 %1487  ;;  %v1497_v53 = vpop.xlane.xlu1 %1496 }
 0x7d9   :  { %6252 = vpow2.f32 %v1508_v36  ;;  %v1501_v55 = vsub.f32 %v7193_v38, %v1488_v43  ;;  %v1504_v2 = vsub.f32 %v7196_v40, %v1497_v53 }
 0x7db   :  { %v1506_v61 = vmul.f32 1.442695, %v1501_v55  ;;  %v1512_v23 = vmul.f32 1.442695, %v1504_v2 }
 0x7dc   :  { %v1494_v3 = vpop.xlane.xlu0 %1493  ;;  %v1794_v11 = vpop.xlane.xlu1 %1793 }
 0x7dd   :  { %6254 = vpow2.f32 %v1506_v61  ;;  %v1503_v30 = vsub.f32 %v7201_v45, %v1494_v3  ;;  %v1807_v5 = vsub.f32 %v7204_v50, %v1794_v11 }
 0x7df   :  { %v7271_v6 = vpop.eup %6250  ;;  %v1510_v34 = vmul.f32 1.442695, %v1503_v30  ;;  %v1812_v0 = vmul.f32 1.442695, %v1807_v5  ;;  %v6116_v5 = vunpack.i.h.bf16 %v7264_v29 }
 0x7e0   :  { %v1500_v7 = vpop.xlane.xlu0 %1499  ;;  %v1222_v16 = vsel %vm884_vm10, %v7271_v6, 0.0  ;;  %v1800_v48 = vpop.xlane.xlu1 %1799 }
 0x7e1   :  { %6256 = vpow2.f32 %v1510_v34  ;;  %v1505_v38 = vsub.f32 %v7211_v58, %v1500_v7  ;;  %1223 = vadd.xlane.f32.xlu0 %v1222_v16  ;;  %v1809_v28 = vsub.f32 %v7214_v59, %v1800_v48  ;;  %v6121_v16 = vunpack.i.h.bf16 %v7261_v22 }
 0x7e2   :  { %6258 = vpow2.f32 %v1812_v0 }
 0x7e3   :  { %v7276_v40 = vpop.eup %6252  ;;  %6260 = vpow2.f32 %v1512_v23  ;;  %v1514_v45 = vmul.f32 1.442695, %v1505_v38  ;;  %v1816_v36 = vmul.f32 1.442695, %v1809_v28  ;;  %v6115_v23 = vunpack.i.l.bf16 %v7264_v29 }
 0x7e4   :  { %v1519_v50 = vsel %vm871_vm9, %v7276_v40, 0.0  ;;  %v1806_v56 = vpop.xlane.xlu1 %1805  ;;  %v1797_v20 = vpop.xlane.xlu0 %1796  ;;  %v6120_v38 = vunpack.i.l.bf16 %v7261_v22 }
 0x7e5   :  { %1520 = vadd.xlane.f32.xlu0 %v1519_v50  ;;  %6262 = vpow2.f32 %v1514_v45  ;;  %v1811_v19 = vsub.f32 %v7224_v47, %v1806_v56  ;;  %v1808_v26 = vsub.f32 %v7221_v60, %v1797_v20  ;;  %v5898_v45 = vpack.c.bf16 %v6116_v5, %v6115_v23 }
 0x7e7   :  { %v7280_v54 = vpop.eup %6254  ;;  %v1820_v24 = vmul.f32 1.442695, %v1811_v19  ;;  %v1814_v31 = vmul.f32 1.442695, %v1808_v26 }
 0x7e8   :  { %v1516_v8 = vsel %vm871_vm9, %v7280_v54, 0.0  ;;  %v1803_v32 = vpop.xlane.xlu0 %1802  ;;  %v1550_v2 = vpop.permute.xlu1 %1549 }
 0x7e9   :  { %1517 = vadd.xlane.f32.xlu1 %v1516_v8  ;;  %6264 = vpow2.f32 %v1820_v24  ;;  %v5901_v8 = vpack.c.bf16 %v6121_v16, %v6120_v38 }
 0x7ea   :  { %6266 = vpow2.f32 %v1814_v31 }
 0x7eb   :  { %v7284_v9 = vpop.eup %6256  ;;  %6268 = vpow2.f32 %v1816_v36 }
 0x7ec   :  { %v7286_v58 = vpop.eup %6258  ;;  %v1522_v10 = vsel %vm871_vm9, %v7284_v9, 0.0 }
 0x7ed   :  { %v7290_v13 = vpop.eup %6260  ;;  %1523 = vadd.xlane.f32.xlu0 %v1522_v10  ;;  %v1822_v44 = vsel %vm871_vm9, %v7286_v58, 0.0 }
 0x7ee   :  { %1823 = vadd.xlane.f32.xlu1 %v1822_v44  ;;  %v1525_v14 = vsel %vm871_vm9, %v7290_v13, 0.0 }
 0x7ef   :  { %v7296_v49 = vpop.eup %6262 }
 0x7f0   :  { %v1528_v15 = vsel %vm884_vm10, %v7296_v49, 0.0 }
 0x7f1   :  { %1526 = vadd.xlane.f32.xlu0 %v1525_v14 }
 0x7f3   :  { %v7308_v43 = vpop.eup %6264 }
 0x7f4   :  { %v7312_v47 = vpop.eup %6266 }
 0x7f5   :  { %1529 = vadd.xlane.f32.xlu0 %v1528_v15  ;;  %v1825_v59 = vsel %vm871_vm9, %v7312_v47, 0.0  ;;  %v7316_v60 = vpop.eup %6268 }
 0x7ff   :  { %6123 = vrot.lane.b32.xlu1 %v6864_v46, %s8427_s0  ;;  %v1810_v46 = vsub.f32 %v7231_v4, %v1803_v32  ;;  %v1828_v4 = vsel %vm871_vm9, %v7316_v60, 0.0 }
 0x801   :  { %v1818_v53 = vmul.f32 1.442695, %v1810_v46 }
 0x803   :  { %6270 = vpow2.f32 %v1818_v53 }
 0x80b   :  { %6128 = vrot.lane.b32.xlu0 %v6874_v51, %s8427_s0  ;;  %v1834_v51 = vsel %vm884_vm10, %v7308_v43, 0.0 }
 0x80d   :  { %v7320_v55 = vpop.eup %6270 }
 0x80e   :  { %v1831_v61 = vsel %vm871_vm9, %v7320_v55, 0.0 }
 0x823   :  { %1835 = vadd.xlane.f32.xlu1 %v1834_v51 }
 0x82a   :  { %1826 = vadd.xlane.f32.xlu0 %v1825_v59 }
 0x82e   :  { %1829 = vadd.xlane.f32.xlu0 %v1828_v4 }
 0x832   :  { %1832 = vadd.xlane.f32.xlu0 %v1831_v61 }
 0x835   :  { %v1212_v3 = vpop.xlane.xlu0 %1211 }
 0x836   :  { %6272 = vrcp.f32 %v1212_v3 }
 0x839   :  { %v1215_v11 = vpop.xlane.xlu1 %1214 }
 0x83a   :  { %6274 = vrcp.f32 %v1215_v11 }
 0x83d   :  { %v1218_v30 = vpop.xlane.xlu0 %1217 }
 0x83e   :  { %6276 = vrcp.f32 %v1218_v30 }
 0x840   :  { %v6273_v34 = vpop.eup %6272 }
 0x841   :  { %v1226_v0 = vmul.f32 %v6273_v34, %v7245_v12  ;;  %v1221_v7 = vpop.xlane.xlu1 %1220 }
 0x842   :  { %6278 = vrcp.f32 %v1221_v7 }
 0x843   :  { %5343 = vmatmul.mubr.msk.f32.vlgmr.msra.gmra.mrb[36].mxu0 %vm871_vm9, %v1226_v0 }
 0x844   :  { %v6275_v50 = vpop.eup %6274  ;;  %5899 = vmatpush3.bf16.msra.mxu0 %v5898_v45  ;;  %5345 = vmatprep.mubr.msk.f32.mxu0 %vm6466_vm6, %v6467_v63 }
 0x845   :  { %5900 = vmatprep.subr.bf16.mxu0 %v6465_v62  ;;  %v1228_v29 = vmul.f32 %v6275_v50, %v7249_v17 }
 0x847   :  { %5346 = vmatmul.mubr.msk.f32.gmra.mrb[38].mxu0 %vm871_vm9, %v1228_v29 }
 0x848   :  { %v6277_v12 = vpop.eup %6276  ;;  %5902 = vmatpush3.bf16.msra.mxu0 %v5901_v8  ;;  %1855 = vrot.lane.b32.xlu0 %v6878_v52, %s8427_s0  ;;  %s6480_s0 = smov 16  }
 0x849   :  { %5348 = vmatprep.mubr.msk.f32.mxu0 %vm6466_vm6, %v6467_v63  ;;  %5390 = vmatprep.subr.mxu0 %v6467_v63  ;;  %v1230_v22 = vmul.f32 %v6277_v12, %v7253_v1 }
 0x84b   :  { %5349 = vmatmul.mubr.msk.f32.gmra.mrb[40].mxu0 %vm871_vm9, %v1230_v22 }
 0x84c   :  { %v6279_v10 = vpop.eup %6278  ;;  %5391 = vmatpush3.msk.msra.mxu0 %vm957_vm11, %v1550_v2  ;;  %5351 = vmatprep.mubr.msk.f32.mxu0 %vm6466_vm6, %v6467_v63 }
 0x84d   :  { %v1232_v17 = vmul.f32 %v6279_v10, %v7257_v42  ;;  %5911 = vmatprep.subr.bf16.mxu0 %v6465_v62 }
 0x84f   :  { %5352 = vmatmul.mubr.msk.f32.gmra.mrb[42].mxu0 %vm871_vm9, %v1232_v17 }
 0x850   :  { %5354 = vmatprep.mubr.msk.f32.mxu0 %vm6466_vm6, %v6467_v63 }
 0x86e   :  { %v1224_v52 = vpop.xlane.xlu0 %1223 }
 0x86f   :  { %6280 = vrcp.f32 %v1224_v52  ;;  %v2045_v52 = vld [vmem:[%s8408_s5] sm:$0xff] }
 0x872   :  { %v1521_v1 = vpop.xlane.xlu0 %1520 }
 0x876   :  { %v1518_v44 = vpop.xlane.xlu1 %1517 }
 0x877   :  { %6282 = vrcp.f32 %v1518_v44  ;;  %v2047_v44 = vld [vmem:[%s8408_s5 + $0x10] sm:$0xff] }
 0x878   :  { %6284 = vrcp.f32 %v1521_v1  ;;  %v2046_v1 = vld [vmem:[%s8408_s5 + $0x8] sm:$0xff] }
 0x879   :  { %v6281_v14 = vpop.eup %6280 }
 0x87a   :  { %v1524_v15 = vpop.xlane.xlu0 %1523  ;;  %v1234_v48 = vmul.f32 %v6281_v14, %v7271_v6  ;;  %v5918_v14 = vpack.c.bf16 %v2046_v1, %v2045_v52  ;;  %v4750_v1 = vld [vmem:[%s8409_s6] ss:$0 sm:$0xff] }
 0x87b   :  { %v1824_v56 = vpop.xlane.xlu1 %1823  ;;  %6286 = vrcp.f32 %v1524_v15  ;;  %v2048_v15 = vld [vmem:[%s8408_s5 + $0x18] sm:$0xff] }
 0x87c   :  { %5355 = vmatmul.mubr.msk.f32.gmra.mrb[44].mxu0 %vm871_vm9, %v1234_v48  ;;  %5919 = vmatpush3.bf16.msra.mxu1 %v5918_v14  ;;  %v5921_v48 = vpack.c.bf16 %v2048_v15, %v2047_v44 }
 0x87d   :  { %5392 = vmatprep.mubr.msk.f32.mxu0 %vm6466_vm6, %v6467_v63  ;;  %5920 = vmatprep.subr.bf16.mxu1 %v6465_v62 }
 0x87e   :  { %v1527_v42 = vpop.xlane.xlu0 %1526 }
 0x87f   :  { %v6124_v19 = vpop.permute.xlu1 %6123  ;;  %6288 = vrcp.f32 %v1527_v42 }
 0x880   :  { %v6126_v20 = vunpack.i.h.bf16 %v6124_v19  ;;  %v6125_v24 = vunpack.i.l.bf16 %v6124_v19  ;;  %5922 = vmatpush3.bf16.msra.mxu1 %v5921_v48 }
 0x881   :  { %v6283_v26 = vpop.eup %6282  ;;  %5929 = vmatprep.subr.bf16.mxu1 %v6465_v62 }
 0x882   :  { %v1532_v28 = vmul.f32 %v6283_v26, %v7280_v54  ;;  %v5912_v31 = vpack.c.bf16 %v6126_v20, %v6125_v24  ;;  %v1530_v32 = vpop.xlane.xlu0 %1529  ;;  %v6285_v36 = vpop.eup %6284 }
 0x883   :  { %6290 = vrcp.f32 %v1530_v32  ;;  %v1534_v46 = vmul.f32 %v6285_v36, %v7276_v40 }
 0x884   :  { %5393 = vmatmul.mubr.msk.f32.vlgmr.msra.gmra.mrb[46].mxu0 %vm871_vm9, %v1532_v28  ;;  %6292 = vrcp.f32 %v1824_v56 }
 0x885   :  { %5913 = vmatpush3.bf16.msra.mxu0 %v5912_v31  ;;  %5395 = vmatprep.mubr.msk.f32.mxu0 %vm6466_vm6, %v6467_v63  ;;  %v6287_v53 = vpop.eup %6286 }
 0x886   :  { %v6129_v6 = vpop.permute.xlu0 %6128  ;;  %5914 = vmatprep.subr.bf16.mxu0 %v6465_v62  ;;  %v1536_v4 = vmul.f32 %v6287_v53, %v7284_v9 }
 0x887   :  { %v6131_v51 = vunpack.i.h.bf16 %v6129_v6  ;;  %v6130_v59 = vunpack.i.l.bf16 %v6129_v6 }
 0x888   :  { %5396 = vmatmul.mubr.msk.f32.gmra.mrb[48].mxu0 %vm871_vm9, %v1534_v46 }
 0x889   :  { %v5915_v54 = vpack.c.bf16 %v6131_v51, %v6130_v59  ;;  %5398 = vmatprep.mubr.msk.f32.mxu0 %vm6466_vm6, %v6467_v63  ;;  %v6289_v61 = vpop.eup %6288 }
 0x88a   :  { %v1538_v40 = vmul.f32 %v6289_v61, %v7290_v13 }
 0x88b   :  { %5916 = vmatpush3.bf16.msra.mxu0 %v5915_v54 }
 0x88c   :  { %5399 = vmatmul.mubr.msk.f32.gmra.mrb[50].mxu0 %vm871_vm9, %v1536_v4  ;;  %5440 = vmatprep.subr.mxu0 %v6467_v63 }
 0x88d   :  { %5401 = vmatprep.mubr.msk.f32.mxu0 %vm6466_vm6, %v6467_v63  ;;  %v6291_v2 = vpop.eup %6290 }
 0x88e   :  { %v1540_v3 = vmul.f32 %v6291_v2, %v7296_v49  ;;  %v6293_v13 = vpop.eup %6292 }
 0x88f   :  { %v1838_v5 = vmul.f32 %v6293_v13, %v7286_v58 }
 0x890   :  { %5402 = vmatmul.mubr.msk.f32.gmra.mrb[52].mxu0 %vm871_vm9, %v1538_v40 }
 0x891   :  { %5404 = vmatprep.mubr.msk.f32.mxu0 %vm6466_vm6, %v6467_v63 }
 0x894   :  { %5405 = vmatmul.mubr.msk.f32.gmra.mrb[54].mxu0 %vm871_vm9, %v1540_v3 }
 0x895   :  { %5442 = vmatprep.mubr.msk.f32.mxu0 %vm6466_vm6, %v6467_v63 }
 0x8b0   :  { %v1836_v23 = vpop.xlane.xlu1 %1835 }
 0x8b7   :  { %v1827_v9 = vpop.xlane.xlu0 %1826 }
 0x8b8   :  { %6294 = vrcp.f32 %v1827_v9 }
 0x8bb   :  { %v1830_v11 = vpop.xlane.xlu0 %1829 }
 0x8bc   :  { %6296 = vrcp.f32 %v1830_v11 }
 0x8bf   :  { %v1833_v30 = vpop.xlane.xlu0 %1832 }
 0x8c0   :  { %6298 = vrcp.f32 %v1833_v30 }
 0x8c1   :  { %6300 = vrcp.f32 %v1836_v23 }
 0x8c2   :  { %v6295_v0 = vpop.eup %6294 }
 0x8c3   :  { %v1856_v34 = vpop.permute.xlu0 %1855  ;;  %v1840_v49 = vmul.f32 %v6295_v0, %v7312_v47 }
 0x8c4   :  { %5441 = vmatpush3.msk.msra.mxu0 %vm957_vm11, %v1856_v34 }
 0x8c5   :  { %5443 = vmatmul.mubr.msk.f32.vlgmr.msra.gmra.mrb[56].mxu0 %vm871_vm9, %v1838_v5  ;;  %5923 = vmatprep.subr.bf16.mxu0 %v6465_v62 }
 0x8c6   :  { %5445 = vmatprep.mubr.msk.f32.mxu0 %vm6466_vm6, %v6467_v63  ;;  %v6297_v7 = vpop.eup %6296 }
 0x8c7   :  { %v1842_v58 = vmul.f32 %v6297_v7, %v7316_v60 }
 0x8c9   :  { %5446 = vmatmul.mubr.msk.f32.gmra.mrb[58].mxu0 %vm871_vm9, %v1840_v49 }
 0x8ca   :  { %5448 = vmatprep.mubr.msk.f32.mxu0 %vm6466_vm6, %v6467_v63  ;;  %v6299_v16 = vpop.eup %6298 }
 0x8cb   :  { %v1844_v38 = vmul.f32 %v6299_v16, %v7320_v55  ;;  %v6301_v45 = vpop.eup %6300 }
 0x8cc   :  { %v1846_v47 = vmul.f32 %v6301_v45, %v7308_v43 }
 0x8cd   :  { %5449 = vmatmul.mubr.msk.f32.gmra.mrb[60].mxu0 %vm871_vm9, %v1842_v58 }
 0x8ce   :  { %5451 = vmatprep.mubr.msk.f32.mxu0 %vm6466_vm6, %v6467_v63 }
 0x8d1   :  { %5452 = vmatmul.mubr.msk.f32.gmra.mrb[62].mxu0 %vm871_vm9, %v1844_v38 }
 0x8d2   :  { %5454 = vmatprep.mubr.msk.f32.mxu0 %vm6466_vm6, %v6467_v63 }
 0x8d5   :  { %5455 = vmatmul.mubr.msk.f32.gmra.mrb[64].mxu0 %vm871_vm9, %v1846_v47 }
 0x8d6   :  { %5488 = vmatprep.mubr.msk.f32.mxu0 %vm6466_vm6, %v6467_v63 }
 0x916   :  { %v1332_v60 = vpop.f32.mrb[36].mxu0 }
 0x917   :  { %1973 = vrot.lane.b32.xlu0 %v1332_v60, %s6479_s30  ;;  %v5344_v50 = vpop.f32.mrb[37].mxu0 }
 0x91a   :  { %v1337_v29 = vpop.f32.mrb[38].mxu0 }
 0x91b   :  { %1975 = vrot.lane.b32.xlu0 %v1337_v29, %s6479_s30  ;;  %v5347_v55 = vpop.f32.mrb[39].mxu0 }
 0x91e   :  { %v1342_v8 = vpop.f32.mrb[40].mxu0 }
 0x91f   :  { %v5350_v12 = vpop.f32.mrb[41].mxu0 }
 0x922   :  { %v1347_v22 = vpop.f32.mrb[42].mxu0 }
 0x923   :  { %v5353_v10 = vpop.f32.mrb[43].mxu0 }
 0x94f   :  { %v1352_v17 = vpop.f32.mrb[44].mxu0 }
 0x950   :  { %v5356_v43 = vpop.f32.mrb[45].mxu0 }
 0x957   :  { %v1638_v56 = vpop.f32.mrb[46].mxu0 }
 0x958   :  { %1993 = vrot.lane.b32.xlu0 %v1638_v56, %s6480_s0  ;;  %v5394_v42 = vpop.f32.mrb[47].mxu0 }
 0x95b   :  { %v1643_v19 = vpop.f32.mrb[48].mxu0 }
 0x95c   :  { %1977 = vrot.lane.b32.xlu0 %v1342_v8, %s6479_s30  ;;  %1995 = vrot.lane.b32.xlu1 %v1643_v19, %s6480_s0  ;;  %v5397_v20 = vpop.f32.mrb[49].mxu0 }
 0x95f   :  { %v1648_v24 = vpop.f32.mrb[50].mxu0 }
 0x960   :  { %1979 = vrot.lane.b32.xlu1 %v1347_v22, %s6479_s30  ;;  %1997 = vrot.lane.b32.xlu0 %v1648_v24, %s6480_s0  ;;  %v5400_v26 = vpop.f32.mrb[51].mxu0 }
 0x963   :  { %v1653_v28 = vpop.f32.mrb[52].mxu0 }
 0x964   :  { %v5403_v31 = vpop.f32.mrb[53].mxu0 }
 0x967   :  { %v1658_v32 = vpop.f32.mrb[54].mxu0 }
 0x968   :  { %v5406_v36 = vpop.f32.mrb[55].mxu0 }
 0x989   :  { %v1974_v3 = vpop.permute.xlu0 %1973 }
 0x98a   :  { %v2028_v5 = vsel %vm760_vm7, %v7150_v33, %v1974_v3 }
 0x98d   :  { %v1976_v9 = vpop.permute.xlu0 %1975 }
 0x98e   :  { %v2029_v7 = vsel %vm760_vm7, %v7152_v35, %v1976_v9 }
 0x998   :  { %v1944_v6 = vpop.f32.mrb[56].mxu0 }
 0x999   :  { %2013 = vrot.lane.b32.xlu0 %v1944_v6, %s8441_s21  ;;  %v5444_v46 = vpop.f32.mrb[57].mxu0 }
 0x99c   :  { %v1949_v53 = vpop.f32.mrb[58].mxu0 }
 0x99d   :  { %2015 = vrot.lane.b32.xlu0 %v1949_v53, %s8441_s21  ;;  %v5447_v51 = vpop.f32.mrb[59].mxu0  ;;  %v6434_v53 = vld [vmem:[%s8449_s28 + $0x20] sm:$0x3] }
 0x9a0   :  { %v1954_v59 = vpop.f32.mrb[60].mxu0 }
 0x9a1   :  { %2017 = vrot.lane.b32.xlu0 %v1954_v59, %s8441_s21  ;;  %v5450_v54 = vpop.f32.mrb[61].mxu0 }
 0x9a4   :  { %v1959_v4 = vpop.f32.mrb[62].mxu0 }
 0x9a5   :  { %1999 = vrot.lane.b32.xlu0 %v1653_v28, %s6480_s0  ;;  %2019 = vrot.lane.b32.xlu1 %v1959_v4, %s8441_s21  ;;  %v5453_v61 = vpop.f32.mrb[63].mxu0 }
 0x9a8   :  { %v1964_v40 = vpop.f32.mrb[64].mxu0 }
 0x9a9   :  { %1981 = vrot.lane.b32.xlu0 %v1352_v17, %s6479_s30  ;;  %2001 = vrot.lane.b32.xlu1 %v1658_v32, %s6480_s0  ;;  %v5456_v2 = vpop.f32.mrb[65].mxu0 }
 0x9ad   :  { %2021 = vrot.lane.b32.xlu0 %v1964_v40, %s8441_s21 }
 0x9ca   :  { %v1994_v11 = vpop.permute.xlu0 %1993 }
 0x9cb   :  { %v2034_v23 = vsel %vm2033_vm12, %v2028_v5, %v1994_v11 }
 0x9ce   :  { %v1978_v30 = vpop.permute.xlu0 %1977  ;;  %v1996_v0 = vpop.permute.xlu1 %1995 }
 0x9cf   :  { %v2035_v58 = vsel %vm2033_vm12, %v2029_v7, %v1996_v0  ;;  %v2030_v33 = vsel %vm760_vm7, %v7154_v37, %v1978_v30 }
 0x9d2   :  { %v1998_v13 = vpop.permute.xlu0 %1997  ;;  %v1980_v47 = vpop.permute.xlu1 %1979 }
 0x9d3   :  { %v2036_v45 = vsel %vm2033_vm12, %v2030_v33, %v1998_v13  ;;  %v2031_v50 = vsel %vm760_vm7, %v7156_v39, %v1980_v47 }
 0xa0b   :  { %v2014_v34 = vpop.permute.xlu0 %2013 }
 0xa0c   :  { %v2040_v49 = vsel %vm2039_vm13, %v2034_v23, %v2014_v34 }
 0xa0d   :  { %5466 = vmatmul.mubr.msk.f32.vlgmr.msra.gmra.mrb[60].mxu1 %vm546_vm4, %v2040_v49 }
 0xa0e   :  { %5468 = vmatprep.mubr.msk.f32.mxu1 %vm6466_vm6, %v6467_v63 }
 0xa0f   :  { %v2016_v16 = vpop.permute.xlu0 %2015 }
 0xa10   :  { %v2041_v38 = vsel %vm2039_vm13, %v2035_v58, %v2016_v16 }
 0xa11   :  { %5469 = vmatmul.mubr.msk.f32.gmra.mrb[62].mxu1 %vm546_vm4, %v2041_v38 }
 0xa12   :  { %5471 = vmatprep.mubr.msk.f32.mxu1 %vm6466_vm6, %v6467_v63 }
 0xa13   :  { %v2018_v35 = vpop.permute.xlu0 %2017 }
 0xa14   :  { %v2042_v60 = vsel %vm2039_vm13, %v2036_v45, %v2018_v35 }
 0xa15   :  { %5472 = vmatmul.mubr.msk.f32.gmra.mrb[64].mxu1 %vm546_vm4, %v2042_v60 }
 0xa16   :  { %5474 = vmatprep.mubr.msk.f32.mxu1 %vm6466_vm6, %v6467_v63 }
 0xa17   :  { %v2000_v29 = vpop.permute.xlu0 %1999  ;;  %v2020_v55 = vpop.permute.xlu1 %2019 }
 0xa18   :  { %v2037_v37 = vsel %vm2033_vm12, %v2031_v50, %v2000_v29 }
 0xa19   :  { %v2043_v8 = vsel %vm2039_vm13, %v2037_v37, %v2020_v55  ;;  %v2260_v55 = vld [vmem:[%s8414_s11] sm:$0xff]  ;;  %v2261_v37 = vld [vmem:[%s8414_s11 + $0x8] sm:$0xff] }
 0xa1a   :  { %5475 = vmatmul.mubr.msk.f32.gmra.mrb[66].mxu1 %vm546_vm4, %v2043_v8  ;;  %v5924_v8 = vpack.c.bf16 %v2261_v37, %v2260_v55 }
 0xa1b   :  { %v1982_v12 = vpop.permute.xlu0 %1981  ;;  %5477 = vmatprep.mubr.msk.f32.mxu1 %vm6466_vm6, %v6467_v63  ;;  %v2002_v10 = vpop.permute.xlu1 %2001 }
 0xa1c   :  { %v2032_v22 = vsel %vm760_vm7, %v7158_v41, %v1982_v12  ;;  %5925 = vmatpush3.bf16.msra.mxu0 %v5924_v8  ;;  %v2262_v12 = vld [vmem:[%s8414_s11 + $0x10] sm:$0xff] }
 0xa1d   :  { %v2038_v17 = vsel %vm2033_vm12, %v2032_v22, %v2002_v10  ;;  %5926 = vmatprep.subr.bf16.mxu0 %v6465_v62  ;;  %v2263_v22 = vld [vmem:[%s8414_s11 + $0x18] sm:$0xff] }
 0xa1e   :  { %v5927_v10 = vpack.c.bf16 %v2263_v22, %v2262_v12 }
 0xa1f   :  { %v2022_v43 = vpop.permute.xlu0 %2021 }
 0xa20   :  { %v2044_v39 = vsel %vm2039_vm13, %v2038_v17, %v2022_v43  ;;  %5928 = vmatpush3.bf16.msra.mxu0 %v5927_v10 }
 0xa21   :  { %5478 = vmatmul.mubr.msk.f32.gmra.mrb[68].mxu1 %vm546_vm4, %v2044_v39  ;;  %5941 = vmatprep.subr.bf16.mxu0 %v6465_v62 }
 0xa22   :  { %5519 = vmatprep.mubr.msk.f32.mxu1 %vm6466_vm6, %v6467_v63 }
 0xae0   :  { %v2130_v52 = vpop.f32.mrb[60].mxu1 }
 0xae1   :  { %v2154_v44 = vadd.f32 %v2130_v52, %v6757_v18  ;;  %v5467_v14 = vpop.f32.mrb[61].mxu1 }
 0xae3   :  { %v7466_v41 = vadd.f32 %v4750_v1, %v2154_v44 }
 0xae4   :  { %v2135_v15 = vpop.f32.mrb[62].mxu1 }
 0xae5   :  { %v2155_v48 = vadd.f32 %v2135_v15, %v6762_v21  ;;  %v5470_v56 = vpop.f32.mrb[63].mxu1  ;;  %v2173_v42 = vsel %vm546_vm4, %v7466_v41, 0.0 }
 0xae6   :  { %2174 = vadd.xlane.f32.xlu1 %v2173_v42 }
 0xae7   :  { %v7471_v19 = vadd.f32 %v4750_v1, %v2155_v48 }
 0xae8   :  { %v2140_v20 = vpop.f32.mrb[64].mxu1 }
 0xae9   :  { %v2156_v24 = vadd.f32 %v2140_v20, %v6769_v25  ;;  %v5473_v26 = vpop.f32.mrb[65].mxu1  ;;  %v2176_v18 = vsel %vm546_vm4, %v7471_v19, 0.0 }
 0xaea   :  { %2177 = vadd.xlane.f32.xlu0 %v2176_v18 }
 0xaeb   :  { %v7476_v28 = vadd.f32 %v4750_v1, %v2156_v24  ;;  %v4751_v24 = vld [vmem:[%s8412_s9] ss:$0 sm:$0xff] }
 0xaed   :  { %v2145_v31 = vpop.f32.mrb[66].mxu1  ;;  %v2179_v21 = vsel %vm546_vm4, %v7476_v28, 0.0 }
 0xaee   :  { %v2157_v32 = vadd.f32 %v2145_v31, %v6774_v27  ;;  %2180 = vadd.xlane.f32.xlu0 %v2179_v21  ;;  %v5476_v36 = vpop.f32.mrb[67].mxu1  ;;  %v4752_v31 = vld [vmem:[%s8413_s10] ss:$0 sm:$0xff] }
 0xaf0   :  { %v7481_v6 = vadd.f32 %v4750_v1, %v2157_v32 }
 0xaf2   :  { %v2182_v25 = vsel %vm546_vm4, %v7481_v6, 0.0 }
 0xaf3   :  { %2183 = vadd.xlane.f32.xlu1 %v2182_v25 }
 0xaf4   :  { %v2150_v46 = vpop.f32.mrb[68].mxu1 }
 0xaf5   :  { %v2158_v51 = vadd.f32 %v6434_v53, %v2150_v46  ;;  %v5479_v59 = vpop.f32.mrb[69].mxu1 }
 0xaf7   :  { %v7488_v54 = vadd.f32 %v4750_v1, %v2158_v51 }
 0xaf9   :  { %v2185_v27 = vsel %vm559_vm5, %v7488_v54, 0.0 }
 0xafa   :  { %2186 = vadd.xlane.f32.xlu0 %v2185_v27 }
 0xb73   :  { %v2175_v4 = vpop.xlane.xlu1 %2174 }
 0xb74   :  { %v2188_v61 = vmul.f32 0.03125, %v2175_v4 }
 0xb76   :  { %v2193_v40 = vsub.f32 %v7466_v41, %v2188_v61 }
 0xb77   :  { %v2178_v2 = vpop.xlane.xlu0 %2177 }
 0xb78   :  { %v2189_v3 = vmul.f32 0.03125, %v2178_v2  ;;  %v2198_v9 = vmul.f32 %v2193_v40, %v2193_v40 }
 0xb7a   :  { %v2194_v11 = vsub.f32 %v7471_v19, %v2189_v3  ;;  %v2203_v30 = vsel %vm546_vm4, %v2198_v9, 0.0 }
 0xb7b   :  { %v2181_v13 = vpop.xlane.xlu0 %2180  ;;  %2204 = vadd.xlane.f32.xlu1 %v2203_v30 }
 0xb7c   :  { %v2190_v5 = vmul.f32 0.03125, %v2181_v13  ;;  %v2199_v23 = vmul.f32 %v2194_v11, %v2194_v11 }
 0xb7e   :  { %v2195_v34 = vsub.f32 %v7476_v28, %v2190_v5  ;;  %v2206_v0 = vsel %vm546_vm4, %v2199_v23, 0.0 }
 0xb7f   :  { %2207 = vadd.xlane.f32.xlu0 %v2206_v0  ;;  %v2401_v0 = vld [vmem:[%s8416_s13] sm:$0xff] }
 0xb80   :  { %v2184_v49 = vpop.xlane.xlu1 %2183  ;;  %v2200_v7 = vmul.f32 %v2195_v34, %v2195_v34 }
 0xb81   :  { %v2191_v58 = vmul.f32 0.03125, %v2184_v49  ;;  %v2402_v49 = vld [vmem:[%s8416_s13 + $0x8] sm:$0xff] }
 0xb82   :  { %v2209_v16 = vsel %vm546_vm4, %v2200_v7, 0.0  ;;  %v5930_v7 = vpack.c.bf16 %v2402_v49, %v2401_v0 }
 0xb83   :  { %v2196_v38 = vsub.f32 %v7481_v6, %v2191_v58  ;;  %2210 = vadd.xlane.f32.xlu1 %v2209_v16  ;;  %v2403_v58 = vld [vmem:[%s8416_s13 + $0x10] sm:$0xff]  ;;  %v2404_v16 = vld [vmem:[%s8416_s13 + $0x18] sm:$0xff] }
 0xb84   :  { %5931 = vmatpush3.bf16.msra.mxu1 %v5930_v7 }
 0xb85   :  { %v2201_v33 = vmul.f32 %v2196_v38, %v2196_v38  ;;  %5932 = vmatprep.subr.bf16.mxu1 %v6465_v62 }
 0xb87   :  { %v2187_v45 = vpop.xlane.xlu0 %2186  ;;  %v2212_v47 = vsel %vm546_vm4, %v2201_v33, 0.0  ;;  %v2405_v33 = vld [vmem:[%s8416_s13 + $0x20] sm:$0xff] }
 0xb88   :  { %v2192_v35 = vmul.f32 0.03125, %v2187_v45  ;;  %2213 = vadd.xlane.f32.xlu0 %v2212_v47  ;;  %v2406_v45 = vld [vmem:[%s8416_s13 + $0x28] sm:$0xff] }
 0xb89   :  { %v5936_v47 = vpack.c.bf16 %v2406_v45, %v2405_v33 }
 0xb8a   :  { %v2197_v60 = vsub.f32 %v7488_v54, %v2192_v35  ;;  %v2407_v35 = vld [vmem:[%s8416_s13 + $0x30] sm:$0xff] }
 0xb8c   :  { %v2202_v50 = vmul.f32 %v2197_v60, %v2197_v60 }
 0xb8e   :  { %v2215_v29 = vsel %vm559_vm5, %v2202_v50, 0.0 }
 0xb8f   :  { %2216 = vadd.xlane.f32.xlu1 %v2215_v29  ;;  %v4753_v29 = vld [vmem:[%s8415_s12] ss:$0 sm:$0xff] }
 0xc08   :  { %v2205_v17 = vpop.xlane.xlu1 %2204 }
 0xc09   :  { %v2218_v43 = vmul.f32 0.03125, %v2205_v17 }
 0xc0b   :  { %v2223_v39 = vadd.f32 1e-05, %v2218_v43 }
 0xc0c   :  { %v2208_v52 = vpop.xlane.xlu0 %2207 }
 0xc0d   :  { %6302 = vrsqrt.f32 %v2223_v39  ;;  %v2219_v1 = vmul.f32 0.03125, %v2208_v52 }
 0xc0f   :  { %v2224_v44 = vadd.f32 1e-05, %v2219_v1 }
 0xc10   :  { %v2211_v14 = vpop.xlane.xlu1 %2210 }
 0xc11   :  { %6304 = vrsqrt.f32 %v2224_v44  ;;  %v2220_v15 = vmul.f32 0.03125, %v2211_v14 }
 0xc13   :  { %v2225_v48 = vadd.f32 1e-05, %v2220_v15 }
 0xc15   :  { %6306 = vrsqrt.f32 %v2225_v48  ;;  %v2214_v56 = vpop.xlane.xlu0 %2213 }
 0xc16   :  { %v2221_v42 = vmul.f32 0.03125, %v2214_v56 }
 0xc17   :  { %v6303_v20 = vpop.eup %6302 }
 0xc18   :  { %v2233_v26 = vmul.f32 %v6303_v20, %v2193_v40  ;;  %v2226_v18 = vadd.f32 1e-05, %v2221_v42 }
 0xc1a   :  { %v2244_v21 = vmul.f32 %v4751_v24, %v2233_v26  ;;  %6308 = vrsqrt.f32 %v2226_v18 }
 0xc1b   :  { %v6305_v32 = vpop.eup %6304 }
 0xc1c   :  { %v2217_v36 = vpop.xlane.xlu1 %2216  ;;  %v2255_v25 = vadd.f32 %v4752_v31, %v2244_v21  ;;  %v2234_v46 = vmul.f32 %v6305_v32, %v2194_v11 }
 0xc1d   :  { %v2222_v53 = vmul.f32 0.03125, %v2217_v36 }
 0xc1e   :  { %5489 = vmatmul.mubr.msk.f32.vlgmr.msra.gmra.mrb[66].mxu0 %vm546_vm4, %v2255_v25  ;;  %v2245_v51 = vmul.f32 %v4751_v24, %v2234_v46 }
 0xc1f   :  { %v6307_v59 = vpop.eup %6306  ;;  %v2227_v27 = vadd.f32 1e-05, %v2222_v53  ;;  %5491 = vmatprep.mubr.msk.f32.mxu0 %vm6466_vm6, %v6467_v63 }
 0xc20   :  { %v2256_v4 = vadd.f32 %v4752_v31, %v2245_v51  ;;  %v2235_v61 = vmul.f32 %v6307_v59, %v2195_v34 }
 0xc21   :  { %6310 = vrsqrt.f32 %v2227_v27 }
 0xc22   :  { %5492 = vmatmul.mubr.msk.f32.gmra.mrb[68].mxu0 %vm546_vm4, %v2256_v4  ;;  %v2246_v40 = vmul.f32 %v4751_v24, %v2235_v61 }
 0xc23   :  { %5494 = vmatprep.mubr.msk.f32.mxu0 %vm6466_vm6, %v6467_v63 }
 0xc24   :  { %v6309_v2 = vpop.eup %6308  ;;  %v2257_v3 = vadd.f32 %v4752_v31, %v2246_v40 }
 0xc25   :  { %v2236_v9 = vmul.f32 %v6309_v2, %v2196_v38  ;;  %v5933_v38 = vpack.c.bf16 %v2404_v16, %v2403_v58 }
 0xc26   :  { %5495 = vmatmul.mubr.msk.f32.gmra.mrb[70].mxu0 %vm546_vm4, %v2257_v3 }
 0xc27   :  { %5497 = vmatprep.mubr.msk.f32.mxu0 %vm6466_vm6, %v6467_v63  ;;  %v2247_v11 = vmul.f32 %v4751_v24, %v2236_v9  ;;  %5934 = vmatpush3.bf16.msra.mxu1 %v5933_v38 }
 0xc28   :  { %5935 = vmatprep.subr.bf16.mxu1 %v6465_v62 }
 0xc29   :  { %v2258_v30 = vadd.f32 %v4752_v31, %v2247_v11 }
 0xc2b   :  { %v6311_v13 = vpop.eup %6310  ;;  %5498 = vmatmul.mubr.msk.f32.gmra.mrb[72].mxu0 %vm546_vm4, %v2258_v30  ;;  %5937 = vmatpush3.bf16.msra.mxu1 %v5936_v47 }
 0xc2c   :  { %5500 = vmatprep.mubr.msk.f32.mxu0 %vm6466_vm6, %v6467_v63  ;;  %v2237_v5 = vmul.f32 %v6311_v13, %v2197_v60  ;;  %5938 = vmatprep.subr.bf16.mxu1 %v6465_v62  ;;  %v2408_v60 = vld [vmem:[%s8416_s13 + $0x38] sm:$0xff] }
 0xc2d   :  { %v5939_v50 = vpack.c.bf16 %v2408_v60, %v2407_v35 }
 0xc2e   :  { %v2248_v23 = vmul.f32 %v4751_v24, %v2237_v5 }
 0xc2f   :  { %5940 = vmatpush3.bf16.msra.mxu1 %v5939_v50 }
 0xc30   :  { %v2259_v34 = vadd.f32 %v4752_v31, %v2248_v23  ;;  %5947 = vmatprep.subr.bf16.mxu1 %v6465_v62  ;;  %v4764_v23 = vld [vmem:[%s8417_s14] ss:$0 sm:$0xff] }
 0xc32   :  { %5501 = vmatmul.mubr.msk.f32.gmra.mrb[74].mxu0 %vm546_vm4, %v2259_v34 }
 0xc33   :  { %5542 = vmatprep.mubr.msk.f32.mxu0 %vm6466_vm6, %v6467_v63 }
 0xcf1   :  { %v2352_v55 = vpop.f32.mrb[66].mxu0 }
 0xcf2   :  { %v2353_v37 = vadd.f32 %v4753_v29, %v2352_v55  ;;  %v5490_v8 = vpop.f32.mrb[67].mxu0 }
 0xcf4   :  { %v2381_v12 = vmul.f32 0.70710677, %v2353_v37  ;;  %v2376_v42 = vmul.f32 0.5, %v2353_v37 }
 0xcf5   :  { %v2357_v22 = vpop.f32.mrb[68].mxu0 }
 0xcf6   :  { %6312 = verf.f32 %v2381_v12  ;;  %v2358_v10 = vadd.f32 %v4753_v29, %v2357_v22  ;;  %v5493_v17 = vpop.f32.mrb[69].mxu0 }
 0xcf8   :  { %v2382_v43 = vmul.f32 0.70710677, %v2358_v10  ;;  %v2377_v31 = vmul.f32 0.5, %v2358_v10 }
 0xcf9   :  { %v2362_v39 = vpop.f32.mrb[70].mxu0 }
 0xcfa   :  { %6314 = verf.f32 %v2382_v43  ;;  %v2363_v52 = vadd.f32 %v4753_v29, %v2362_v39  ;;  %v5496_v1 = vpop.f32.mrb[71].mxu0 }
 0xcfc   :  { %v2383_v44 = vmul.f32 0.70710677, %v2363_v52  ;;  %v2378_v59 = vmul.f32 0.5, %v2363_v52 }
 0xcfe   :  { %6316 = verf.f32 %v2383_v44  ;;  %v2367_v14 = vpop.f32.mrb[72].mxu0 }
 0xcff   :  { %v2368_v15 = vadd.f32 %v4753_v29, %v2367_v14  ;;  %v5499_v48 = vpop.f32.mrb[73].mxu0 }
 0xd00   :  { %v6313_v56 = vpop.eup %6312 }
 0xd01   :  { %v2391_v20 = vadd.f32 1.0, %v6313_v56  ;;  %v2384_v24 = vmul.f32 0.70710677, %v2368_v15  ;;  %v2379_v40 = vmul.f32 0.5, %v2368_v15 }
 0xd03   :  { %v2396_v26 = vmul.f32 %v2391_v20, %v2376_v42  ;;  %6318 = verf.f32 %v2384_v24 }
 0xd04   :  { %v6315_v18 = vpop.eup %6314 }
 0xd05   :  { %v2392_v21 = vadd.f32 1.0, %v6315_v18  ;;  %v2372_v32 = vpop.f32.mrb[74].mxu0  ;;  %5520 = vmatmul.mubr.msk.f32.vlgmr.msra.gmra.mrb[70].mxu1 %vm2409_vm14, %v2396_v26 }
 0xd06   :  { %v2373_v36 = vadd.f32 %v4753_v29, %v2372_v32  ;;  %v5502_v25 = vpop.f32.mrb[75].mxu0  ;;  %5522 = vmatprep.mubr.msk.f32.mxu1 %vm6466_vm6, %v6467_v63 }
 0xd07   :  { %v2397_v46 = vmul.f32 %v2392_v21, %v2377_v31 }
 0xd08   :  { %v6317_v53 = vpop.eup %6316  ;;  %v2385_v51 = vmul.f32 0.70710677, %v2373_v36  ;;  %v2380_v11 = vmul.f32 0.5, %v2373_v36 }
 0xd09   :  { %v2393_v27 = vadd.f32 1.0, %v6317_v53  ;;  %5523 = vmatmul.mubr.msk.f32.gmra.mrb[72].mxu1 %vm2409_vm14, %v2397_v46 }
 0xd0a   :  { %6320 = verf.f32 %v2385_v51  ;;  %5525 = vmatprep.mubr.msk.f32.mxu1 %vm6466_vm6, %v6467_v63 }
 0xd0b   :  { %v2398_v4 = vmul.f32 %v2393_v27, %v2378_v59  ;;  %v4769_v27 = vld [vmem:[%s8407_s4 + $0x20] sm:$0xff] }
 0xd0d   :  { %v6319_v61 = vpop.eup %6318  ;;  %5526 = vmatmul.mubr.msk.f32.gmra.mrb[74].mxu1 %vm2409_vm14, %v2398_v4  ;;  %v4770_v4 = vld [vmem:[%s8407_s4 + $0x28] sm:$0xff] }
 0xd0e   :  { %v2394_v2 = vadd.f32 1.0, %v6319_v61  ;;  %5528 = vmatprep.mubr.msk.f32.mxu1 %vm6466_vm6, %v6467_v63  ;;  %v5942_v61 = vpack.c.bf16 %v4770_v4, %v4769_v27 }
 0xd10   :  { %v2399_v3 = vmul.f32 %v2394_v2, %v2379_v40  ;;  %5943 = vmatpush3.bf16.msra.mxu0 %v5942_v61  ;;  %v4771_v40 = vld [vmem:[%s8407_s4 + $0x30] sm:$0xff]  ;;  %v4772_v2 = vld [vmem:[%s8407_s4 + $0x38] sm:$0xff] }
 0xd11   :  { %5944 = vmatprep.subr.bf16.mxu0 %v6465_v62 }
 0xd12   :  { %5529 = vmatmul.mubr.msk.f32.gmra.mrb[76].mxu1 %vm2409_vm14, %v2399_v3  ;;  %v5945_v3 = vpack.c.bf16 %v4772_v2, %v4771_v40 }
 0xd13   :  { %5531 = vmatprep.mubr.msk.f32.mxu1 %vm6466_vm6, %v6467_v63 }
 0xd14   :  { %v6321_v9 = vpop.eup %6320  ;;  %5946 = vmatpush3.bf16.msra.mxu0 %v5945_v3 }
 0xd15   :  { %v2395_v30 = vadd.f32 1.0, %v6321_v9  ;;  %5955 = vmatprep.subr.bf16.mxu0 %v6465_v62 }
 0xd17   :  { %v2400_v13 = vmul.f32 %v2395_v30, %v2380_v11 }
 0xd19   :  { %5532 = vmatmul.mubr.msk.f32.gmra.mrb[78].mxu1 %vm2409_vm14, %v2400_v13 }
 0xd1a   :  { %5567 = vmatprep.mubr.msk.f32.mxu1 %vm6466_vm6, %v6467_v63 }
 0xdd8   :  { %v2491_v5 = vpop.f32.mrb[70].mxu1 }
 0xdd9   :  { %v2515_v34 = vadd.f32 %v2491_v5, %v7466_v41  ;;  %v5521_v0 = vpop.f32.mrb[71].mxu1 }
 0xddb   :  { %v7587_v49 = vadd.f32 %v4764_v23, %v2515_v34 }
 0xddc   :  { %v2496_v7 = vpop.f32.mrb[72].mxu1 }
 0xddd   :  { %v2516_v58 = vadd.f32 %v2496_v7, %v7471_v19  ;;  %v5524_v16 = vpop.f32.mrb[73].mxu1  ;;  %v2536_v38 = vsel %vm546_vm4, %v7587_v49, 0.0 }
 0xdde   :  { %2537 = vadd.xlane.f32.xlu0 %v2536_v38 }
 0xddf   :  { %v7592_v33 = vadd.f32 %v4764_v23, %v2516_v58 }
 0xde0   :  { %v2501_v45 = vpop.f32.mrb[74].mxu1 }
 0xde1   :  { %v2517_v47 = vadd.f32 %v2501_v45, %v7476_v28  ;;  %v5527_v35 = vpop.f32.mrb[75].mxu1  ;;  %v2539_v41 = vsel %vm546_vm4, %v7592_v33, 0.0  ;;  %v4767_v45 = vld [vmem:[%s8410_s7 + $0x1] ss:$0 sm:$0xff]  ;;  %s8453_s7 = smov 112  }
 0xde2   :  { %2540 = vadd.xlane.f32.xlu1 %v2539_v41  ;;  %v4768_v41 = vld [vmem:[%s8411_s8 + $0x1] ss:$0 sm:$0xff]  ;;  %s8454_s8 = smov 72  }
 0xde3   :  { %v7597_v60 = vadd.f32 %v4764_v23, %v2517_v47 }
 0xde5   :  { %v2506_v50 = vpop.f32.mrb[76].mxu1  ;;  %v2542_v19 = vsel %vm546_vm4, %v7597_v60, 0.0 }
 0xde6   :  { %v2518_v29 = vadd.f32 %v2506_v50, %v7481_v6  ;;  %2543 = vadd.xlane.f32.xlu0 %v2542_v19  ;;  %v5530_v55 = vpop.f32.mrb[77].mxu1 }
 0xde8   :  { %v7602_v37 = vadd.f32 %v4764_v23, %v2518_v29 }
 0xdea   :  { %v2545_v28 = vsel %vm546_vm4, %v7602_v37, 0.0 }
 0xdeb   :  { %2546 = vadd.xlane.f32.xlu1 %v2545_v28 }
 0xdec   :  { %v2511_v8 = vpop.f32.mrb[78].mxu1 }
 0xded   :  { %v2519_v12 = vadd.f32 %v2511_v8, %v7488_v54  ;;  %v5533_v22 = vpop.f32.mrb[79].mxu1 }
 0xdef   :  { %v7607_v10 = vadd.f32 %v4764_v23, %v2519_v12 }
 0xdf1   :  { %v2548_v17 = vsel %vm559_vm5, %v7607_v10, 0.0 }
 0xdf2   :  { %2549 = vadd.xlane.f32.xlu0 %v2548_v17 }
 0xe6b   :  { %v2538_v43 = vpop.xlane.xlu0 %2537 }
 0xe6c   :  { %v2551_v6 = vmul.f32 0.03125, %v2538_v43 }
 0xe6e   :  { %v2556_v39 = vsub.f32 %v7587_v49, %v2551_v6 }
 0xe6f   :  { %v2541_v52 = vpop.xlane.xlu1 %2540 }
 0xe70   :  { %v2552_v1 = vmul.f32 0.03125, %v2541_v52  ;;  %v2561_v44 = vmul.f32 %v2556_v39, %v2556_v39 }
 0xe72   :  { %v2557_v14 = vsub.f32 %v7592_v33, %v2552_v1  ;;  %v2566_v15 = vsel %vm546_vm4, %v2561_v44, 0.0 }
 0xe73   :  { %v2544_v48 = vpop.xlane.xlu0 %2543  ;;  %2567 = vadd.xlane.f32.xlu1 %v2566_v15 }
 0xe74   :  { %v2553_v54 = vmul.f32 0.03125, %v2544_v48  ;;  %v2562_v56 = vmul.f32 %v2557_v14, %v2557_v14 }
 0xe76   :  { %v2558_v42 = vsub.f32 %v7597_v60, %v2553_v54  ;;  %v2569_v20 = vsel %vm546_vm4, %v2562_v56, 0.0 }
 0xe77   :  { %2570 = vadd.xlane.f32.xlu0 %v2569_v20 }
 0xe78   :  { %v2547_v24 = vpop.xlane.xlu1 %2546  ;;  %v2563_v26 = vmul.f32 %v2558_v42, %v2558_v42 }
 0xe79   :  { %v2554_v18 = vmul.f32 0.03125, %v2547_v24 }
 0xe7a   :  { %v2572_v31 = vsel %vm546_vm4, %v2563_v26, 0.0 }
 0xe7b   :  { %v2559_v21 = vsub.f32 %v7602_v37, %v2554_v18  ;;  %2573 = vadd.xlane.f32.xlu1 %v2572_v31 }
 0xe7d   :  { %v2564_v32 = vmul.f32 %v2559_v21, %v2559_v21 }
 0xe7f   :  { %v2550_v36 = vpop.xlane.xlu0 %2549  ;;  %v2575_v25 = vsel %vm546_vm4, %v2564_v32, 0.0 }
 0xe80   :  { %v2555_v46 = vmul.f32 0.03125, %v2550_v36  ;;  %2576 = vadd.xlane.f32.xlu0 %v2575_v25 }
 0xe82   :  { %v2560_v53 = vsub.f32 %v7607_v10, %v2555_v46 }
 0xe84   :  { %v2565_v51 = vmul.f32 %v2560_v53, %v2560_v53 }
 0xe86   :  { %v2578_v59 = vsel %vm559_vm5, %v2565_v51, 0.0 }
 0xe87   :  { %2579 = vadd.xlane.f32.xlu1 %v2578_v59 }
 0xf00   :  { %v2568_v9 = vpop.xlane.xlu1 %2567 }
 0xf01   :  { %v2581_v11 = vmul.f32 0.03125, %v2568_v9 }
 0xf03   :  { %v2586_v30 = vadd.f32 1e-05, %v2581_v11 }
 0xf04   :  { %v2571_v13 = vpop.xlane.xlu0 %2570 }
 0xf05   :  { %6322 = vrsqrt.f32 %v2586_v30  ;;  %v2582_v5 = vmul.f32 0.03125, %v2571_v13 }
 0xf07   :  { %v2587_v23 = vadd.f32 1e-05, %v2582_v5 }
 0xf08   :  { %v2574_v34 = vpop.xlane.xlu1 %2573 }
 0xf09   :  { %6324 = vrsqrt.f32 %v2587_v23  ;;  %v2583_v0 = vmul.f32 0.03125, %v2574_v34 }
 0xf0b   :  { %v2588_v7 = vadd.f32 1e-05, %v2583_v0 }
 0xf0d   :  { %6326 = vrsqrt.f32 %v2588_v7  ;;  %v2577_v58 = vpop.xlane.xlu0 %2576 }
 0xf0e   :  { %v2584_v16 = vmul.f32 0.03125, %v2577_v58 }
 0xf0f   :  { %v6323_v38 = vpop.eup %6322 }
 0xf10   :  { %v2596_v47 = vmul.f32 %v6323_v38, %v2556_v39  ;;  %v2589_v35 = vadd.f32 1e-05, %v2584_v16 }
 0xf12   :  { %v2607_v50 = vmul.f32 %v4767_v45, %v2596_v47  ;;  %6328 = vrsqrt.f32 %v2589_v35 }
 0xf13   :  { %v6325_v19 = vpop.eup %6324 }
 0xf14   :  { %v2580_v29 = vpop.xlane.xlu1 %2579  ;;  %v2618_v55 = vadd.f32 %v4768_v41, %v2607_v50  ;;  %v2597_v28 = vmul.f32 %v6325_v19, %v2557_v14 }
 0xf15   :  { %v2585_v8 = vmul.f32 0.03125, %v2580_v29 }
 0xf16   :  { %5543 = vmatmul.mubr.msk.f32.vlgmr.msra.gmra.mrb[76].mxu0 %vm546_vm4, %v2618_v55  ;;  %v2608_v12 = vmul.f32 %v4767_v45, %v2597_v28 }
 0xf17   :  { %v6327_v22 = vpop.eup %6326  ;;  %v2590_v17 = vadd.f32 1e-05, %v2585_v8  ;;  %5545 = vmatprep.mubr.msk.f32.mxu0 %vm6466_vm6, %v6467_v63 }
 0xf18   :  { %v2619_v43 = vadd.f32 %v4768_v41, %v2608_v12  ;;  %v2598_v6 = vmul.f32 %v6327_v22, %v2558_v42 }
 0xf19   :  { %6330 = vrsqrt.f32 %v2590_v17 }
 0xf1a   :  { %5546 = vmatmul.mubr.msk.f32.gmra.mrb[78].mxu0 %vm546_vm4, %v2619_v43  ;;  %v2609_v39 = vmul.f32 %v4767_v45, %v2598_v6 }
 0xf1b   :  { %5548 = vmatprep.mubr.msk.f32.mxu0 %vm6466_vm6, %v6467_v63 }
 0xf1c   :  { %v6329_v52 = vpop.eup %6328  ;;  %v2620_v1 = vadd.f32 %v4768_v41, %v2609_v39 }
 0xf1d   :  { %v2599_v44 = vmul.f32 %v6329_v52, %v2559_v21 }
 0xf1e   :  { %5549 = vmatmul.mubr.msk.f32.gmra.mrb[80].mxu0 %vm546_vm4, %v2620_v1 }
 0xf1f   :  { %5551 = vmatprep.mubr.msk.f32.mxu0 %vm6466_vm6, %v6467_v63  ;;  %v2610_v14 = vmul.f32 %v4767_v45, %v2599_v44 }
 0xf21   :  { %v2621_v15 = vadd.f32 %v4768_v41, %v2610_v14 }
 0xf23   :  { %v6331_v48 = vpop.eup %6330  ;;  %5552 = vmatmul.mubr.msk.f32.gmra.mrb[82].mxu0 %vm546_vm4, %v2621_v15 }
 0xf24   :  { %5554 = vmatprep.mubr.msk.f32.mxu0 %vm6466_vm6, %v6467_v63  ;;  %v2600_v54 = vmul.f32 %v6331_v48, %v2560_v53 }
 0xf26   :  { %v2611_v56 = vmul.f32 %v4767_v45, %v2600_v54 }
 0xf28   :  { %v2622_v42 = vadd.f32 %v4768_v41, %v2611_v56 }
 0xf2a   :  { %5555 = vmatmul.mubr.msk.f32.gmra.mrb[84].mxu0 %vm546_vm4, %v2622_v42 }
 0xf2b   :  { %5592 = vmatprep.mubr.msk.f32.mxu0 %vm6466_vm6, %v6467_v63 }
 0xfe9   :  { %v7656_v20 = vpop.f32.mrb[76].mxu0 }
 0xfea   :  { %v5544_v24 = vpop.f32.mrb[77].mxu0 }
 0xfed   :  { %v7658_v26 = vpop.f32.mrb[78].mxu0 }
 0xfee   :  { %v5547_v18 = vpop.f32.mrb[79].mxu0  ;;  %v7662_v31 = vpack.i.bf16 %v7658_v26, %v7656_v20 }
 0xff0   :  { %6133 = vrot.lane.b32.xlu0 %v7662_v31, %s6468_s22 }
 0xff1   :  { %v7666_v21 = vpop.f32.mrb[80].mxu0 }
 0xff2   :  { %v5550_v32 = vpop.f32.mrb[81].mxu0 }
 0xff4   :  { %6143 = vrot.lane.b32.xlu0 %v7662_v31, %s6470_s1 }
 0xff6   :  { %v7670_v36 = vpop.f32.mrb[82].mxu0 }
 0xff7   :  { %v5553_v25 = vpop.f32.mrb[83].mxu0  ;;  %v7674_v46 = vpack.i.bf16 %v7670_v36, %v7666_v21 }
 0xff9   :  { %6138 = vrot.lane.b32.xlu1 %v7674_v46, %s6468_s22 }
 0xffd   :  { %v7678_v53 = vpop.f32.mrb[84].mxu0 }
 0xffe   :  { %3052 = vrot.lane.b32.xlu0 %v7678_v53, %s6470_s1  ;;  %2746 = vrot.lane.b32.xlu1 %v7678_v53, %s6468_s22  ;;  %v5556_v51 = vpop.f32.mrb[85].mxu0  ;;  %s8455_s22 = smov 104  }
0x1002   :  { %3034 = vrot.lane.b32.xlu0 %v7656_v20, %s6472_s23  ;;  %6148 = vrot.lane.b32.xlu1 %v7674_v46, %s6470_s1  ;;  %s8456_s1 = smov 64  }
0x1006   :  { %6158 = vrot.lane.b32.xlu0 %v7674_v46, %s6471_s2  ;;  %6153 = vrot.lane.b32.xlu1 %v7662_v31, %s6471_s2 }
0x100a   :  { %3040 = vrot.lane.b32.xlu0 %v7670_v36, %s6472_s23  ;;  %3036 = vrot.lane.b32.xlu1 %v7658_v26, %s6472_s23 }
0x100e   :  { %3358 = vrot.lane.b32.xlu0 %v7678_v53, %s6471_s2  ;;  %3038 = vrot.lane.b32.xlu1 %v7666_v21, %s6472_s23  ;;  %s8457_s2 = smov 56  }
0x1012   :  { %3340 = vrot.lane.b32.xlu0 %v7656_v20, %s8453_s7  ;;  %3042 = vrot.lane.b32.xlu1 %v7678_v53, %s6472_s23 }
0x1016   :  { %6168 = vrot.lane.b32.xlu0 %v7674_v46, %s8454_s8  ;;  %6163 = vrot.lane.b32.xlu1 %v7662_v31, %s8454_s8 }
0x101a   :  { %3346 = vrot.lane.b32.xlu0 %v7670_v36, %s8453_s7  ;;  %3342 = vrot.lane.b32.xlu1 %v7658_v26, %s8453_s7 }
0x101e   :  { %3664 = vrot.lane.b32.xlu0 %v7678_v53, %s8454_s8  ;;  %3344 = vrot.lane.b32.xlu1 %v7666_v21, %s8453_s7 }
0x1022   :  { %3648 = vrot.lane.b32.xlu0 %v7658_v26, %s8455_s22  ;;  %3348 = vrot.lane.b32.xlu1 %v7678_v53, %s8453_s7  ;;  %s8459_s7 = smov 40  }
0x1026   :  { %3652 = vrot.lane.b32.xlu0 %v7670_v36, %s8455_s22  ;;  %3646 = vrot.lane.b32.xlu1 %v7656_v20, %s8455_s22 }
0x102a   :  { %6173 = vrot.lane.b32.xlu0 %v7662_v31, %s8456_s1  ;;  %3650 = vrot.lane.b32.xlu1 %v7666_v21, %s8455_s22 }
0x102e   :  { %6188 = vrot.lane.b32.xlu0 %v7674_v46, %s8457_s2  ;;  %3654 = vrot.lane.b32.xlu1 %v7678_v53, %s8455_s22 }
0x1032   :  { %2921 = vrot.lane.b32.xlu0 %v7678_v53, %s8456_s1  ;;  %6178 = vrot.lane.b32.xlu1 %v7674_v46, %s8456_s1 }
0x1036   :  { %3227 = vrot.lane.b32.xlu0 %v7678_v53, %s8457_s2  ;;  %6183 = vrot.lane.b32.xlu1 %v7662_v31, %s8457_s2 }
0x1062   :  { %v6134_v59 = vpop.permute.xlu0 %6133 }
0x1063   :  { %v6136_v27 = vunpack.i.h.bf16 %v6134_v59  ;;  %v6135_v4 = vunpack.i.l.bf16 %v6134_v59 }
0x1065   :  { %v5948_v61 = vpack.c.bf16 %v6136_v27, %v6135_v4 }
0x1066   :  { %v6144_v2 = vpop.permute.xlu0 %6143 }
0x1067   :  { %5950 = vmatpush3.bf16.xpose.msk.msra.mxu1 %vm6884_vm8, %v5948_v61  ;;  %v6146_v34 = vunpack.i.h.bf16 %v6144_v2  ;;  %v6145_v0 = vunpack.i.l.bf16 %v6144_v2 }
0x1068   :  { %5951 = vmatprep.subr.bf16.mxu1 %v6465_v62 }
0x1069   :  { %v5962_v16 = vpack.c.bf16 %v6146_v34, %v6145_v0  ;;  %v7859_v34 = vld [vmem:[%s8452_s24 + $0x8] sm:$0xff] }
0x106b   :  { %v6139_v40 = vpop.permute.xlu1 %6138 }
0x106c   :  { %v6141_v3 = vunpack.i.h.bf16 %v6139_v40  ;;  %v6140_v9 = vunpack.i.l.bf16 %v6139_v40 }
0x106e   :  { %v5952_v11 = vpack.c.bf16 %v6141_v3, %v6140_v9 }
0x1070   :  { %v2747_v30 = vpop.permute.xlu1 %2746  ;;  %v3053_v13 = vpop.permute.xlu0 %3052  ;;  %5954 = vmatpush3.bf16.xpose.msk.msra.mxu1 %vm6884_vm8, %v5952_v11  ;;  %v7849_v11 = vld [vmem:[%s8452_s24] sm:$0xff] }
0x1071   :  { %5565 = vmatprep.subr.mxu1 %v6467_v63 }
0x1074   :  { %v6149_v5 = vpop.permute.xlu1 %6148  ;;  %v3035_v23 = vpop.permute.xlu0 %3034 }
0x1075   :  { %v6151_v47 = vunpack.i.h.bf16 %v6149_v5  ;;  %v6150_v35 = vunpack.i.l.bf16 %v6149_v5 }
0x1077   :  { %v5966_v19 = vpack.c.bf16 %v6151_v47, %v6150_v35 }
0x1078   :  { %v6154_v7 = vpop.permute.xlu1 %6153  ;;  %v6159_v58 = vpop.permute.xlu0 %6158  ;;  %5566 = vmatpush3.xpose.msk.msra.mxu1 %vm760_vm7, %v2747_v30 }
0x1079   :  { %5961 = vmatprep.subr.bf16.mxu1 %v6465_v62  ;;  %v6156_v12 = vunpack.i.h.bf16 %v6154_v7  ;;  %v6155_v22 = vunpack.i.l.bf16 %v6154_v7  ;;  %v6161_v1 = vunpack.i.h.bf16 %v6159_v58  ;;  %v6160_v44 = vunpack.i.l.bf16 %v6159_v58 }
0x107b   :  { %5568 = vmatmul.mubr.msk.f32.vlgmr.msra.gmra.mrb[80].mxu1 %vm760_vm7, %v7656_v20  ;;  %v5976_v6 = vpack.c.bf16 %v6156_v12, %v6155_v22  ;;  %v5980_v48 = vpack.c.bf16 %v6161_v1, %v6160_v44 }
0x107c   :  { %v3037_v38 = vpop.permute.xlu1 %3036  ;;  %v3041_v45 = vpop.permute.xlu0 %3040  ;;  %5964 = vmatpush3.bf16.xpose.msk.msra.mxu1 %vm6884_vm8, %v5962_v16  ;;  %5570 = vmatprep.mubr.msk.f32.mxu1 %vm6466_vm6, %v6467_v63 }
0x107d   :  { %5965 = vmatprep.subr.bf16.mxu1 %v6465_v62 }
0x107f   :  { %5571 = vmatmul.mubr.msk.f32.gmra.mrb[82].mxu1 %vm760_vm7, %v7658_v26 }
0x1080   :  { %v3039_v41 = vpop.permute.xlu1 %3038  ;;  %v3359_v50 = vpop.permute.xlu0 %3358  ;;  %5573 = vmatprep.mubr.msk.f32.mxu1 %vm6466_vm6, %v6467_v63 }
0x1083   :  { %5574 = vmatmul.mubr.msk.f32.gmra.mrb[84].mxu1 %vm760_vm7, %v7666_v21 }
0x1084   :  { %v3043_v29 = vpop.permute.xlu1 %3042  ;;  %v3341_v55 = vpop.permute.xlu0 %3340  ;;  %5968 = vmatpush3.bf16.xpose.msk.msra.mxu1 %vm6884_vm8, %v5966_v19  ;;  %5576 = vmatprep.mubr.msk.f32.mxu1 %vm6466_vm6, %v6467_v63 }
0x1085   :  { %5615 = vmatprep.subr.mxu1 %v6467_v63 }
0x1087   :  { %5577 = vmatmul.mubr.msk.f32.gmra.mrb[86].mxu1 %vm760_vm7, %v7670_v36 }
0x1088   :  { %v6164_v28 = vpop.permute.xlu1 %6163  ;;  %v6169_v8 = vpop.permute.xlu0 %6168  ;;  %5579 = vmatprep.mubr.msk.f32.mxu1 %vm6466_vm6, %v6467_v63 }
0x1089   :  { %v6166_v18 = vunpack.i.h.bf16 %v6164_v28  ;;  %v6165_v21 = vunpack.i.l.bf16 %v6164_v28  ;;  %v6171_v4 = vunpack.i.h.bf16 %v6169_v8  ;;  %v6170_v61 = vunpack.i.l.bf16 %v6169_v8  ;;  %v7889_v8 = vld [vmem:[%s8452_s24 + $0x20] sm:$0x3] }
0x108b   :  { %5580 = vmatmul.mubr.msk.f32.gmra.mrb[88].mxu1 %vm760_vm7, %v7678_v53  ;;  %v5990_v25 = vpack.c.bf16 %v6166_v18, %v6165_v21  ;;  %v5994_v3 = vpack.c.bf16 %v6171_v4, %v6170_v61 }
0x108c   :  { %v3343_v17 = vpop.permute.xlu1 %3342  ;;  %v7772_v43 = vpop.permute.xlu0 %3346  ;;  %5616 = vmatpush3.xpose.msk.msra.mxu1 %vm760_vm7, %v3053_v13  ;;  %5617 = vmatprep.mubr.msk.f32.mxu1 %vm6466_vm6, %v6467_v63 }
0x108d   :  { %5975 = vmatprep.subr.bf16.mxu1 %v6465_v62 }
0x108f   :  { %5618 = vmatmul.mubr.msk.f32.vlgmr.msra.gmra.mrb[90].mxu1 %vm760_vm7, %v3035_v23 }
0x1090   :  { %v3345_v39 = vpop.permute.xlu1 %3344  ;;  %v3665_v52 = vpop.permute.xlu0 %3664  ;;  %5978 = vmatpush3.bf16.xpose.msk.msra.mxu1 %vm6884_vm8, %v5976_v6  ;;  %5620 = vmatprep.mubr.msk.f32.mxu1 %vm6466_vm6, %v6467_v63 }
0x1091   :  { %5979 = vmatprep.subr.bf16.mxu1 %v6465_v62 }
0x1093   :  { %5621 = vmatmul.mubr.msk.f32.gmra.mrb[92].mxu1 %vm760_vm7, %v3037_v38  ;;  %v7869_v38 = vld [vmem:[%s8452_s24 + $0x10] sm:$0xff] }
0x1094   :  { %v3349_v14 = vpop.permute.xlu1 %3348  ;;  %v3649_v15 = vpop.permute.xlu0 %3648  ;;  %5623 = vmatprep.mubr.msk.f32.mxu1 %vm6466_vm6, %v6467_v63 }
0x1097   :  { %5624 = vmatmul.mubr.msk.f32.gmra.mrb[94].mxu1 %vm760_vm7, %v3039_v41 }
0x1098   :  { %v3647_v54 = vpop.permute.xlu1 %3646  ;;  %v3653_v56 = vpop.permute.xlu0 %3652  ;;  %5982 = vmatpush3.bf16.xpose.msk.msra.mxu1 %vm6884_vm8, %v5980_v48  ;;  %5626 = vmatprep.mubr.msk.f32.mxu1 %vm6466_vm6, %v6467_v63 }
0x1099   :  { %5665 = vmatprep.subr.mxu1 %v6467_v63 }
0x109b   :  { %5627 = vmatmul.mubr.msk.f32.gmra.mrb[96].mxu1 %vm760_vm7, %v3041_v45 }
0x109c   :  { %v3651_v42 = vpop.permute.xlu1 %3650  ;;  %v6174_v20 = vpop.permute.xlu0 %6173  ;;  %5629 = vmatprep.mubr.msk.f32.mxu1 %vm6466_vm6, %v6467_v63 }
0x109d   :  { %v6176_v24 = vunpack.i.h.bf16 %v6174_v20  ;;  %v6175_v26 = vunpack.i.l.bf16 %v6174_v20 }
0x109f   :  { %v5956_v32 = vpack.c.bf16 %v6176_v24, %v6175_v26  ;;  %5630 = vmatmul.mubr.msk.f32.gmra.mrb[98].mxu1 %vm760_vm7, %v3043_v29 }
0x10a0   :  { %v3655_v36 = vpop.permute.xlu1 %3654  ;;  %5666 = vmatpush3.xpose.msk.msra.mxu1 %vm760_vm7, %v3359_v50  ;;  %5667 = vmatprep.mubr.msk.f32.mxu1 %vm6466_vm6, %v6467_v63  ;;  %v7808_v40 = vpop.permute.xlu0 %6188  ;;  %v7879_v50 = vld [vmem:[%s8452_s24 + $0x18] sm:$0xff]  ;;  %s8458_s24 = smov 48  }
0x10a1   :  { %5957 = vmatpush3.bf16.msra.mxu0 %v5956_v32  ;;  %5989 = vmatprep.subr.bf16.mxu1 %v6465_v62 }
0x10a2   :  { %5958 = vmatprep.subr.bf16.mxu0 %v6465_v62 }
0x10a3   :  { %5668 = vmatmul.mubr.msk.f32.vlgmr.msra.gmra.mrb[100].mxu1 %vm760_vm7, %v3341_v55 }
0x10a4   :  { %v6179_v51 = vpop.permute.xlu1 %6178  ;;  %5992 = vmatpush3.bf16.xpose.msk.msra.mxu1 %vm6884_vm8, %v5990_v25  ;;  %5670 = vmatprep.mubr.msk.f32.mxu1 %vm6466_vm6, %v6467_v63  ;;  %v2922_v9 = vpop.permute.xlu0 %2921 }
0x10a5   :  { %v6181_v59 = vunpack.i.h.bf16 %v6179_v51  ;;  %v6180_v27 = vunpack.i.l.bf16 %v6179_v51  ;;  %5993 = vmatprep.subr.bf16.mxu1 %v6465_v62 }
0x10a7   :  { %v5959_v2 = vpack.c.bf16 %v6181_v59, %v6180_v27  ;;  %5671 = vmatmul.mubr.msk.f32.gmra.mrb[102].mxu1 %vm760_vm7, %v3343_v17 }
0x10a8   :  { %5673 = vmatprep.mubr.msk.f32.mxu1 %vm6466_vm6, %v6467_v63 }
0x10a9   :  { %5960 = vmatpush3.bf16.msra.mxu0 %v5959_v2 }
0x10aa   :  { %5590 = vmatprep.subr.mxu0 %v6467_v63 }
0x10ab   :  { %5674 = vmatmul.mubr.msk.f32.gmra.mrb[104].mxu1 %vm760_vm7, %v3345_v39 }
0x10ac   :  { %5996 = vmatpush3.bf16.xpose.msk.msra.mxu1 %vm6884_vm8, %v5994_v3  ;;  %5676 = vmatprep.mubr.msk.f32.mxu1 %vm6466_vm6, %v6467_v63 }
0x10ad   :  { %5591 = vmatpush3.msk.msra.mxu0 %vm957_vm11, %v2922_v9  ;;  %5715 = vmatprep.subr.mxu1 %v6467_v63 }
0x10ae   :  { %5969 = vmatprep.subr.bf16.mxu0 %v6465_v62 }
0x10af   :  { %5677 = vmatmul.mubr.msk.f32.gmra.mrb[106].mxu1 %vm760_vm7, %v7772_v43 }
0x10b0   :  { %5679 = vmatprep.mubr.msk.f32.mxu1 %vm6466_vm6, %v6467_v63 }
0x10b3   :  { %5680 = vmatmul.mubr.msk.f32.gmra.mrb[108].mxu1 %vm760_vm7, %v3349_v14 }
0x10b4   :  { %5716 = vmatpush3.xpose.msk.msra.mxu1 %vm760_vm7, %v3665_v52  ;;  %5717 = vmatprep.mubr.msk.f32.mxu1 %vm6466_vm6, %v6467_v63 }
0x10b5   :  { %6003 = vmatprep.subr.bf16.mxu1 %v6465_v62 }
0x10b7   :  { %5718 = vmatmul.mubr.msk.f32.vlgmr.msra.gmra.mrb[110].mxu1 %vm760_vm7, %v3647_v54 }
0x10b8   :  { %5720 = vmatprep.mubr.msk.f32.mxu1 %vm6466_vm6, %v6467_v63 }
0x10bb   :  { %5721 = vmatmul.mubr.msk.f32.gmra.mrb[112].mxu1 %vm760_vm7, %v3649_v15 }
0x10bc   :  { %5723 = vmatprep.mubr.msk.f32.mxu1 %vm6466_vm6, %v6467_v63 }
0x10bf   :  { %5724 = vmatmul.mubr.msk.f32.gmra.mrb[114].mxu1 %vm760_vm7, %v3651_v42 }
0x10c0   :  { %5726 = vmatprep.mubr.msk.f32.mxu1 %vm6466_vm6, %v6467_v63 }
0x10c3   :  { %5727 = vmatmul.mubr.msk.f32.gmra.mrb[116].mxu1 %vm760_vm7, %v3653_v56 }
0x10c4   :  { %5729 = vmatprep.mubr.msk.f32.mxu1 %vm6466_vm6, %v6467_v63 }
0x10c7   :  { %5730 = vmatmul.mubr.msk.f32.gmra.mrb[118].mxu1 %vm760_vm7, %v3655_v36 }
0x10c8   :  { %5765 = vmatprep.mubr.msk.f32.mxu1 %vm6466_vm6, %v6467_v63 }
0x114e   :  { %v2834_v57 = vpop.f32.mrb[80].mxu1 }
0x114f   :  { %v7852_v30 = vadd.f32 %v7849_v11, %v2834_v57  ;;  %v5569_v13 = vpop.f32.mrb[81].mxu1 }
0x1151   :  { %v2858_v5 = vsel %vm871_vm9, %v7852_v30, -inf }
0x1152   :  { %2859 = vmax.xlane.f32.xlu0 %v2858_v5  ;;  %v2839_v23 = vpop.f32.mrb[82].mxu1 }
0x1153   :  { %v7862_v0 = vadd.f32 %v7859_v34, %v2839_v23  ;;  %v5572_v7 = vpop.f32.mrb[83].mxu1 }
0x1155   :  { %v2861_v58 = vsel %vm871_vm9, %v7862_v0, -inf }
0x1156   :  { %2862 = vmax.xlane.f32.xlu1 %v2861_v58  ;;  %v2844_v16 = vpop.f32.mrb[84].mxu1 }
0x1157   :  { %v7872_v45 = vadd.f32 %v7869_v38, %v2844_v16  ;;  %v5575_v47 = vpop.f32.mrb[85].mxu1 }
0x1159   :  { %v2864_v35 = vsel %vm871_vm9, %v7872_v45, -inf }
0x115a   :  { %2865 = vmax.xlane.f32.xlu0 %v2864_v35  ;;  %v2849_v41 = vpop.f32.mrb[86].mxu1 }
0x115b   :  { %v7882_v19 = vadd.f32 %v7879_v50, %v2849_v41  ;;  %v5578_v29 = vpop.f32.mrb[87].mxu1 }
0x115d   :  { %v2867_v55 = vsel %vm871_vm9, %v7882_v19, -inf }
0x115e   :  { %2868 = vmax.xlane.f32.xlu0 %v2867_v55  ;;  %v2854_v28 = vpop.f32.mrb[88].mxu1 }
0x115f   :  { %v7892_v12 = vadd.f32 %v7889_v8, %v2854_v28  ;;  %v5581_v22 = vpop.f32.mrb[89].mxu1 }
0x1161   :  { %v2870_v17 = vsel %vm884_vm10, %v7892_v12, -inf }
0x1162   :  { %2871 = vmax.xlane.f32.xlu1 %v2870_v17  ;;  %v3140_v43 = vpop.f32.mrb[90].mxu1 }
0x1163   :  { %v7897_v6 = vadd.f32 %v7849_v11, %v3140_v43  ;;  %v5619_v39 = vpop.f32.mrb[91].mxu1 }
0x1165   :  { %v3164_v52 = vsel %vm871_vm9, %v7897_v6, -inf }
0x1166   :  { %3165 = vmax.xlane.f32.xlu0 %v3164_v52  ;;  %v3145_v1 = vpop.f32.mrb[92].mxu1 }
0x1167   :  { %v7902_v44 = vadd.f32 %v7859_v34, %v3145_v1  ;;  %v5622_v14 = vpop.f32.mrb[93].mxu1 }
0x1169   :  { %v3167_v15 = vsel %vm871_vm9, %v7902_v44, -inf }
0x116a   :  { %3168 = vmax.xlane.f32.xlu1 %v3167_v15  ;;  %v3150_v48 = vpop.f32.mrb[94].mxu1 }
0x116b   :  { %v7907_v54 = vadd.f32 %v7869_v38, %v3150_v48  ;;  %v5625_v56 = vpop.f32.mrb[95].mxu1 }
0x116d   :  { %v3170_v42 = vsel %vm871_vm9, %v7907_v54, -inf }
0x116e   :  { %3171 = vmax.xlane.f32.xlu0 %v3170_v42  ;;  %v3155_v20 = vpop.f32.mrb[96].mxu1 }
0x116f   :  { %v7912_v24 = vadd.f32 %v7879_v50, %v3155_v20  ;;  %v5628_v26 = vpop.f32.mrb[97].mxu1 }
0x1171   :  { %v3173_v18 = vsel %vm871_vm9, %v7912_v24, -inf }
0x1172   :  { %3174 = vmax.xlane.f32.xlu1 %v3173_v18  ;;  %v3160_v21 = vpop.f32.mrb[98].mxu1 }
0x1173   :  { %v7917_v32 = vadd.f32 %v7889_v8, %v3160_v21  ;;  %v5631_v36 = vpop.f32.mrb[99].mxu1 }
0x1175   :  { %v3176_v25 = vsel %vm884_vm10, %v7917_v32, -inf }
0x1176   :  { %3177 = vmax.xlane.f32.xlu0 %v3176_v25  ;;  %v3446_v51 = vpop.f32.mrb[100].mxu1  ;;  %v7977_v25 = vpop.permute.xlu1 %6183 }
0x1177   :  { %v7922_v59 = vadd.f32 %v7849_v11, %v3446_v51  ;;  %v5669_v27 = vpop.f32.mrb[101].mxu1 }
0x1179   :  { %v3470_v4 = vsel %vm871_vm9, %v7922_v59, -inf }
0x117a   :  { %3471 = vmax.xlane.f32.xlu1 %v3470_v4  ;;  %v3451_v61 = vpop.f32.mrb[102].mxu1 }
0x117b   :  { %v7927_v2 = vadd.f32 %v7859_v34, %v3451_v61  ;;  %v5672_v3 = vpop.f32.mrb[103].mxu1 }
0x117d   :  { %v3473_v9 = vsel %vm871_vm9, %v7927_v2, -inf }
0x117e   :  { %3474 = vmax.xlane.f32.xlu0 %v3473_v9  ;;  %v3456_v57 = vpop.f32.mrb[104].mxu1 }
0x117f   :  { %v7932_v13 = vadd.f32 %v7869_v38, %v3456_v57  ;;  %v5675_v5 = vpop.f32.mrb[105].mxu1 }
0x1181   :  { %v3476_v23 = vsel %vm871_vm9, %v7932_v13, -inf }
0x1182   :  { %3477 = vmax.xlane.f32.xlu1 %v3476_v23  ;;  %v3461_v7 = vpop.f32.mrb[106].mxu1 }
0x1183   :  { %v7937_v58 = vadd.f32 %v7879_v50, %v3461_v7  ;;  %v5678_v16 = vpop.f32.mrb[107].mxu1 }
0x1185   :  { %v3479_v47 = vsel %vm871_vm9, %v7937_v58, -inf }
0x1186   :  { %3480 = vmax.xlane.f32.xlu0 %v3479_v47  ;;  %v3466_v35 = vpop.f32.mrb[108].mxu1 }
0x1187   :  { %v7942_v41 = vadd.f32 %v7889_v8, %v3466_v35  ;;  %v5681_v29 = vpop.f32.mrb[109].mxu1 }
0x1189   :  { %v3482_v55 = vsel %vm884_vm10, %v7942_v41, -inf }
0x118a   :  { %3483 = vmax.xlane.f32.xlu1 %v3482_v55  ;;  %v3752_v28 = vpop.f32.mrb[110].mxu1 }
0x118b   :  { %v7947_v22 = vadd.f32 %v7849_v11, %v3752_v28  ;;  %v5719_v17 = vpop.f32.mrb[111].mxu1 }
0x118d   :  { %v3776_v43 = vsel %vm871_vm9, %v7947_v22, -inf }
0x118e   :  { %3777 = vmax.xlane.f32.xlu0 %v3776_v43  ;;  %v3757_v39 = vpop.f32.mrb[112].mxu1 }
0x118f   :  { %v7952_v52 = vadd.f32 %v7859_v34, %v3757_v39  ;;  %v5722_v1 = vpop.f32.mrb[113].mxu1 }
0x1191   :  { %v3779_v14 = vsel %vm871_vm9, %v7952_v52, -inf }
0x1192   :  { %3780 = vmax.xlane.f32.xlu1 %v3779_v14  ;;  %v3762_v15 = vpop.f32.mrb[114].mxu1 }
0x1193   :  { %v7957_v48 = vadd.f32 %v7869_v38, %v3762_v15  ;;  %v5725_v11 = vpop.f32.mrb[115].mxu1 }
0x1195   :  { %v3782_v56 = vsel %vm871_vm9, %v7957_v48, -inf }
0x1196   :  { %3783 = vmax.xlane.f32.xlu0 %v3782_v56  ;;  %v3767_v42 = vpop.f32.mrb[116].mxu1 }
0x1197   :  { %v7962_v20 = vadd.f32 %v7879_v50, %v3767_v42  ;;  %v5728_v34 = vpop.f32.mrb[117].mxu1  ;;  %v7975_v50 = vpop.permute.xlu0 %3227 }
0x1199   :  { %v3785_v26 = vsel %vm871_vm9, %v7962_v20, -inf }
0x119a   :  { %3786 = vmax.xlane.f32.xlu1 %v3785_v26  ;;  %v3772_v18 = vpop.f32.mrb[118].mxu1 }
0x119b   :  { %v7967_v21 = vadd.f32 %v7889_v8, %v3772_v18  ;;  %v5731_v38 = vpop.f32.mrb[119].mxu1 }
0x119d   :  { %v3788_v36 = vsel %vm884_vm10, %v7967_v21, -inf }
0x119e   :  { %3789 = vmax.xlane.f32.xlu0 %v3788_v36 }
0x11ab   :  { %6198 = vrot.lane.b32.xlu1 %v7674_v46, %s8458_s24 }
0x11b4   :  { %6193 = vrot.lane.b32.xlu0 %v7662_v31, %s8458_s24 }
0x11df   :  { %v2860_v51 = vpop.xlane.xlu0 %2859 }
0x11e0   :  { %v2873_v27 = vsub.f32 %v7852_v30, %v2860_v51 }
0x11e2   :  { %v2878_v8 = vmul.f32 1.442695, %v2873_v27 }
0x11e3   :  { %v2863_v4 = vpop.xlane.xlu1 %2862 }
0x11e4   :  { %6332 = vpow2.f32 %v2878_v8  ;;  %v2874_v61 = vsub.f32 %v7862_v0, %v2863_v4 }
0x11e6   :  { %v2880_v3 = vmul.f32 1.442695, %v2874_v61 }
0x11e7   :  { %v2866_v9 = vpop.xlane.xlu0 %2865 }
0x11e8   :  { %6334 = vpow2.f32 %v2880_v3  ;;  %v2875_v57 = vsub.f32 %v7872_v45, %v2866_v9 }
0x11ea   :  { %v2882_v5 = vmul.f32 1.442695, %v2875_v57 }
0x11eb   :  { %v2869_v23 = vpop.xlane.xlu0 %2868 }
0x11ec   :  { %6336 = vpow2.f32 %v2882_v5  ;;  %v2876_v7 = vsub.f32 %v7882_v19, %v2869_v23 }
0x11ee   :  { %v7983_v16 = vpop.eup %6332  ;;  %v2884_v47 = vmul.f32 1.442695, %v2876_v7 }
0x11ef   :  { %v2872_v35 = vpop.xlane.xlu1 %2871  ;;  %v2888_v30 = vsel %vm871_vm9, %v7983_v16, 0.0 }
0x11f0   :  { %6338 = vpow2.f32 %v2884_v47  ;;  %v2877_v0 = vsub.f32 %v7892_v12, %v2872_v35  ;;  %2889 = vadd.xlane.f32.xlu1 %v2888_v30 }
0x11f2   :  { %v7988_v29 = vpop.eup %6334  ;;  %v2886_v55 = vmul.f32 1.442695, %v2877_v0 }
0x11f3   :  { %v3166_v45 = vpop.xlane.xlu0 %3165  ;;  %v2891_v28 = vsel %vm871_vm9, %v7988_v29, 0.0 }
0x11f4   :  { %6340 = vpow2.f32 %v2886_v55  ;;  %v3179_v19 = vsub.f32 %v7897_v6, %v3166_v45  ;;  %2892 = vadd.xlane.f32.xlu0 %v2891_v28 }
0x11f6   :  { %v7993_v17 = vpop.eup %6336  ;;  %v3184_v43 = vmul.f32 1.442695, %v3179_v19 }
0x11f7   :  { %v3169_v39 = vpop.xlane.xlu1 %3168  ;;  %v2894_v1 = vsel %vm871_vm9, %v7993_v17, 0.0 }
0x11f8   :  { %6342 = vpow2.f32 %v3184_v43  ;;  %v3180_v12 = vsub.f32 %v7902_v44, %v3169_v39  ;;  %2895 = vadd.xlane.f32.xlu1 %v2894_v1 }
0x11fa   :  { %v7998_v14 = vpop.eup %6338  ;;  %v3186_v15 = vmul.f32 1.442695, %v3180_v12 }
0x11fb   :  { %v3172_v11 = vpop.xlane.xlu0 %3171  ;;  %v2897_v56 = vsel %vm871_vm9, %v7998_v14, 0.0 }
0x11fc   :  { %6344 = vpow2.f32 %v3186_v15  ;;  %v3181_v6 = vsub.f32 %v7907_v54, %v3172_v11  ;;  %2898 = vadd.xlane.f32.xlu0 %v2897_v56 }
0x11fe   :  { %v8003_v42 = vpop.eup %6340  ;;  %v3188_v34 = vmul.f32 1.442695, %v3181_v6 }
0x11ff   :  { %v3175_v26 = vpop.xlane.xlu1 %3174  ;;  %v2900_v18 = vsel %vm884_vm10, %v8003_v42, 0.0 }
0x1200   :  { %6346 = vpow2.f32 %v3188_v34  ;;  %v3182_v44 = vsub.f32 %v7912_v24, %v3175_v26  ;;  %2901 = vadd.xlane.f32.xlu1 %v2900_v18 }
0x1202   :  { %v8008_v38 = vpop.eup %6342  ;;  %v3190_v36 = vmul.f32 1.442695, %v3182_v44 }
0x1203   :  { %v3178_v51 = vpop.xlane.xlu0 %3177  ;;  %v3194_v27 = vsel %vm871_vm9, %v8008_v38, 0.0 }
0x1204   :  { %6348 = vpow2.f32 %v3190_v36  ;;  %v3183_v54 = vsub.f32 %v7917_v32, %v3178_v51  ;;  %3195 = vadd.xlane.f32.xlu1 %v3194_v27 }
0x1206   :  { %v8013_v8 = vpop.eup %6344  ;;  %v3192_v4 = vmul.f32 1.442695, %v3183_v54 }
0x1207   :  { %v3472_v61 = vpop.xlane.xlu1 %3471  ;;  %v3197_v3 = vsel %vm871_vm9, %v8013_v8, 0.0 }
0x1208   :  { %6350 = vpow2.f32 %v3192_v4  ;;  %v3485_v24 = vsub.f32 %v7922_v59, %v3472_v61  ;;  %3198 = vadd.xlane.f32.xlu0 %v3197_v3 }
0x120a   :  { %v8018_v9 = vpop.eup %6346  ;;  %v3490_v57 = vmul.f32 1.442695, %v3485_v24 }
0x120b   :  { %v3475_v5 = vpop.xlane.xlu0 %3474  ;;  %v3200_v23 = vsel %vm871_vm9, %v8018_v9, 0.0 }
0x120c   :  { %6352 = vpow2.f32 %v3490_v57  ;;  %v3486_v32 = vsub.f32 %v7927_v2, %v3475_v5  ;;  %3201 = vadd.xlane.f32.xlu1 %v3200_v23 }
0x120e   :  { %v8023_v7 = vpop.eup %6348  ;;  %v3492_v47 = vmul.f32 1.442695, %v3486_v32 }
0x120f   :  { %v3478_v35 = vpop.xlane.xlu1 %3477  ;;  %v3203_v30 = vsel %vm871_vm9, %v8023_v7, 0.0 }
0x1210   :  { %6354 = vpow2.f32 %v3492_v47  ;;  %v3487_v59 = vsub.f32 %v7932_v13, %v3478_v35  ;;  %3204 = vadd.xlane.f32.xlu1 %v3203_v30 }
0x1212   :  { %v8028_v0 = vpop.eup %6350  ;;  %v3494_v55 = vmul.f32 1.442695, %v3487_v59 }
0x1213   :  { %v3481_v45 = vpop.xlane.xlu0 %3480  ;;  %v3206_v28 = vsel %vm884_vm10, %v8028_v0, 0.0 }
0x1214   :  { %6356 = vpow2.f32 %v3494_v55  ;;  %v3488_v2 = vsub.f32 %v7937_v58, %v3481_v45  ;;  %3207 = vadd.xlane.f32.xlu1 %v3206_v28 }
0x1216   :  { %v8033_v19 = vpop.eup %6352  ;;  %v3496_v43 = vmul.f32 1.442695, %v3488_v2 }
0x1217   :  { %v3484_v39 = vpop.xlane.xlu1 %3483  ;;  %v3500_v1 = vsel %vm871_vm9, %v8033_v19, 0.0 }
0x1218   :  { %6358 = vpow2.f32 %v3496_v43  ;;  %v3489_v13 = vsub.f32 %v7942_v41, %v3484_v39  ;;  %3501 = vadd.xlane.f32.xlu0 %v3500_v1  ;;  %v6186_v39 = vunpack.i.h.bf16 %v7977_v25  ;;  %v6185_v1 = vunpack.i.l.bf16 %v7977_v25 }
0x121a   :  { %v8038_v12 = vpop.eup %6354  ;;  %v3498_v15 = vmul.f32 1.442695, %v3489_v13 }
0x121b   :  { %v3778_v11 = vpop.xlane.xlu0 %3777  ;;  %v3503_v56 = vsel %vm871_vm9, %v8038_v12, 0.0 }
0x121c   :  { %6360 = vpow2.f32 %v3498_v15  ;;  %v3791_v58 = vsub.f32 %v7947_v22, %v3778_v11  ;;  %3504 = vadd.xlane.f32.xlu1 %v3503_v56  ;;  %v6191_v56 = vunpack.i.h.bf16 %v7808_v40 }
0x121e   :  { %v8043_v6 = vpop.eup %6356  ;;  %v3796_v34 = vmul.f32 1.442695, %v3791_v58  ;;  %v6190_v58 = vunpack.i.l.bf16 %v7808_v40 }
0x121f   :  { %v3781_v26 = vpop.xlane.xlu1 %3780  ;;  %v3506_v18 = vsel %vm871_vm9, %v8043_v6, 0.0 }
0x1220   :  { %6362 = vpow2.f32 %v3796_v34  ;;  %v3792_v41 = vsub.f32 %v7952_v52, %v3781_v26  ;;  %3507 = vadd.xlane.f32.xlu1 %v3506_v18  ;;  %v5970_v34 = vpack.c.bf16 %v6186_v39, %v6185_v1 }
0x1222   :  { %v8048_v44 = vpop.eup %6358  ;;  %v3798_v36 = vmul.f32 1.442695, %v3792_v41 }
0x1223   :  { %v3784_v51 = vpop.xlane.xlu0 %3783  ;;  %v3509_v27 = vsel %vm871_vm9, %v8048_v44, 0.0 }
0x1224   :  { %6364 = vpow2.f32 %v3798_v36  ;;  %v3793_v22 = vsub.f32 %v7957_v48, %v3784_v51  ;;  %3510 = vadd.xlane.f32.xlu1 %v3509_v27 }
0x1226   :  { %v8053_v54 = vpop.eup %6360  ;;  %v3800_v4 = vmul.f32 1.442695, %v3793_v22 }
0x1227   :  { %v3512_v61 = vsel %vm884_vm10, %v8053_v54, 0.0  ;;  %v3787_v23 = vpop.xlane.xlu1 %3786 }
0x1228   :  { %6366 = vpow2.f32 %v3800_v4  ;;  %3513 = vadd.xlane.f32.xlu1 %v3512_v61  ;;  %v3794_v32 = vsub.f32 %v7962_v20, %v3787_v23 }
0x122a   :  { %v8057_v52 = vpop.eup %6362  ;;  %v3802_v47 = vmul.f32 1.442695, %v3794_v32 }
0x122b   :  { %v3806_v3 = vsel %vm871_vm9, %v8057_v52, 0.0  ;;  %v3790_v35 = vpop.xlane.xlu0 %3789  ;;  %v8085_v20 = vpop.permute.xlu1 %6198 }
0x122c   :  { %3807 = vadd.xlane.f32.xlu0 %v3806_v3  ;;  %6368 = vpow2.f32 %v3802_v47  ;;  %v3795_v30 = vsub.f32 %v7967_v21, %v3790_v35 }
0x122e   :  { %v8061_v24 = vpop.eup %6364  ;;  %v3804_v59 = vmul.f32 1.442695, %v3795_v30 }
0x122f   :  { %v3809_v48 = vsel %vm871_vm9, %v8061_v24, 0.0  ;;  %v6194_v28 = vpop.permute.xlu0 %6193 }
0x1230   :  { %3810 = vadd.xlane.f32.xlu1 %v3809_v48  ;;  %6370 = vpow2.f32 %v3804_v59  ;;  %v6196_v4 = vunpack.i.h.bf16 %v6194_v28  ;;  %v6201_v48 = vunpack.i.h.bf16 %v8085_v20 }
0x1232   :  { %v8065_v57 = vpop.eup %6366 }
0x1233   :  { %v3812_v5 = vsel %vm871_vm9, %v8065_v57, 0.0 }
0x1234   :  { %3813 = vadd.xlane.f32.xlu1 %v3812_v5  ;;  %v6200_v5 = vunpack.i.l.bf16 %v8085_v20 }
0x1236   :  { %v8077_v55 = vpop.eup %6368 }
0x1237   :  { %v3815_v45 = vsel %vm871_vm9, %v8077_v55, 0.0 }
0x1242   :  { %3533 = vrot.lane.b32.xlu0 %v7678_v53, %s8458_s24 }
0x1245   :  { %6203 = vrot.lane.b32.xlu1 %v7662_v31, %s8459_s7  ;;  %v8081_v31 = vpop.eup %6370 }
0x1249   :  { %6208 = vrot.lane.b32.xlu1 %v7674_v46, %s8459_s7  ;;  %v3818_v46 = vsel %vm884_vm10, %v8081_v31, 0.0 }
0x1261   :  { %3816 = vadd.xlane.f32.xlu0 %v3815_v45 }
0x126d   :  { %3819 = vadd.xlane.f32.xlu1 %v3818_v46 }
0x127d   :  { %v2890_v2 = vpop.xlane.xlu1 %2889 }
0x127e   :  { %6372 = vrcp.f32 %v2890_v2  ;;  %3839 = vrot.lane.b32.xlu1 %v7678_v53, %s8459_s7 }
0x1281   :  { %v2893_v21 = vpop.xlane.xlu0 %2892 }
0x1282   :  { %6374 = vrcp.f32 %v2893_v21 }
0x1285   :  { %v2896_v43 = vpop.xlane.xlu1 %2895 }
0x1286   :  { %6376 = vrcp.f32 %v2896_v43 }
0x1288   :  { %v6373_v13 = vpop.eup %6372 }
0x1289   :  { %v2904_v15 = vmul.f32 %v6373_v13, %v7983_v16  ;;  %v2899_v11 = vpop.xlane.xlu0 %2898  ;;  %v5973_v16 = vpack.c.bf16 %v6191_v56, %v6190_v58 }
0x128a   :  { %6378 = vrcp.f32 %v2899_v11 }
0x128b   :  { %5593 = vmatmul.mubr.msk.f32.vlgmr.msra.gmra.mrb[86].mxu0 %vm871_vm9, %v2904_v15 }
0x128c   :  { %v6375_v53 = vpop.eup %6374  ;;  %5971 = vmatpush3.bf16.msra.mxu0 %v5970_v34  ;;  %5595 = vmatprep.mubr.msk.f32.mxu0 %vm6466_vm6, %v6467_v63 }
0x128d   :  { %v2902_v26 = vpop.xlane.xlu1 %2901  ;;  %5972 = vmatprep.subr.bf16.mxu0 %v6465_v62  ;;  %v2906_v25 = vmul.f32 %v6375_v53, %v7988_v29 }
0x128e   :  { %6380 = vrcp.f32 %v2902_v26 }
0x128f   :  { %5596 = vmatmul.mubr.msk.f32.gmra.mrb[88].mxu0 %vm871_vm9, %v2906_v25 }
0x1290   :  { %v6377_v18 = vpop.eup %6376  ;;  %5974 = vmatpush3.bf16.msra.mxu0 %v5973_v16  ;;  %5598 = vmatprep.mubr.msk.f32.mxu0 %vm6466_vm6, %v6467_v63 }
0x1291   :  { %v3196_v40 = vpop.xlane.xlu1 %3195  ;;  %5640 = vmatprep.subr.mxu0 %v6467_v63  ;;  %v2908_v41 = vmul.f32 %v6377_v18, %v7993_v17 }
0x1292   :  { %6382 = vrcp.f32 %v3196_v40 }
0x1293   :  { %5599 = vmatmul.mubr.msk.f32.gmra.mrb[90].mxu0 %vm871_vm9, %v2908_v41 }
0x1294   :  { %v6379_v36 = vpop.eup %6378  ;;  %5641 = vmatpush3.msk.msra.mxu0 %vm957_vm11, %v7975_v50  ;;  %5601 = vmatprep.mubr.msk.f32.mxu0 %vm6466_vm6, %v6467_v63  ;;  %v6195_v50 = vunpack.i.l.bf16 %v6194_v28 }
0x1295   :  { %v3199_v29 = vpop.xlane.xlu0 %3198  ;;  %v2910_v51 = vmul.f32 %v6379_v36, %v7998_v14  ;;  %5983 = vmatprep.subr.bf16.mxu0 %v6465_v62 }
0x1296   :  { %6384 = vrcp.f32 %v3199_v29  ;;  %v5984_v23 = vpack.c.bf16 %v6196_v4, %v6195_v50 }
0x1297   :  { %5602 = vmatmul.mubr.msk.f32.gmra.mrb[92].mxu0 %vm871_vm9, %v2910_v51 }
0x1298   :  { %v6381_v27 = vpop.eup %6380  ;;  %5604 = vmatprep.mubr.msk.f32.mxu0 %vm6466_vm6, %v6467_v63 }
0x1299   :  { %v3202_v17 = vpop.xlane.xlu1 %3201  ;;  %v2912_v22 = vmul.f32 %v6381_v27, %v8003_v42 }
0x129a   :  { %6386 = vrcp.f32 %v3202_v17 }
0x129b   :  { %5605 = vmatmul.mubr.msk.f32.gmra.mrb[94].mxu0 %vm871_vm9, %v2912_v22 }
0x129c   :  { %v6383_v61 = vpop.eup %6382  ;;  %5642 = vmatprep.mubr.msk.f32.mxu0 %vm6466_vm6, %v6467_v63 }
0x129d   :  { %v3210_v14 = vmul.f32 %v6383_v61, %v8008_v38  ;;  %v3205_v3 = vpop.xlane.xlu1 %3204  ;;  %v5987_v38 = vpack.c.bf16 %v6201_v48, %v6200_v5 }
0x129e   :  { %6388 = vrcp.f32 %v3205_v3 }
0x129f   :  { %5643 = vmatmul.mubr.msk.f32.vlgmr.msra.gmra.mrb[96].mxu0 %vm871_vm9, %v3210_v14 }
0x12a0   :  { %v6385_v42 = vpop.eup %6384  ;;  %5985 = vmatpush3.bf16.msra.mxu0 %v5984_v23  ;;  %5645 = vmatprep.mubr.msk.f32.mxu0 %vm6466_vm6, %v6467_v63 }
0x12a1   :  { %v3208_v32 = vpop.xlane.xlu1 %3207  ;;  %5986 = vmatprep.subr.bf16.mxu0 %v6465_v62  ;;  %v3212_v47 = vmul.f32 %v6385_v42, %v8013_v8 }
0x12a2   :  { %6390 = vrcp.f32 %v3208_v32 }
0x12a3   :  { %5646 = vmatmul.mubr.msk.f32.gmra.mrb[98].mxu0 %vm871_vm9, %v3212_v47 }
0x12a4   :  { %v6387_v35 = vpop.eup %6386  ;;  %5988 = vmatpush3.bf16.msra.mxu0 %v5987_v38  ;;  %5648 = vmatprep.mubr.msk.f32.mxu0 %vm6466_vm6, %v6467_v63 }
0x12a5   :  { %v3214_v30 = vmul.f32 %v6387_v35, %v8018_v9  ;;  %5690 = vmatprep.subr.mxu0 %v6467_v63  ;;  %v3502_v20 = vpop.xlane.xlu0 %3501 }
0x12a6   :  { %6392 = vrcp.f32 %v3502_v20 }
0x12a7   :  { %5649 = vmatmul.mubr.msk.f32.gmra.mrb[100].mxu0 %vm871_vm9, %v3214_v30 }
0x12a8   :  { %v6389_v59 = vpop.eup %6388  ;;  %5651 = vmatprep.mubr.msk.f32.mxu0 %vm6466_vm6, %v6467_v63 }
0x12a9   :  { %v3505_v8 = vpop.xlane.xlu1 %3504  ;;  %v3216_v45 = vmul.f32 %v6389_v59, %v8023_v7 }
0x12aa   :  { %6394 = vrcp.f32 %v3505_v8 }
0x12ab   :  { %5652 = vmatmul.mubr.msk.f32.gmra.mrb[102].mxu0 %vm871_vm9, %v3216_v45 }
0x12ac   :  { %v6391_v46 = vpop.eup %6390  ;;  %5654 = vmatprep.mubr.msk.f32.mxu0 %vm6466_vm6, %v6467_v63 }
0x12ad   :  { %v3508_v28 = vpop.xlane.xlu1 %3507  ;;  %v3218_v9 = vmul.f32 %v6391_v46, %v8028_v0 }
0x12ae   :  { %6396 = vrcp.f32 %v3508_v28 }
0x12af   :  { %5655 = vmatmul.mubr.msk.f32.gmra.mrb[104].mxu0 %vm871_vm9, %v3218_v9 }
0x12b0   :  { %5692 = vmatprep.mubr.msk.f32.mxu0 %vm6466_vm6, %v6467_v63  ;;  %v6393_v43 = vpop.eup %6392 }
0x12b1   :  { %v3511_v2 = vpop.xlane.xlu1 %3510  ;;  %v3516_v39 = vmul.f32 %v6393_v43, %v8033_v19  ;;  %v4844_v43 = vld [vmem:[%s8408_s5 + $0x30] sm:$0xff] }
0x12b2   :  { %6398 = vrcp.f32 %v3511_v2 }
0x12b4   :  { %v6395_v15 = vpop.eup %6394 }
0x12b5   :  { %v3514_v7 = vpop.xlane.xlu1 %3513  ;;  %v3518_v11 = vmul.f32 %v6395_v15, %v8038_v12 }
0x12b6   :  { %6400 = vrcp.f32 %v3514_v7  ;;  %v4842_v7 = vld [vmem:[%s8408_s5 + $0x20] sm:$0xff] }
0x12b8   :  { %v6397_v56 = vpop.eup %6396 }
0x12b9   :  { %v3808_v21 = vpop.xlane.xlu0 %3807  ;;  %v3520_v58 = vmul.f32 %v6397_v56, %v8043_v6 }
0x12ba   :  { %6402 = vrcp.f32 %v3808_v21  ;;  %v4843_v21 = vld [vmem:[%s8408_s5 + $0x28] sm:$0xff] }
0x12bc   :  { %v6399_v34 = vpop.eup %6398 }
0x12bd   :  { %v3811_v1 = vpop.xlane.xlu1 %3810  ;;  %v3534_v13 = vpop.permute.xlu0 %3533  ;;  %v3522_v12 = vmul.f32 %v6399_v34, %v8048_v44 }
0x12be   :  { %5691 = vmatpush3.msk.msra.mxu0 %vm957_vm11, %v3534_v13  ;;  %6404 = vrcp.f32 %v3811_v1  ;;  %v6004_v1 = vpack.c.bf16 %v4843_v21, %v4842_v7  ;;  %v4845_v13 = vld [vmem:[%s8408_s5 + $0x38] sm:$0xff]  ;;  %s8460_s5 = smov 24   ;;  %v4852_v7 = vld [vmem:[%s8409_s6 + $0x1] ss:$0 sm:$0xff] }
0x12bf   :  { %5693 = vmatmul.mubr.msk.f32.vlgmr.msra.gmra.mrb[106].mxu0 %vm871_vm9, %v3516_v39  ;;  %5997 = vmatprep.subr.bf16.mxu0 %v6465_v62  ;;  %v6007_v15 = vpack.c.bf16 %v4845_v13, %v4844_v43 }
0x12c0   :  { %5695 = vmatprep.mubr.msk.f32.mxu0 %vm6466_vm6, %v6467_v63  ;;  %v6401_v18 = vpop.eup %6400  ;;  %6005 = vmatpush3.bf16.msra.mxu1 %v6004_v1 }
0x12c1   :  { %v3814_v0 = vpop.xlane.xlu1 %3813  ;;  %v3524_v36 = vmul.f32 %v6401_v18, %v8053_v54  ;;  %6006 = vmatprep.subr.bf16.mxu1 %v6465_v62 }
0x12c2   :  { %6406 = vrcp.f32 %v3814_v0 }
0x12c3   :  { %5696 = vmatmul.mubr.msk.f32.gmra.mrb[108].mxu0 %vm871_vm9, %v3518_v11 }
0x12c4   :  { %5698 = vmatprep.mubr.msk.f32.mxu0 %vm6466_vm6, %v6467_v63  ;;  %v6403_v51 = vpop.eup %6402  ;;  %6008 = vmatpush3.bf16.msra.mxu1 %v6007_v15 }
0x12c5   :  { %v6204_v19 = vpop.permute.xlu1 %6203  ;;  %v3822_v27 = vmul.f32 %v6403_v51, %v8057_v52  ;;  %6015 = vmatprep.subr.bf16.mxu1 %v6465_v62 }
0x12c6   :  { %v6206_v53 = vunpack.i.h.bf16 %v6204_v19  ;;  %v6205_v26 = vunpack.i.l.bf16 %v6204_v19 }
0x12c7   :  { %5699 = vmatmul.mubr.msk.f32.gmra.mrb[110].mxu0 %vm871_vm9, %v3520_v58 }
0x12c8   :  { %v5998_v25 = vpack.c.bf16 %v6206_v53, %v6205_v26  ;;  %5701 = vmatprep.mubr.msk.f32.mxu0 %vm6466_vm6, %v6467_v63  ;;  %v6405_v22 = vpop.eup %6404 }
0x12c9   :  { %v6209_v16 = vpop.permute.xlu1 %6208  ;;  %v3824_v54 = vmul.f32 %v6405_v22, %v8061_v24 }
0x12ca   :  { %v6211_v40 = vunpack.i.h.bf16 %v6209_v16  ;;  %v6210_v41 = vunpack.i.l.bf16 %v6209_v16  ;;  %5999 = vmatpush3.bf16.msra.mxu0 %v5998_v25 }
0x12cb   :  { %5702 = vmatmul.mubr.msk.f32.gmra.mrb[112].mxu0 %vm871_vm9, %v3522_v12  ;;  %6000 = vmatprep.subr.bf16.mxu0 %v6465_v62 }
0x12cc   :  { %v6001_v6 = vpack.c.bf16 %v6211_v40, %v6210_v41  ;;  %5704 = vmatprep.mubr.msk.f32.mxu0 %vm6466_vm6, %v6467_v63  ;;  %v6407_v4 = vpop.eup %6406 }
0x12cd   :  { %v3826_v52 = vmul.f32 %v6407_v4, %v8065_v57 }
0x12ce   :  { %6002 = vmatpush3.bf16.msra.mxu0 %v6001_v6 }
0x12cf   :  { %5705 = vmatmul.mubr.msk.f32.gmra.mrb[114].mxu0 %vm871_vm9, %v3524_v36  ;;  %5740 = vmatprep.subr.mxu0 %v6467_v63 }
0x12d0   :  { %5742 = vmatprep.mubr.msk.f32.mxu0 %vm6466_vm6, %v6467_v63 }
0x12ee   :  { %v3817_v44 = vpop.xlane.xlu0 %3816 }
0x12ef   :  { %6408 = vrcp.f32 %v3817_v44 }
0x12f9   :  { %v6409_v50 = vpop.eup %6408 }
0x12fa   :  { %v3820_v29 = vpop.xlane.xlu1 %3819  ;;  %v3828_v61 = vmul.f32 %v6409_v50, %v8077_v55 }
0x12fb   :  { %6410 = vrcp.f32 %v3820_v29 }
0x12fe   :  { %v3840_v17 = vpop.permute.xlu1 %3839 }
0x12ff   :  { %5741 = vmatpush3.msk.msra.mxu0 %vm957_vm11, %v3840_v17 }
0x1300   :  { %5743 = vmatmul.mubr.msk.f32.vlgmr.msra.gmra.mrb[116].mxu0 %vm871_vm9, %v3822_v27  ;;  %6009 = vmatprep.subr.bf16.mxu0 %v6465_v62 }
0x1301   :  { %5745 = vmatprep.mubr.msk.f32.mxu0 %vm6466_vm6, %v6467_v63 }
0x1304   :  { %5746 = vmatmul.mubr.msk.f32.gmra.mrb[118].mxu0 %vm871_vm9, %v3824_v54 }
0x1305   :  { %5748 = vmatprep.mubr.msk.f32.mxu0 %vm6466_vm6, %v6467_v63  ;;  %v6411_v14 = vpop.eup %6410 }
0x1306   :  { %v3830_v24 = vmul.f32 %v6411_v14, %v8081_v31 }
0x1308   :  { %5749 = vmatmul.mubr.msk.f32.gmra.mrb[120].mxu0 %vm871_vm9, %v3826_v52 }
0x1309   :  { %5751 = vmatprep.mubr.msk.f32.mxu0 %vm6466_vm6, %v6467_v63 }
0x130c   :  { %5752 = vmatmul.mubr.msk.f32.gmra.mrb[122].mxu0 %vm871_vm9, %v3828_v61 }
0x130d   :  { %5754 = vmatprep.mubr.msk.f32.mxu0 %vm6466_vm6, %v6467_v63 }
0x1310   :  { %5755 = vmatmul.mubr.msk.f32.gmra.mrb[124].mxu0 %vm871_vm9, %v3830_v24 }
0x1311   :  { %5788 = vmatprep.mubr.msk.f32.mxu0 %vm6466_vm6, %v6467_v63 }
0x135e   :  { %v8188_v57 = vpop.f32.mrb[86].mxu0 }
0x135f   :  { %v5594_v3 = vpop.f32.mrb[87].mxu0 }
0x1362   :  { %v8190_v48 = vpop.f32.mrb[88].mxu0 }
0x1363   :  { %v5597_v5 = vpop.f32.mrb[89].mxu0 }
0x1366   :  { %v8192_v55 = vpop.f32.mrb[90].mxu0 }
0x1367   :  { %v5600_v23 = vpop.f32.mrb[91].mxu0 }
0x136a   :  { %v8194_v42 = vpop.f32.mrb[92].mxu0 }
0x136b   :  { %v5603_v32 = vpop.f32.mrb[93].mxu0 }
0x136e   :  { %v8196_v47 = vpop.f32.mrb[94].mxu0 }
0x136f   :  { %v5606_v31 = vpop.f32.mrb[95].mxu0 }
0x1372   :  { %v3316_v38 = vpop.f32.mrb[96].mxu0 }
0x1373   :  { %3957 = vrot.lane.b32.xlu1 %v3316_v38, %s6479_s30  ;;  %v5644_v35 = vpop.f32.mrb[97].mxu0 }
0x1376   :  { %v3321_v30 = vpop.f32.mrb[98].mxu0 }
0x1377   :  { %3959 = vrot.lane.b32.xlu1 %v3321_v30, %s6479_s30  ;;  %v5647_v59 = vpop.f32.mrb[99].mxu0 }
0x137a   :  { %v3326_v8 = vpop.f32.mrb[100].mxu0 }
0x137b   :  { %3961 = vrot.lane.b32.xlu1 %v3326_v8, %s6479_s30  ;;  %v5650_v45 = vpop.f32.mrb[101].mxu0 }
0x137e   :  { %v3331_v46 = vpop.f32.mrb[102].mxu0 }
0x137f   :  { %v5653_v20 = vpop.f32.mrb[103].mxu0 }
0x1382   :  { %v3336_v28 = vpop.f32.mrb[104].mxu0 }
0x1383   :  { %v5656_v9 = vpop.f32.mrb[105].mxu0 }
0x1392   :  { %v3622_v2 = vpop.f32.mrb[106].mxu0 }
0x1393   :  { %3977 = vrot.lane.b32.xlu0 %v3622_v2, %s6480_s0  ;;  %v5694_v39 = vpop.f32.mrb[107].mxu0 }
0x1396   :  { %v3627_v0 = vpop.f32.mrb[108].mxu0 }
0x1397   :  { %3963 = vrot.lane.b32.xlu0 %v3331_v46, %s6479_s30  ;;  %3979 = vrot.lane.b32.xlu1 %v3627_v0, %s6480_s0  ;;  %v5697_v11 = vpop.f32.mrb[109].mxu0 }
0x139a   :  { %v3632_v56 = vpop.f32.mrb[110].mxu0 }
0x139b   :  { %3981 = vrot.lane.b32.xlu0 %v3632_v56, %s6480_s0  ;;  %v5700_v19 = vpop.f32.mrb[111].mxu0 }
0x139e   :  { %v3637_v58 = vpop.f32.mrb[112].mxu0 }
0x139f   :  { %3983 = vrot.lane.b32.xlu1 %v3637_v58, %s6480_s0  ;;  %v5703_v34 = vpop.f32.mrb[113].mxu0 }
0x13a2   :  { %v3642_v53 = vpop.f32.mrb[114].mxu0 }
0x13a3   :  { %v5706_v26 = vpop.f32.mrb[115].mxu0 }
0x13d3   :  { %v3928_v25 = vpop.f32.mrb[116].mxu0 }
0x13d4   :  { %3997 = vrot.lane.b32.xlu1 %v3928_v25, %s8460_s5  ;;  %v5744_v16 = vpop.f32.mrb[117].mxu0 }
0x13d7   :  { %v3933_v12 = vpop.f32.mrb[118].mxu0 }
0x13d8   :  { %3999 = vrot.lane.b32.xlu1 %v3933_v12, %s8460_s5  ;;  %v5747_v18 = vpop.f32.mrb[119].mxu0 }
0x13db   :  { %v3938_v40 = vpop.f32.mrb[120].mxu0 }
0x13dc   :  { %4001 = vrot.lane.b32.xlu1 %v3938_v40, %s8460_s5  ;;  %v5750_v41 = vpop.f32.mrb[121].mxu0 }
0x13df   :  { %v3943_v6 = vpop.f32.mrb[122].mxu0 }
0x13e0   :  { %3965 = vrot.lane.b32.xlu1 %v3336_v28, %s6479_s30  ;;  %4003 = vrot.lane.b32.xlu0 %v3943_v6, %s8460_s5  ;;  %v5753_v36 = vpop.f32.mrb[123].mxu0 }
0x13e3   :  { %v3948_v44 = vpop.f32.mrb[124].mxu0 }
0x13e4   :  { %3985 = vrot.lane.b32.xlu0 %v3642_v53, %s6480_s0  ;;  %4005 = vrot.lane.b32.xlu1 %v3948_v44, %s8460_s5  ;;  %v5756_v29 = vpop.f32.mrb[125].mxu0  ;;  %s4629_s5 = sshll.u32 %s6482_s3, 4  ;;  %s4630_s5 = int_to_ptr.vmem [resolvable:$true] %s4629_s5 }
0x13e5   :  { %v3958_v51 = vpop.permute.xlu1 %3957  ;;  %p6445_p1 = scmp.lt.s32.totalorder %s4630_s5, %s4630_s5 }
0x13e6   :  { %v4012_v52 = vsel %vm760_vm7, %v8188_v57, %v3958_v51 }
0x13e9   :  { %v3960_v27 = vpop.permute.xlu1 %3959 }
0x13ea   :  { %v4013_v3 = vsel %vm760_vm7, %v8190_v48, %v3960_v27 }
0x13ed   :  { %v3962_v17 = vpop.permute.xlu1 %3961 }
0x13ee   :  { %v4014_v31 = vsel %vm760_vm7, %v8192_v55, %v3962_v17 }
0x1405   :  { %v3978_v54 = vpop.permute.xlu0 %3977 }
0x1406   :  { %v4017_v61 = vsel %vm2033_vm12, %v4012_v52, %v3978_v54 }
0x1409   :  { %v3980_v22 = vpop.permute.xlu1 %3979  ;;  %v3964_v50 = vpop.permute.xlu0 %3963 }
0x140a   :  { %v4018_v5 = vsel %vm2033_vm12, %v4013_v3, %v3980_v22  ;;  %v4015_v30 = vsel %vm760_vm7, %v8194_v42, %v3964_v50 }
0x140d   :  { %v3982_v32 = vpop.permute.xlu0 %3981 }
0x140e   :  { %v4019_v38 = vsel %vm2033_vm12, %v4014_v31, %v3982_v32 }
0x1411   :  { %v3984_v4 = vpop.permute.xlu1 %3983 }
0x1412   :  { %v4020_v59 = vsel %vm2033_vm12, %v4015_v30, %v3984_v4  ;;  %v4858_v30 = vld [vmem:[%s8414_s11 + $0x28] sm:$0xff] }
0x1446   :  { %v3998_v14 = vpop.permute.xlu1 %3997 }
0x1447   :  { %v4022_v24 = vsel %vm2039_vm13, %v4017_v61, %v3998_v14 }
0x1448   :  { %5766 = vmatmul.mubr.msk.f32.vlgmr.msra.gmra.mrb[120].mxu1 %vm546_vm4, %v4022_v24 }
0x1449   :  { %5768 = vmatprep.mubr.msk.f32.mxu1 %vm6466_vm6, %v6467_v63 }
0x144a   :  { %v4000_v23 = vpop.permute.xlu1 %3999 }
0x144b   :  { %v4023_v57 = vsel %vm2039_vm13, %v4018_v5, %v4000_v23 }
0x144c   :  { %5769 = vmatmul.mubr.msk.f32.gmra.mrb[122].mxu1 %vm546_vm4, %v4023_v57 }
0x144d   :  { %5771 = vmatprep.mubr.msk.f32.mxu1 %vm6466_vm6, %v6467_v63 }
0x144e   :  { %v4002_v48 = vpop.permute.xlu1 %4001 }
0x144f   :  { %v4024_v35 = vsel %vm2039_vm13, %v4019_v38, %v4002_v48 }
0x1450   :  { %5772 = vmatmul.mubr.msk.f32.gmra.mrb[124].mxu1 %vm546_vm4, %v4024_v35  ;;  %v4857_v35 = vld [vmem:[%s8414_s11 + $0x20] sm:$0xff] }
0x1451   :  { %5774 = vmatprep.mubr.msk.f32.mxu1 %vm6466_vm6, %v6467_v63 }
0x1452   :  { %v3966_v8 = vpop.permute.xlu1 %3965  ;;  %v4004_v55 = vpop.permute.xlu0 %4003 }
0x1453   :  { %v4025_v45 = vsel %vm2039_vm13, %v4020_v59, %v4004_v55  ;;  %v4016_v46 = vsel %vm760_vm7, %v8196_v47, %v3966_v8  ;;  %v6010_v59 = vpack.c.bf16 %v4858_v30, %v4857_v35  ;;  %v4859_v8 = vld [vmem:[%s8414_s11 + $0x30] sm:$0xff]  ;;  %v4860_v55 = vld [vmem:[%s8414_s11 + $0x38] sm:$0xff] }
0x1454   :  { %5775 = vmatmul.mubr.msk.f32.gmra.mrb[126].mxu1 %vm546_vm4, %v4025_v45  ;;  %v6013_v45 = vpack.c.bf16 %v4860_v55, %v4859_v8 }
0x1455   :  { %5777 = vmatprep.mubr.msk.f32.mxu1 %vm6466_vm6, %v6467_v63  ;;  %6011 = vmatpush3.bf16.msra.mxu0 %v6010_v59 }
0x1456   :  { %v3986_v20 = vpop.permute.xlu0 %3985  ;;  %v4006_v28 = vpop.permute.xlu1 %4005  ;;  %6012 = vmatprep.subr.bf16.mxu0 %v6465_v62 }
0x1457   :  { %v4021_v42 = vsel %vm2033_vm12, %v4016_v46, %v3986_v20 }
0x1458   :  { %v4026_v9 = vsel %vm2039_vm13, %v4021_v42, %v4006_v28 }
0x1459   :  { %5778 = vmatmul.mubr.msk.f32.gmra.mrb[128].mxu1 %vm546_vm4, %v4026_v9  ;;  %6014 = vmatpush3.bf16.msra.mxu0 %v6013_v45 }
0x145a   :  { %5819 = vmatprep.mubr.msk.f32.mxu1 %vm6466_vm6, %v6467_v63  ;;  %6027 = vmatprep.subr.bf16.mxu0 %v6465_v62 }
0x151b   :  { %v4113_v2 = vpop.f32.mrb[120].mxu1 }
0x151c   :  { %v4137_v21 = vadd.f32 %v4113_v2, %v7587_v49  ;;  %v5767_v43 = vpop.f32.mrb[121].mxu1 }
0x151e   :  { %v4150_v47 = vadd.f32 %v4852_v7, %v4137_v21 }
0x151f   :  { %v4118_v39 = vpop.f32.mrb[122].mxu1 }
0x1520   :  { %v4138_v1 = vadd.f32 %v4118_v39, %v7592_v33  ;;  %v5770_v13 = vpop.f32.mrb[123].mxu1  ;;  %v4159_v15 = vsel %vm546_vm4, %v4150_v47, 0.0 }
0x1521   :  { %4160 = vadd.xlane.f32.xlu0 %v4159_v15  ;;  %v4855_v13 = vld [vmem:[%s8412_s9 + $0x1] ss:$0 sm:$0xff] }
0x1522   :  { %v4151_v0 = vadd.f32 %v4852_v7, %v4138_v1 }
0x1523   :  { %v4123_v11 = vpop.f32.mrb[124].mxu1 }
0x1524   :  { %v4139_v56 = vadd.f32 %v4123_v11, %v7597_v60  ;;  %v5773_v19 = vpop.f32.mrb[125].mxu1  ;;  %v4162_v58 = vsel %vm546_vm4, %v4151_v0, 0.0  ;;  %v4856_v11 = vld [vmem:[%s8413_s10 + $0x1] ss:$0 sm:$0xff] }
0x1525   :  { %4163 = vadd.xlane.f32.xlu1 %v4162_v58 }
0x1526   :  { %v4152_v34 = vadd.f32 %v4852_v7, %v4139_v56 }
0x1527   :  { %v4128_v53 = vpop.f32.mrb[126].mxu1 }
0x1528   :  { %v4140_v49 = vadd.f32 %v4128_v53, %v7602_v37  ;;  %v5776_v26 = vpop.f32.mrb[127].mxu1  ;;  %v4165_v25 = vsel %vm546_vm4, %v4152_v34, 0.0 }
0x1529   :  { %4166 = vadd.xlane.f32.xlu0 %v4165_v25 }
0x152a   :  { %v4153_v33 = vadd.f32 %v4852_v7, %v4140_v49 }
0x152c   :  { %v4133_v16 = vpop.f32.mrb[128].mxu1  ;;  %v4168_v12 = vsel %vm546_vm4, %v4153_v33, 0.0 }
0x152d   :  { %v4141_v18 = vadd.f32 %v4133_v16, %v7607_v10  ;;  %4169 = vadd.xlane.f32.xlu0 %v4168_v12  ;;  %v5779_v60 = vpop.f32.mrb[129].mxu1 }
0x152f   :  { %v8274_v40 = vadd.f32 %v4852_v7, %v4141_v18 }
0x1531   :  { %v4171_v41 = vsel %vm559_vm5, %v8274_v40, 0.0 }
0x1532   :  { %4172 = vadd.xlane.f32.xlu1 %v4171_v41 }
0x15ae   :  { %v4161_v6 = vpop.xlane.xlu0 %4160 }
0x15af   :  { %v4174_v37 = vmul.f32 0.03125, %v4161_v6 }
0x15b1   :  { %v4179_v36 = vsub.f32 %v4150_v47, %v4174_v37 }
0x15b2   :  { %v4164_v44 = vpop.xlane.xlu1 %4163 }
0x15b3   :  { %v4175_v29 = vmul.f32 0.03125, %v4164_v44  ;;  %v4184_v51 = vmul.f32 %v4179_v36, %v4179_v36 }
0x15b5   :  { %v4180_v27 = vsub.f32 %v4151_v0, %v4175_v29  ;;  %v4189_v17 = vsel %vm546_vm4, %v4184_v51, 0.0 }
0x15b6   :  { %v4167_v22 = vpop.xlane.xlu0 %4166  ;;  %4190 = vadd.xlane.f32.xlu0 %v4189_v17  ;;  %v4868_v17 = vld [vmem:[%s8416_s13 + $0x40] sm:$0xff] }
0x15b7   :  { %v4176_v10 = vmul.f32 0.03125, %v4167_v22  ;;  %v4185_v54 = vmul.f32 %v4180_v27, %v4180_v27  ;;  %v4869_v22 = vld [vmem:[%s8416_s13 + $0x48] sm:$0xff] }
0x15b9   :  { %v4181_v4 = vsub.f32 %v4152_v34, %v4176_v10  ;;  %v4192_v52 = vsel %vm546_vm4, %v4185_v54, 0.0  ;;  %v6016_v10 = vpack.c.bf16 %v4869_v22, %v4868_v17  ;;  %v4870_v54 = vld [vmem:[%s8416_s13 + $0x50] sm:$0xff]  ;;  %v4882_v22 = vld [vmem:[%s8417_s14 + $0x1] ss:$0 sm:$0xff] }
0x15ba   :  { %v4170_v50 = vpop.xlane.xlu0 %4169  ;;  %4193 = vadd.xlane.f32.xlu1 %v4192_v52 }
0x15bb   :  { %v4177_v61 = vmul.f32 0.03125, %v4170_v50  ;;  %v4186_v14 = vmul.f32 %v4181_v4, %v4181_v4  ;;  %6017 = vmatpush3.bf16.msra.mxu1 %v6016_v10  ;;  %v4872_v50 = vld [vmem:[%s8416_s13 + $0x60] sm:$0xff] }
0x15bc   :  { %6018 = vmatprep.subr.bf16.mxu1 %v6465_v62 }
0x15bd   :  { %v4182_v24 = vsub.f32 %v4153_v33, %v4177_v61  ;;  %v4195_v3 = vsel %vm546_vm4, %v4186_v14, 0.0  ;;  %v4873_v61 = vld [vmem:[%s8416_s13 + $0x68] sm:$0xff] }
0x15be   :  { %4196 = vadd.xlane.f32.xlu0 %v4195_v3  ;;  %v6022_v14 = vpack.c.bf16 %v4873_v61, %v4872_v50  ;;  %v4875_v3 = vld [vmem:[%s8416_s13 + $0x78] sm:$0xff] }
0x15bf   :  { %v4173_v5 = vpop.xlane.xlu1 %4172  ;;  %v4187_v23 = vmul.f32 %v4182_v24, %v4182_v24 }
0x15c0   :  { %v4178_v32 = vmul.f32 0.03125, %v4173_v5 }
0x15c1   :  { %v4198_v57 = vsel %vm546_vm4, %v4187_v23, 0.0  ;;  %v4862_v23 = vld [vmem:[%s8415_s12 + $0x1] ss:$0 sm:$0xff] }
0x15c2   :  { %v4183_v31 = vsub.f32 %v8274_v40, %v4178_v32  ;;  %4199 = vadd.xlane.f32.xlu1 %v4198_v57 }
0x15c4   :  { %v4188_v38 = vmul.f32 %v4183_v31, %v4183_v31 }
0x15c6   :  { %v4201_v48 = vsel %vm559_vm5, %v4188_v38, 0.0 }
0x15c7   :  { %4202 = vadd.xlane.f32.xlu0 %v4201_v48 }
0x1643   :  { %v4191_v46 = vpop.xlane.xlu0 %4190 }
0x1644   :  { %v4204_v20 = vmul.f32 0.03125, %v4191_v46 }
0x1646   :  { %v4209_v28 = vadd.f32 1e-05, %v4204_v20 }
0x1647   :  { %v4194_v42 = vpop.xlane.xlu1 %4193 }
0x1648   :  { %6412 = vrsqrt.f32 %v4209_v28  ;;  %v4205_v9 = vmul.f32 0.03125, %v4194_v42 }
0x164a   :  { %v4210_v2 = vadd.f32 1e-05, %v4205_v9 }
0x164b   :  { %v4197_v7 = vpop.xlane.xlu0 %4196 }
0x164c   :  { %6414 = vrsqrt.f32 %v4210_v2  ;;  %v4206_v21 = vmul.f32 0.03125, %v4197_v7 }
0x164e   :  { %v4211_v43 = vadd.f32 1e-05, %v4206_v21 }
0x164f   :  { %v4200_v47 = vpop.xlane.xlu1 %4199 }
0x1650   :  { %6416 = vrsqrt.f32 %v4211_v43  ;;  %v4207_v39 = vmul.f32 0.03125, %v4200_v47 }
0x1652   :  { %v6413_v1 = vpop.eup %6412  ;;  %v4212_v15 = vadd.f32 1e-05, %v4207_v39 }
0x1653   :  { %v4219_v0 = vmul.f32 %v6413_v1, %v4179_v36 }
0x1654   :  { %6418 = vrsqrt.f32 %v4212_v15  ;;  %v4203_v56 = vpop.xlane.xlu0 %4202 }
0x1655   :  { %v4230_v19 = vmul.f32 %v4855_v13, %v4219_v0  ;;  %v4208_v58 = vmul.f32 0.03125, %v4203_v56 }
0x1656   :  { %v6415_v34 = vpop.eup %6414 }
0x1657   :  { %v4241_v53 = vadd.f32 %v4856_v11, %v4230_v19  ;;  %v4213_v49 = vadd.f32 1e-05, %v4208_v58  ;;  %v4220_v26 = vmul.f32 %v6415_v34, %v4180_v27 }
0x1659   :  { %6420 = vrsqrt.f32 %v4213_v49  ;;  %5789 = vmatmul.mubr.msk.f32.vlgmr.msra.gmra.mrb[126].mxu0 %vm546_vm4, %v4241_v53  ;;  %v4231_v25 = vmul.f32 %v4855_v13, %v4220_v26 }
0x165a   :  { %v6417_v33 = vpop.eup %6416  ;;  %5791 = vmatprep.mubr.msk.f32.mxu0 %vm6466_vm6, %v6467_v63 }
0x165b   :  { %v4242_v16 = vadd.f32 %v4856_v11, %v4231_v25  ;;  %v4221_v12 = vmul.f32 %v6417_v33, %v4181_v4  ;;  %v4871_v4 = vld [vmem:[%s8416_s13 + $0x58] sm:$0xff] }
0x165c   :  { %v6019_v52 = vpack.c.bf16 %v4871_v4, %v4870_v54 }
0x165d   :  { %5792 = vmatmul.mubr.msk.f32.gmra.mrb[128].mxu0 %vm546_vm4, %v4242_v16  ;;  %v4232_v18 = vmul.f32 %v4855_v13, %v4221_v12 }
0x165e   :  { %v6419_v60 = vpop.eup %6418  ;;  %5794 = vmatprep.mubr.msk.f32.mxu0 %vm6466_vm6, %v6467_v63  ;;  %6020 = vmatpush3.bf16.msra.mxu1 %v6019_v52 }
0x165f   :  { %v4243_v41 = vadd.f32 %v4856_v11, %v4232_v18  ;;  %v4222_v6 = vmul.f32 %v6419_v60, %v4182_v24  ;;  %6021 = vmatprep.subr.bf16.mxu1 %v6465_v62  ;;  %v4874_v24 = vld [vmem:[%s8416_s13 + $0x70] sm:$0xff] }
0x1660   :  { %v6025_v5 = vpack.c.bf16 %v4875_v3, %v4874_v24  ;;  %v4538_v3 = vld [vmem:[%s8420_s17] sm:$0xff] }
0x1661   :  { %5795 = vmatmul.mubr.msk.f32.gmra.mrb[130].mxu0 %vm546_vm4, %v4243_v41  ;;  %v4233_v37 = vmul.f32 %v4855_v13, %v4222_v6 }
0x1662   :  { %5797 = vmatprep.mubr.msk.f32.mxu0 %vm6466_vm6, %v6467_v63  ;;  %6023 = vmatpush3.bf16.msra.mxu1 %v6022_v14 }
0x1663   :  { %v6421_v36 = vpop.eup %6420  ;;  %v4244_v44 = vadd.f32 %v4856_v11, %v4233_v37  ;;  %6024 = vmatprep.subr.bf16.mxu1 %v6465_v62 }
0x1664   :  { %v4223_v29 = vmul.f32 %v6421_v36, %v4183_v31 }
0x1665   :  { %5798 = vmatmul.mubr.msk.f32.gmra.mrb[132].mxu0 %vm546_vm4, %v4244_v44 }
0x1666   :  { %5800 = vmatprep.mubr.msk.f32.mxu0 %vm6466_vm6, %v6467_v63  ;;  %v4234_v51 = vmul.f32 %v4855_v13, %v4223_v29  ;;  %6026 = vmatpush3.bf16.msra.mxu1 %v6025_v5 }
0x1668   :  { %v4245_v27 = vadd.f32 %v4856_v11, %v4234_v51 }
0x166a   :  { %5801 = vmatmul.mubr.msk.f32.gmra.mrb[134].mxu0 %vm546_vm4, %v4245_v27 }
0x166b   :  { %5842 = vmatprep.mubr.msk.f32.mxu0 %vm6466_vm6, %v6467_v63 }
0x172c   :  { %v4340_v32 = vpop.f32.mrb[126].mxu0 }
0x172d   :  { %v4341_v57 = vadd.f32 %v4862_v23, %v4340_v32  ;;  %v5790_v31 = vpop.f32.mrb[127].mxu0  ;;  %v4541_v32 = vld [vmem:[%s8420_s17 + $0x18] sm:$0xff] }
0x172f   :  { %v4369_v38 = vmul.f32 0.70710677, %v4341_v57  ;;  %v4364_v7 = vmul.f32 0.5, %v4341_v57 }
0x1730   :  { %v4345_v48 = vpop.f32.mrb[128].mxu0 }
0x1731   :  { %6422 = verf.f32 %v4369_v38  ;;  %v4346_v35 = vadd.f32 %v4862_v23, %v4345_v48  ;;  %v5793_v30 = vpop.f32.mrb[129].mxu0 }
0x1732   :  { %v4883_v30 = vld [vmem:[%s8418_s15] ss:$0 sm:$0xff]  ;;  %s6440_s15 = scalar_lea.vmem %s4630_s5, 32 }
0x1733   :  { %v4370_v59 = vmul.f32 0.70710677, %v4346_v35  ;;  %v4365_v15 = vmul.f32 0.5, %v4346_v35  ;;  %p6441_p0 = scmp.ne.s32.totalorder %s4630_s5, %s6440_s15  ;;  %p6446_p2 = scmp.lt.s32.totalorder %s6440_s15, %s6440_s15 }
0x1734   :  { %v4350_v8 = vpop.f32.mrb[130].mxu0 }
0x1735   :  { %6424 = verf.f32 %v4370_v59  ;;  %v4351_v55 = vadd.f32 %v4862_v23, %v4350_v8  ;;  %v5796_v45 = vpop.f32.mrb[131].mxu0  ;;  %v4884_v59 = vld [vmem:[%s8419_s16] ss:$0 sm:$0xff]  ;;  %p6447_p3 = por %p6446_p2, %p6445_p1 }
0x1736   :  { %v4885_v45 = vld [vmem:[%s8421_s18] ss:$0 sm:$0xff] }
0x1737   :  { %v4371_v46 = vmul.f32 0.70710677, %v4351_v55  ;;  %v4366_v58 = vmul.f32 0.5, %v4351_v55  ;;  %p6448_p4 = pnand %p6447_p3, %p6441_p0 }
0x1738   :  { %v4355_v20 = vpop.f32.mrb[132].mxu0 }
0x1739   :  { %6426 = verf.f32 %v4371_v46  ;;  %v4356_v28 = vadd.f32 %v4862_v23, %v4355_v20  ;;  %v5799_v42 = vpop.f32.mrb[133].mxu0 }
0x173b   :  { %v6423_v9 = vpop.eup %6422  ;;  %v4372_v2 = vmul.f32 0.70710677, %v4356_v28  ;;  %v4367_v26 = vmul.f32 0.5, %v4356_v28 }
0x173c   :  { %v4379_v21 = vadd.f32 1.0, %v6423_v9 }
0x173d   :  { %6428 = verf.f32 %v4372_v2  ;;  %v4360_v43 = vpop.f32.mrb[134].mxu0 }
0x173e   :  { %v4384_v47 = vmul.f32 %v4379_v21, %v4364_v7  ;;  %v4361_v39 = vadd.f32 %v4862_v23, %v4360_v43  ;;  %v5802_v1 = vpop.f32.mrb[135].mxu0  ;;  %v4540_v23 = vld [vmem:[%s8420_s17 + $0x10] sm:$0xff] }
0x173f   :  { %v6425_v13 = vpop.eup %6424  ;;  %v6031_v57 = vpack.c.bf16 %v4541_v32, %v4540_v23 }
0x1740   :  { %v4380_v0 = vadd.f32 1.0, %v6425_v13  ;;  %v4373_v11 = vmul.f32 0.70710677, %v4361_v39  ;;  %5820 = vmatmul.mubr.msk.f32.vlgmr.msra.gmra.mrb[130].mxu1 %vm2409_vm14, %v4384_v47  ;;  %v4368_v12 = vmul.f32 0.5, %v4361_v39 }
0x1741   :  { %5822 = vmatprep.mubr.msk.f32.mxu1 %vm6466_vm6, %v6467_v63 }
0x1742   :  { %v4385_v56 = vmul.f32 %v4380_v0, %v4365_v15  ;;  %6430 = verf.f32 %v4373_v11 }
0x1743   :  { %v6427_v19 = vpop.eup %6426 }
0x1744   :  { %v4381_v34 = vadd.f32 1.0, %v6427_v19  ;;  %5823 = vmatmul.mubr.msk.f32.gmra.mrb[132].mxu1 %vm2409_vm14, %v4385_v56 }
0x1745   :  { %5825 = vmatprep.mubr.msk.f32.mxu1 %vm6466_vm6, %v6467_v63 }
0x1746   :  { %v4386_v53 = vmul.f32 %v4381_v34, %v4366_v58 }
0x1747   :  { %v6429_v49 = vpop.eup %6428 }
0x1748   :  { %v4382_v25 = vadd.f32 1.0, %v6429_v49  ;;  %5826 = vmatmul.mubr.msk.f32.gmra.mrb[134].mxu1 %vm2409_vm14, %v4386_v53 }
0x1749   :  { %5828 = vmatprep.mubr.msk.f32.mxu1 %vm6466_vm6, %v6467_v63 }
0x174a   :  { %v4387_v33 = vmul.f32 %v4382_v25, %v4367_v26 }
0x174c   :  { %v6431_v16 = vpop.eup %6430  ;;  %5829 = vmatmul.mubr.msk.f32.gmra.mrb[136].mxu1 %vm2409_vm14, %v4387_v33 }
0x174d   :  { %v4383_v18 = vadd.f32 1.0, %v6431_v16  ;;  %5831 = vmatprep.mubr.msk.f32.mxu1 %vm6466_vm6, %v6467_v63 }
0x174f   :  { %v4388_v60 = vmul.f32 %v4383_v18, %v4368_v12 }
0x1751   :  { %5832 = vmatmul.mubr.msk.f32.gmra.mrb[138].mxu1 %vm2409_vm14, %v4388_v60 }
0x1813   :  { %v4479_v41 = vpop.f32.mrb[130].mxu1 }
0x1814   :  { %v5821_v6 = vpop.f32.mrb[131].mxu1 }
0x1817   :  { %v4483_v37 = vpop.f32.mrb[132].mxu1 }
0x1818   :  { %v5824_v36 = vpop.f32.mrb[133].mxu1 }
0x181b   :  { %v4487_v44 = vpop.f32.mrb[134].mxu1 }
0x181c   :  { %v5827_v29 = vpop.f32.mrb[135].mxu1 }
0x181f   :  { %v4491_v51 = vpop.f32.mrb[136].mxu1 }
0x1820   :  { %v5830_v27 = vpop.f32.mrb[137].mxu1 }
0x1824   :  { %v4495_v17 = vpop.f32.mrb[138].mxu1 }
0x1825   :  { %v4499_v10 = vadd.f32 %v4495_v17, %v8274_v40  ;;  %v5833_v54 = vpop.f32.mrb[139].mxu1  ;;  %v4539_v40 = vld [vmem:[%s8420_s17 + $0x8] sm:$0xff] }
0x1826   :  { %v6028_v5 = vpack.c.bf16 %v4539_v40, %v4538_v3 }
0x1827   :  { %v4508_v63 = vadd.f32 %v4882_v22, %v4499_v10 }
0x1828   :  { %6029 = vmatpush3.bf16.msra.mxu0 %v6028_v5 }
0x1829   :  { %v4511_v4 = vsel %vm559_vm5, %v4508_v63, 0.0  ;;  %6030 = vmatprep.subr.bf16.mxu0 %v6465_v62 }
0x182a   :  { %4512 = vadd.xlane.f32.xlu1 %v4511_v4 }
0x182c   :  { %6032 = vmatpush3.bf16.msra.mxu0 %v6031_v57 }
0x18b7   :  { %v4513_v52 = vpop.xlane.xlu1 %4512 }
0x18b8   :  { %v4514_v50 = vmul.f32 0.03125, %v4513_v52 }
0x18ba   :  { %v4515_v61 = vsub.f32 %v4508_v63, %v4514_v50 }
0x18bc   :  { %v4516_v14 = vmul.f32 %v4515_v61, %v4515_v61 }
0x18be   :  { %v4517_v24 = vsel %vm559_vm5, %v4516_v14, 0.0 }
0x18bf   :  { %4518 = vadd.xlane.f32.xlu0 %v4517_v24 }
0x194c   :  { %v4519_v31 = vpop.xlane.xlu0 %4518 }
0x194d   :  { %v4520_v38 = vmul.f32 0.03125, %v4519_v31 }
0x194f   :  { %v4521_v48 = vadd.f32 1e-05, %v4520_v38 }
0x1951   :  { %6432 = vrsqrt.f32 %v4521_v48 }
0x195b   :  { %v6433_v35 = vpop.eup %6432 }
0x195c   :  { %v4523_v62 = vmul.f32 %v6433_v35, %v4515_v61 }
0x195e   :  { %v4530_v8 = vmul.f32 %v4883_v30, %v4523_v62 }
0x1960   :  { %v4537_v55 = vadd.f32 %v4884_v59, %v4530_v8 }
0x1962   :  { %5843 = vmatmul.mubr.msk.f32.vlgmr.msra.gmra.mrb[136].mxu0 %vm546_vm4, %v4537_v55 }
0x1a35   :  { %v4618_v46 = vpop.f32.mrb[136].mxu0 }
0x1a36   :  { %v4619_v20 = vadd.f32 %v4885_v45, %v4618_v46  ;;  %v5844_v28 = vpop.f32.mrb[137].mxu0 }
0x1a38   :  { %4622 = vst [vmem:[#allocation2] sm:$0x3] %v4619_v20 }
0x1a39   :  { %6451 = shalt.err (!%p6448_p4)
}
0x1a3a   :  { %s6452_s0 = scalar_lea.hbm %s8422_s19, 32 }
0x1a3b   :  { %p6453_p5 = scmp.ne.s32.totalorder %s8422_s19, %s6452_s0  ;;  %p6456_p6 = scmp.lt.u32.totalorder %s6452_s0, %s8422_s19 }
0x1a3d   :  { %p6458_p7 = pnand %p6456_p6, %p6453_p5 }
0x1a3f   :  { %6461 = shalt.err (!%p6458_p7)
}
0x1a40   :  { %4632 = dma.vmem_to_hbm [thread:$0]  %s4630_s5, 32, %s8422_s19, [#allocation3]  }
0x1a41   :  { %6462 = dma.done.wait [#allocation3], 32  }
0x1a42   :  { %6463 = vsyncadd [#allocation3], 4294967264 }
0x1a43   :  { %4636 = vsyncpa [#allocation3], 1 }

</bundles_post_ra>
